<compile_context>
chip_gen: v5e
topology: v5e:2x2
jax: 0.10.0
libtpu: 0.0.40
codegen_flags: <defaults>
</compile_context>

<pallas_src>
import jax
import jax.numpy as jnp
from jax.experimental import pallas as pl
from jax.experimental.pallas import tpu as pltpu


def _encoder_kernel(y_ref, x_ref,
                    We_whT_ref, We_wcT_ref, We_b_ref, ve_ref,
                    WihT_ref, WhhT_ref, bias_ref,
                    out_ref):
    Bt, T, N = x_ref.shape
    M = WhhT_ref.shape[0]

    # Loop-invariant loads hoisted out of the (fully unrolled) time loop.
    y = y_ref[...]                      # (Bt, N, T)  precomputed U_e(inputs.permute(0,2,1))
    x = x_ref[...]                      # (Bt, T, N)  raw inputs tile, loaded once
    We_whT = We_whT_ref[...]            # (M, T)
    We_wcT = We_wcT_ref[...]            # (M, T)
    We_b = We_b_ref[...]                # (1, T)
    ve = ve_ref[...][None, :, :]        # (1, 1, T)
    WihT = WihT_ref[...]                # (N, 4M)  fused, lane-dense, gate order i,f,g,o
    WhhT = WhhT_ref[...]                # (M, 4M)
    bias = bias_ref[...]                # (1, 4M)

    h = jnp.zeros((Bt, M), jnp.float32)
    c = jnp.zeros((Bt, M), jnp.float32)

    # T is small and static -> unrolled straight-line code, all indexing static.
    for t in range(T):
        # x_t = W_e(cat(h, s)) : (Bt, T)  (concat replaced by split-weight matmuls)
        xw = (jnp.dot(h, We_whT, preferred_element_type=jnp.float32)
              + jnp.dot(c, We_wcT, preferred_element_type=jnp.float32)
              + We_b)

        # z = tanh(x_t.repeat + y);  e = v_e(z) : (Bt, N)
        z = jnp.tanh(xw[:, None, :] + y)
        e = jnp.sum(z * ve, axis=-1)

        # alpha = softmax(e, dim=1)  (exact EUP reciprocal, no VALU divide)
        e = e - jnp.max(e, axis=1, keepdims=True)
        ee = jnp.exp(e)
        alpha = ee * pl.reciprocal(jnp.sum(ee, axis=1, keepdims=True), approx=False)

        # weighted inputs + LSTMCell update, fused lane-dense gate matmul.
        wx = alpha * x[:, t, :]                                 # (Bt, N)

        gates = jnp.dot(wx, WihT, preferred_element_type=jnp.float32)
        gates = gates + jnp.dot(h, WhhT, preferred_element_type=jnp.float32)
        gates = gates + bias                                    # (Bt, 4M)

        sig = jax.nn.sigmoid(gates)                             # 1 EUP pass over 4M lanes
        i_g = sig[:, 0 * M:1 * M]
        f_g = sig[:, 1 * M:2 * M]
        o_g = sig[:, 3 * M:4 * M]
        g_g = jnp.tanh(gates[:, 2 * M:3 * M])                   # 1 EUP pass, g block only

        c = f_g * c + i_g * g_g
        h = o_g * jnp.tanh(c)

        # Lane-dense output slab: encoded[:, t, :] lives at lanes [t*M, (t+1)*M).
        out_ref[:, t * M:(t + 1) * M] = h


def _pick_b_tile(B_pad):
    """Largest multiple-of-8 divisor of B_pad, capped at 128 rows, keeping >= 2
    grid steps when the batch allows it (v7x megacore sharding)."""
    K = B_pad // 8
    max_units = min(K if K < 2 else K // 2, 128 // 8)
    best = 1
    for d in range(1, max_units + 1):
        if K % d == 0:
            best = d
    return best * 8


def input_attention_encoder(inputs, params, *, b_tile=None):
    """inputs: (B, T, N) float32 -> encoded: (B, T, M) float32."""
    B, T, N = inputs.shape
    M = params["Whh"].shape[1]

    # Pad batch to a multiple of 8 (sublane alignment, uniform tiling).
    B_pad = -(-B // 8) * 8
    if B_pad != B:
        inputs_p = jnp.concatenate(
            [inputs, jnp.zeros((B_pad - B, T, N), inputs.dtype)], axis=0)
    else:
        inputs_p = inputs

    if b_tile is None:
        b_tile = _pick_b_tile(B_pad)
    assert B_pad % b_tile == 0, "b_tile must divide the padded batch"
    nb = B_pad // b_tile

    # Hoist the t-invariant attention matmul out of the recurrence:
    # y[b, n, s] = sum_t Ue_w[s, t] * inputs[b, t, n]   (computed once by XLA)
    y = jnp.einsum('btn,st->bns', inputs_p, params["Ue_w"]).astype(jnp.float32)

    # W_e split so cat(h, c) is never materialized (Linear applies x @ W.T).
    We_whT = params["We_w"][:, :M].T            # (M, T)
    We_wcT = params["We_w"][:, M:].T            # (M, T)
    We_b = params["We_b"].reshape(1, T)         # (1, T)
    ve = params["ve_w"].reshape(1, T)           # (1, T)

    # Fused, lane-dense LSTMCell weights (PyTorch gate order i, f, g, o preserved
    # as column blocks of the transposed matrices).
    WihT = params["Wih"].T                                   # (N, 4M)
    WhhT = params["Whh"].T                                   # (M, 4M)
    bias = (params["b_ih"] + params["b_hh"]).reshape(1, 4 * M)

    c2 = lambda b: (0, 0)

    out = pl.pallas_call(
        _encoder_kernel,
        out_shape=jax.ShapeDtypeStruct((B_pad, T * M), jnp.float32),
        grid_spec=pltpu.PrefetchScalarGridSpec(
            num_scalar_prefetch=0,
            grid=(nb,),
            in_specs=[
                pl.BlockSpec((b_tile, N, T), lambda b: (b, 0, 0)),   # y (precomputed)
                pl.BlockSpec((b_tile, T, N), lambda b: (b, 0, 0)),   # inputs
                pl.BlockSpec((M, T), c2),                            # We_whT
                pl.BlockSpec((M, T), c2),                            # We_wcT
                pl.BlockSpec((1, T), c2),                            # We_b
                pl.BlockSpec((1, T), c2),                            # ve
                pl.BlockSpec((N, 4 * M), c2),                        # WihT (fused)
                pl.BlockSpec((M, 4 * M), c2),                        # WhhT (fused)
                pl.BlockSpec((1, 4 * M), c2),                        # bias (fused)
            ],
            out_specs=pl.BlockSpec((b_tile, T * M), lambda b: (b, 0)),
        ),
        compiler_params=pltpu.CompilerParams(
            dimension_semantics=("parallel",),
            vmem_limit_bytes=32 * 1024 * 1024),
    )(y, inputs_p, We_whT, We_wcT, We_b, ve, WihT, WhhT, bias)

    # Strip batch padding, split the lane-dense slab back into (T, M).
    return out[:B].reshape(B, T, M)


def reference_encoder(inputs, params):
    """Pure-JAX reference mirroring the PyTorch forward exactly."""
    B, T, N = inputs.shape
    M = params["Whh"].shape[1]
    h = jnp.zeros((B, M), jnp.float32)
    c = jnp.zeros((B, M), jnp.float32)
    xp = jnp.transpose(inputs, (0, 2, 1))
    outs = []
    for t in range(T):
        hc = jnp.concatenate([h, c], axis=1)
        xw = hc @ params["We_w"].T + params["We_b"]
        y = jnp.einsum('bnt,st->bns', xp, params["Ue_w"])
        z = jnp.tanh(xw[:, None, :] + y)
        e = jnp.einsum('bnt,ot->bno', z, params["ve_w"])[..., 0]
        alpha = jax.nn.softmax(e, axis=1)
        wx = alpha * inputs[:, t, :]
        gates = (wx @ params["Wih"].T + h @ params["Whh"].T
                 + params["b_ih"] + params["b_hh"])
        i = jax.nn.sigmoid(gates[:, :M])
        f = jax.nn.sigmoid(gates[:, M:2 * M])
        g = jnp.tanh(gates[:, 2 * M:3 * M])
        o = jax.nn.sigmoid(gates[:, 3 * M:])
        c = f * c + i * g
        h = o * jnp.tanh(c)
        outs.append(h)
    return jnp.stack(outs, axis=1)


def init_params(key, N, M, T):
    ks = jax.random.split(key, 8)
    u = lambda k, shape, bound: jax.random.uniform(
        k, shape, jnp.float32, minval=-bound, maxval=bound)
    bW = 1.0 / jnp.sqrt(2.0 * M)   # W_e: Linear(2M -> T)
    bU = 1.0 / jnp.sqrt(1.0 * T)   # U_e, v_e: Linear(T -> *)
    bL = 1.0 / jnp.sqrt(1.0 * M)   # LSTMCell default init
    return {
        "We_w": u(ks[0], (T, 2 * M), bW),
        "We_b": u(ks[1], (T,), bW),
        "Ue_w": u(ks[2], (T, T), bU),
        "ve_w": u(ks[3], (1, T), bU),
        "Wih":  u(ks[4], (4 * M, N), bL),
        "Whh":  u(ks[5], (4 * M, M), bL),
        "b_ih": u(ks[6], (4 * M,), bL),
        "b_hh": u(ks[7], (4 * M,), bL),
    }


if __name__ == "__main__":
    B, T, N, M = 2, 8, 4, 32
    key = jax.random.PRNGKey(0)
    k_in, k_par = jax.random.split(key)
    inputs = jax.random.normal(k_in, (B, T, N), jnp.float32)
    params = init_params(k_par, N, M, T)

    out = jax.block_until_ready(input_attention_encoder(inputs, params))
    ref = jax.block_until_ready(reference_encoder(inputs, params))

    assert out.shape == (B, T, M)
    max_err = float(jnp.max(jnp.abs(out - ref)))
    assert jnp.allclose(out, ref, atol=1e-4, rtol=1e-4), max_err
    print("KERNEL_OK")
</pallas_src>

<mosaic_0001>
module attributes {stable_mosaic.version = 11 : i64} {
  func.func @_encoder_kernel(%arg0: i32, %arg1: memref<8x4x8xf32, #tpu.memory_space<vmem>>, %arg2: memref<8x8x4xf32, #tpu.memory_space<vmem>>, %arg3: memref<32x8xf32, #tpu.memory_space<vmem>>, %arg4: memref<32x8xf32, #tpu.memory_space<vmem>>, %arg5: memref<1x8xf32, #tpu.memory_space<vmem>>, %arg6: memref<1x8xf32, #tpu.memory_space<vmem>>, %arg7: memref<4x128xf32, #tpu.memory_space<vmem>>, %arg8: memref<32x128xf32, #tpu.memory_space<vmem>>, %arg9: memref<1x128xf32, #tpu.memory_space<vmem>>, %arg10: memref<8x256xf32, #tpu.memory_space<vmem>>) attributes {dimension_semantics = [#tpu.dimension_semantics<parallel>], iteration_bounds = array<i64: 1>, scalar_prefetch = 0 : i64, scratch_operands = 0 : i64, tpu.core_type = #tpu.core_type<tc>, window_params = [{transform_indices = @transform_0, window_bounds = array<i64: 8, 4, 8>}, {transform_indices = @transform_1, window_bounds = array<i64: 8, 8, 4>}, {pipeline_mode = #tpu.pipeline_mode<synchronous>, transform_indices = @transform_2, window_bounds = array<i64: 32, 8>}, {pipeline_mode = #tpu.pipeline_mode<synchronous>, transform_indices = @transform_3, window_bounds = array<i64: 32, 8>}, {pipeline_mode = #tpu.pipeline_mode<synchronous>, transform_indices = @transform_4, window_bounds = array<i64: 1, 8>}, {pipeline_mode = #tpu.pipeline_mode<synchronous>, transform_indices = @transform_5, window_bounds = array<i64: 1, 8>}, {pipeline_mode = #tpu.pipeline_mode<synchronous>, transform_indices = @transform_6, window_bounds = array<i64: 4, 128>}, {pipeline_mode = #tpu.pipeline_mode<synchronous>, transform_indices = @transform_7, window_bounds = array<i64: 32, 128>}, {pipeline_mode = #tpu.pipeline_mode<synchronous>, transform_indices = @transform_8, window_bounds = array<i64: 1, 128>}, {transform_indices = @transform_9, window_bounds = array<i64: 8, 256>}]} {
    %c0 = arith.constant 0 : index
    %c0_0 = arith.constant 0 : index
    %c0_1 = arith.constant 0 : index
    %0 = vector.load %arg1[%c0, %c0_0, %c0_1] : memref<8x4x8xf32, #tpu.memory_space<vmem>>, vector<8x4x8xf32>
    %c0_2 = arith.constant 0 : index
    %c0_3 = arith.constant 0 : index
    %c0_4 = arith.constant 0 : index
    %1 = vector.load %arg2[%c0_2, %c0_3, %c0_4] : memref<8x8x4xf32, #tpu.memory_space<vmem>>, vector<8x8x4xf32>
    %c0_5 = arith.constant 0 : index
    %c0_6 = arith.constant 0 : index
    %2 = vector.load %arg3[%c0_5, %c0_6] : memref<32x8xf32, #tpu.memory_space<vmem>>, vector<32x8xf32>
    %c0_7 = arith.constant 0 : index
    %c0_8 = arith.constant 0 : index
    %3 = vector.load %arg4[%c0_7, %c0_8] : memref<32x8xf32, #tpu.memory_space<vmem>>, vector<32x8xf32>
    %c0_9 = arith.constant 0 : index
    %c0_10 = arith.constant 0 : index
    %4 = vector.load %arg5[%c0_9, %c0_10] : memref<1x8xf32, #tpu.memory_space<vmem>>, vector<1x8xf32>
    %c0_11 = arith.constant 0 : index
    %c0_12 = arith.constant 0 : index
    %5 = vector.load %arg6[%c0_11, %c0_12] : memref<1x8xf32, #tpu.memory_space<vmem>>, vector<1x8xf32>
    %6 = vector.shape_cast %5 : vector<1x8xf32> to vector<1x1x8xf32>
    %c0_13 = arith.constant 0 : index
    %c0_14 = arith.constant 0 : index
    %7 = vector.load %arg7[%c0_13, %c0_14] : memref<4x128xf32, #tpu.memory_space<vmem>>, vector<4x128xf32>
    %c0_15 = arith.constant 0 : index
    %c0_16 = arith.constant 0 : index
    %8 = vector.load %arg8[%c0_15, %c0_16] : memref<32x128xf32, #tpu.memory_space<vmem>>, vector<32x128xf32>
    %c0_17 = arith.constant 0 : index
    %c0_18 = arith.constant 0 : index
    %9 = vector.load %arg9[%c0_17, %c0_18] : memref<1x128xf32, #tpu.memory_space<vmem>>, vector<1x128xf32>
    %cst = arith.constant 0.000000e+00 : f32
    %10 = vector.broadcast %cst : f32 to vector<8x32xf32>
    %cst_19 = arith.constant 0.000000e+00 : f32
    %11 = vector.broadcast %cst_19 : f32 to vector<8x32xf32>
    %cst_20 = arith.constant dense<0.000000e+00> : vector<8x8xf32>
    %12 = tpu.matmul %10, %2, %cst_20 {dimension_numbers = #tpu.dot_dimension_numbers<[1], [0], [0], [1], [0, 0, 1, 1], [], []>} : vector<8x32xf32>, vector<32x8xf32>, vector<8x8xf32> -> vector<8x8xf32>
    %cst_21 = arith.constant dense<0.000000e+00> : vector<8x8xf32>
    %13 = tpu.matmul %11, %3, %cst_21 {dimension_numbers = #tpu.dot_dimension_numbers<[1], [0], [0], [1], [0, 0, 1, 1], [], []>} : vector<8x32xf32>, vector<32x8xf32>, vector<8x8xf32> -> vector<8x8xf32>
    %14 = arith.addf %12, %13 : vector<8x8xf32>
    %15 = vector.broadcast %4 : vector<1x8xf32> to vector<8x8xf32>
    %16 = arith.addf %14, %15 : vector<8x8xf32>
    %17 = vector.shape_cast %16 : vector<8x8xf32> to vector<8x1x8xf32>
    %18 = vector.broadcast %17 : vector<8x1x8xf32> to vector<8x4x8xf32>
    %19 = arith.addf %18, %0 : vector<8x4x8xf32>
    %20 = math.tanh %19 : vector<8x4x8xf32>
    %21 = vector.broadcast %6 : vector<1x1x8xf32> to vector<8x4x8xf32>
    %22 = arith.mulf %20, %21 : vector<8x4x8xf32>
    %cst_22 = arith.constant dense<0.000000e+00> : vector<8x4xf32>
    %23 = vector.multi_reduction <add>, %22, %cst_22 [2] : vector<8x4x8xf32> to vector<8x4xf32>
    %cst_23 = arith.constant dense<0xFF800000> : vector<8xf32>
    %24 = vector.multi_reduction <maximumf>, %23, %cst_23 [1] : vector<8x4xf32> to vector<8xf32>
    %25 = vector.shape_cast %24 : vector<8xf32> to vector<8x1xf32>
    %26 = vector.broadcast %25 : vector<8x1xf32> to vector<8x4xf32>
    %27 = arith.subf %23, %26 : vector<8x4xf32>
    %28 = math.exp %27 : vector<8x4xf32>
    %cst_24 = arith.constant dense<0.000000e+00> : vector<8xf32>
    %29 = vector.multi_reduction <add>, %28, %cst_24 [1] : vector<8x4xf32> to vector<8xf32>
    %30 = vector.shape_cast %29 : vector<8xf32> to vector<8x1xf32>
    %31 = tpu.reciprocal %30 : vector<8x1xf32> -> vector<8x1xf32>
    %32 = vector.broadcast %31 : vector<8x1xf32> to vector<8x4xf32>
    %33 = arith.mulf %28, %32 : vector<8x4xf32>
    %34 = vector.extract_strided_slice %1 {offsets = [0, 0, 0], sizes = [8, 1, 4], strides = [1, 1, 1]} : vector<8x8x4xf32> to vector<8x1x4xf32>
    %35 = vector.shape_cast %34 : vector<8x1x4xf32> to vector<8x4xf32>
    %36 = arith.mulf %33, %35 : vector<8x4xf32>
    %cst_25 = arith.constant dense<0.000000e+00> : vector<8x128xf32>
    %37 = tpu.matmul %36, %7, %cst_25 {dimension_numbers = #tpu.dot_dimension_numbers<[1], [0], [0], [1], [0, 0, 1, 1], [], []>} : vector<8x4xf32>, vector<4x128xf32>, vector<8x128xf32> -> vector<8x128xf32>
    %cst_26 = arith.constant dense<0.000000e+00> : vector<8x128xf32>
    %38 = tpu.matmul %10, %8, %cst_26 {dimension_numbers = #tpu.dot_dimension_numbers<[1], [0], [0], [1], [0, 0, 1, 1], [], []>} : vector<8x32xf32>, vector<32x128xf32>, vector<8x128xf32> -> vector<8x128xf32>
    %39 = arith.addf %37, %38 : vector<8x128xf32>
    %40 = vector.broadcast %9 : vector<1x128xf32> to vector<8x128xf32>
    %41 = arith.addf %39, %40 : vector<8x128xf32>
    %42 = arith.negf %41 : vector<8x128xf32>
    %43 = math.exp %42 : vector<8x128xf32>
    %cst_27 = arith.constant 1.000000e+00 : f32
    %44 = vector.broadcast %cst_27 : f32 to vector<8x128xf32>
    %45 = arith.addf %44, %43 : vector<8x128xf32>
    %46 = arith.divf %44, %45 : vector<8x128xf32>
    %47 = vector.extract_strided_slice %46 {offsets = [0, 0], sizes = [8, 32], strides = [1, 1]} : vector<8x128xf32> to vector<8x32xf32>
    %48 = vector.extract_strided_slice %46 {offsets = [0, 32], sizes = [8, 32], strides = [1, 1]} : vector<8x128xf32> to vector<8x32xf32>
    %49 = vector.extract_strided_slice %46 {offsets = [0, 96], sizes = [8, 32], strides = [1, 1]} : vector<8x128xf32> to vector<8x32xf32>
    %50 = vector.extract_strided_slice %41 {offsets = [0, 64], sizes = [8, 32], strides = [1, 1]} : vector<8x128xf32> to vector<8x32xf32>
    %51 = math.tanh %50 : vector<8x32xf32>
    %52 = arith.mulf %48, %11 : vector<8x32xf32>
    %53 = arith.mulf %47, %51 : vector<8x32xf32>
    %54 = arith.addf %52, %53 : vector<8x32xf32>
    %55 = math.tanh %54 : vector<8x32xf32>
    %56 = arith.mulf %49, %55 : vector<8x32xf32>
    %c0_28 = arith.constant 0 : index
    %c0_29 = arith.constant 0 : index
    %57 = vector.load %arg10[%c0_28, %c0_29] : memref<8x256xf32, #tpu.memory_space<vmem>>, vector<8x32xf32>
    tpu.vector_store %arg10[%c0_28, %c0_29], %56 {strides = array<i32>} : memref<8x256xf32, #tpu.memory_space<vmem>>, vector<8x32xf32>,
    %cst_30 = arith.constant dense<0.000000e+00> : vector<8x8xf32>
    %58 = tpu.matmul %56, %2, %cst_30 {dimension_numbers = #tpu.dot_dimension_numbers<[1], [0], [0], [1], [0, 0, 1, 1], [], []>} : vector<8x32xf32>, vector<32x8xf32>, vector<8x8xf32> -> vector<8x8xf32>
    %cst_31 = arith.constant dense<0.000000e+00> : vector<8x8xf32>
    %59 = tpu.matmul %54, %3, %cst_31 {dimension_numbers = #tpu.dot_dimension_numbers<[1], [0], [0], [1], [0, 0, 1, 1], [], []>} : vector<8x32xf32>, vector<32x8xf32>, vector<8x8xf32> -> vector<8x8xf32>
    %60 = arith.addf %58, %59 : vector<8x8xf32>
    %61 = vector.broadcast %4 : vector<1x8xf32> to vector<8x8xf32>
    %62 = arith.addf %60, %61 : vector<8x8xf32>
    %63 = vector.shape_cast %62 : vector<8x8xf32> to vector<8x1x8xf32>
    %64 = vector.broadcast %63 : vector<8x1x8xf32> to vector<8x4x8xf32>
    %65 = arith.addf %64, %0 : vector<8x4x8xf32>
    %66 = math.tanh %65 : vector<8x4x8xf32>
    %67 = vector.broadcast %6 : vector<1x1x8xf32> to vector<8x4x8xf32>
    %68 = arith.mulf %66, %67 : vector<8x4x8xf32>
    %cst_32 = arith.constant dense<0.000000e+00> : vector<8x4xf32>
    %69 = vector.multi_reduction <add>, %68, %cst_32 [2] : vector<8x4x8xf32> to vector<8x4xf32>
    %cst_33 = arith.constant dense<0xFF800000> : vector<8xf32>
    %70 = vector.multi_reduction <maximumf>, %69, %cst_33 [1] : vector<8x4xf32> to vector<8xf32>
    %71 = vector.shape_cast %70 : vector<8xf32> to vector<8x1xf32>
    %72 = vector.broadcast %71 : vector<8x1xf32> to vector<8x4xf32>
    %73 = arith.subf %69, %72 : vector<8x4xf32>
    %74 = math.exp %73 : vector<8x4xf32>
    %cst_34 = arith.constant dense<0.000000e+00> : vector<8xf32>
    %75 = vector.multi_reduction <add>, %74, %cst_34 [1] : vector<8x4xf32> to vector<8xf32>
    %76 = vector.shape_cast %75 : vector<8xf32> to vector<8x1xf32>
    %77 = tpu.reciprocal %76 : vector<8x1xf32> -> vector<8x1xf32>
    %78 = vector.broadcast %77 : vector<8x1xf32> to vector<8x4xf32>
    %79 = arith.mulf %74, %78 : vector<8x4xf32>
    %80 = vector.extract_strided_slice %1 {offsets = [0, 1, 0], sizes = [8, 1, 4], strides = [1, 1, 1]} : vector<8x8x4xf32> to vector<8x1x4xf32>
    %81 = vector.shape_cast %80 : vector<8x1x4xf32> to vector<8x4xf32>
    %82 = arith.mulf %79, %81 : vector<8x4xf32>
    %cst_35 = arith.constant dense<0.000000e+00> : vector<8x128xf32>
    %83 = tpu.matmul %82, %7, %cst_35 {dimension_numbers = #tpu.dot_dimension_numbers<[1], [0], [0], [1], [0, 0, 1, 1], [], []>} : vector<8x4xf32>, vector<4x128xf32>, vector<8x128xf32> -> vector<8x128xf32>
    %cst_36 = arith.constant dense<0.000000e+00> : vector<8x128xf32>
    %84 = tpu.matmul %56, %8, %cst_36 {dimension_numbers = #tpu.dot_dimension_numbers<[1], [0], [0], [1], [0, 0, 1, 1], [], []>} : vector<8x32xf32>, vector<32x128xf32>, vector<8x128xf32> -> vector<8x128xf32>
    %85 = arith.addf %83, %84 : vector<8x128xf32>
    %86 = vector.broadcast %9 : vector<1x128xf32> to vector<8x128xf32>
    %87 = arith.addf %85, %86 : vector<8x128xf32>
    %88 = arith.negf %87 : vector<8x128xf32>
    %89 = math.exp %88 : vector<8x128xf32>
    %cst_37 = arith.constant 1.000000e+00 : f32
    %90 = vector.broadcast %cst_37 : f32 to vector<8x128xf32>
    %91 = arith.addf %90, %89 : vector<8x128xf32>
    %92 = arith.divf %90, %91 : vector<8x128xf32>
    %93 = vector.extract_strided_slice %92 {offsets = [0, 0], sizes = [8, 32], strides = [1, 1]} : vector<8x128xf32> to vector<8x32xf32>
    %94 = vector.extract_strided_slice %92 {offsets = [0, 32], sizes = [8, 32], strides = [1, 1]} : vector<8x128xf32> to vector<8x32xf32>
    %95 = vector.extract_strided_slice %92 {offsets = [0, 96], sizes = [8, 32], strides = [1, 1]} : vector<8x128xf32> to vector<8x32xf32>
    %96 = vector.extract_strided_slice %87 {offsets = [0, 64], sizes = [8, 32], strides = [1, 1]} : vector<8x128xf32> to vector<8x32xf32>
    %97 = math.tanh %96 : vector<8x32xf32>
    %98 = arith.mulf %94, %54 : vector<8x32xf32>
    %99 = arith.mulf %93, %97 : vector<8x32xf32>
    %100 = arith.addf %98, %99 : vector<8x32xf32>
    %101 = math.tanh %100 : vector<8x32xf32>
    %102 = arith.mulf %95, %101 : vector<8x32xf32>
    %c0_38 = arith.constant 0 : index
    %c32 = arith.constant 32 : index
    %103 = vector.load %arg10[%c0_38, %c32] : memref<8x256xf32, #tpu.memory_space<vmem>>, vector<8x32xf32>
    tpu.vector_store %arg10[%c0_38, %c32], %102 {strides = array<i32>} : memref<8x256xf32, #tpu.memory_space<vmem>>, vector<8x32xf32>,
    %cst_39 = arith.constant dense<0.000000e+00> : vector<8x8xf32>
    %104 = tpu.matmul %102, %2, %cst_39 {dimension_numbers = #tpu.dot_dimension_numbers<[1], [0], [0], [1], [0, 0, 1, 1], [], []>} : vector<8x32xf32>, vector<32x8xf32>, vector<8x8xf32> -> vector<8x8xf32>
    %cst_40 = arith.constant dense<0.000000e+00> : vector<8x8xf32>
    %105 = tpu.matmul %100, %3, %cst_40 {dimension_numbers = #tpu.dot_dimension_numbers<[1], [0], [0], [1], [0, 0, 1, 1], [], []>} : vector<8x32xf32>, vector<32x8xf32>, vector<8x8xf32> -> vector<8x8xf32>
    %106 = arith.addf %104, %105 : vector<8x8xf32>
    %107 = vector.broadcast %4 : vector<1x8xf32> to vector<8x8xf32>
    %108 = arith.addf %106, %107 : vector<8x8xf32>
    %109 = vector.shape_cast %108 : vector<8x8xf32> to vector<8x1x8xf32>
    %110 = vector.broadcast %109 : vector<8x1x8xf32> to vector<8x4x8xf32>
    %111 = arith.addf %110, %0 : vector<8x4x8xf32>
    %112 = math.tanh %111 : vector<8x4x8xf32>
    %113 = vector.broadcast %6 : vector<1x1x8xf32> to vector<8x4x8xf32>
    %114 = arith.mulf %112, %113 : vector<8x4x8xf32>
    %cst_41 = arith.constant dense<0.000000e+00> : vector<8x4xf32>
    %115 = vector.multi_reduction <add>, %114, %cst_41 [2] : vector<8x4x8xf32> to vector<8x4xf32>
    %cst_42 = arith.constant dense<0xFF800000> : vector<8xf32>
    %116 = vector.multi_reduction <maximumf>, %115, %cst_42 [1] : vector<8x4xf32> to vector<8xf32>
    %117 = vector.shape_cast %116 : vector<8xf32> to vector<8x1xf32>
    %118 = vector.broadcast %117 : vector<8x1xf32> to vector<8x4xf32>
    %119 = arith.subf %115, %118 : vector<8x4xf32>
    %120 = math.exp %119 : vector<8x4xf32>
    %cst_43 = arith.constant dense<0.000000e+00> : vector<8xf32>
    %121 = vector.multi_reduction <add>, %120, %cst_43 [1] : vector<8x4xf32> to vector<8xf32>
    %122 = vector.shape_cast %121 : vector<8xf32> to vector<8x1xf32>
    %123 = tpu.reciprocal %122 : vector<8x1xf32> -> vector<8x1xf32>
    %124 = vector.broadcast %123 : vector<8x1xf32> to vector<8x4xf32>
    %125 = arith.mulf %120, %124 : vector<8x4xf32>
    %126 = vector.extract_strided_slice %1 {offsets = [0, 2, 0], sizes = [8, 1, 4], strides = [1, 1, 1]} : vector<8x8x4xf32> to vector<8x1x4xf32>
    %127 = vector.shape_cast %126 : vector<8x1x4xf32> to vector<8x4xf32>
    %128 = arith.mulf %125, %127 : vector<8x4xf32>
    %cst_44 = arith.constant dense<0.000000e+00> : vector<8x128xf32>
    %129 = tpu.matmul %128, %7, %cst_44 {dimension_numbers = #tpu.dot_dimension_numbers<[1], [0], [0], [1], [0, 0, 1, 1], [], []>} : vector<8x4xf32>, vector<4x128xf32>, vector<8x128xf32> -> vector<8x128xf32>
    %cst_45 = arith.constant dense<0.000000e+00> : vector<8x128xf32>
    %130 = tpu.matmul %102, %8, %cst_45 {dimension_numbers = #tpu.dot_dimension_numbers<[1], [0], [0], [1], [0, 0, 1, 1], [], []>} : vector<8x32xf32>, vector<32x128xf32>, vector<8x128xf32> -> vector<8x128xf32>
    %131 = arith.addf %129, %130 : vector<8x128xf32>
    %132 = vector.broadcast %9 : vector<1x128xf32> to vector<8x128xf32>
    %133 = arith.addf %131, %132 : vector<8x128xf32>
    %134 = arith.negf %133 : vector<8x128xf32>
    %135 = math.exp %134 : vector<8x128xf32>
    %cst_46 = arith.constant 1.000000e+00 : f32
    %136 = vector.broadcast %cst_46 : f32 to vector<8x128xf32>
    %137 = arith.addf %136, %135 : vector<8x128xf32>
    %138 = arith.divf %136, %137 : vector<8x128xf32>
    %139 = vector.extract_strided_slice %138 {offsets = [0, 0], sizes = [8, 32], strides = [1, 1]} : vector<8x128xf32> to vector<8x32xf32>
    %140 = vector.extract_strided_slice %138 {offsets = [0, 32], sizes = [8, 32], strides = [1, 1]} : vector<8x128xf32> to vector<8x32xf32>
    %141 = vector.extract_strided_slice %138 {offsets = [0, 96], sizes = [8, 32], strides = [1, 1]} : vector<8x128xf32> to vector<8x32xf32>
    %142 = vector.extract_strided_slice %133 {offsets = [0, 64], sizes = [8, 32], strides = [1, 1]} : vector<8x128xf32> to vector<8x32xf32>
    %143 = math.tanh %142 : vector<8x32xf32>
    %144 = arith.mulf %140, %100 : vector<8x32xf32>
    %145 = arith.mulf %139, %143 : vector<8x32xf32>
    %146 = arith.addf %144, %145 : vector<8x32xf32>
    %147 = math.tanh %146 : vector<8x32xf32>
    %148 = arith.mulf %141, %147 : vector<8x32xf32>
    %c0_47 = arith.constant 0 : index
    %c64 = arith.constant 64 : index
    %149 = vector.load %arg10[%c0_47, %c64] : memref<8x256xf32, #tpu.memory_space<vmem>>, vector<8x32xf32>
    tpu.vector_store %arg10[%c0_47, %c64], %148 {strides = array<i32>} : memref<8x256xf32, #tpu.memory_space<vmem>>, vector<8x32xf32>,
    %cst_48 = arith.constant dense<0.000000e+00> : vector<8x8xf32>
    %150 = tpu.matmul %148, %2, %cst_48 {dimension_numbers = #tpu.dot_dimension_numbers<[1], [0], [0], [1], [0, 0, 1, 1], [], []>} : vector<8x32xf32>, vector<32x8xf32>, vector<8x8xf32> -> vector<8x8xf32>
    %cst_49 = arith.constant dense<0.000000e+00> : vector<8x8xf32>
    %151 = tpu.matmul %146, %3, %cst_49 {dimension_numbers = #tpu.dot_dimension_numbers<[1], [0], [0], [1], [0, 0, 1, 1], [], []>} : vector<8x32xf32>, vector<32x8xf32>, vector<8x8xf32> -> vector<8x8xf32>
    %152 = arith.addf %150, %151 : vector<8x8xf32>
    %153 = vector.broadcast %4 : vector<1x8xf32> to vector<8x8xf32>
    %154 = arith.addf %152, %153 : vector<8x8xf32>
    %155 = vector.shape_cast %154 : vector<8x8xf32> to vector<8x1x8xf32>
    %156 = vector.broadcast %155 : vector<8x1x8xf32> to vector<8x4x8xf32>
    %157 = arith.addf %156, %0 : vector<8x4x8xf32>
    %158 = math.tanh %157 : vector<8x4x8xf32>
    %159 = vector.broadcast %6 : vector<1x1x8xf32> to vector<8x4x8xf32>
    %160 = arith.mulf %158, %159 : vector<8x4x8xf32>
    %cst_50 = arith.constant dense<0.000000e+00> : vector<8x4xf32>
    %161 = vector.multi_reduction <add>, %160, %cst_50 [2] : vector<8x4x8xf32> to vector<8x4xf32>
    %cst_51 = arith.constant dense<0xFF800000> : vector<8xf32>
    %162 = vector.multi_reduction <maximumf>, %161, %cst_51 [1] : vector<8x4xf32> to vector<8xf32>
    %163 = vector.shape_cast %162 : vector<8xf32> to vector<8x1xf32>
    %164 = vector.broadcast %163 : vector<8x1xf32> to vector<8x4xf32>
    %165 = arith.subf %161, %164 : vector<8x4xf32>
    %166 = math.exp %165 : vector<8x4xf32>
    %cst_52 = arith.constant dense<0.000000e+00> : vector<8xf32>
    %167 = vector.multi_reduction <add>, %166, %cst_52 [1] : vector<8x4xf32> to vector<8xf32>
    %168 = vector.shape_cast %167 : vector<8xf32> to vector<8x1xf32>
    %169 = tpu.reciprocal %168 : vector<8x1xf32> -> vector<8x1xf32>
    %170 = vector.broadcast %169 : vector<8x1xf32> to vector<8x4xf32>
    %171 = arith.mulf %166, %170 : vector<8x4xf32>
    %172 = vector.extract_strided_slice %1 {offsets = [0, 3, 0], sizes = [8, 1, 4], strides = [1, 1, 1]} : vector<8x8x4xf32> to vector<8x1x4xf32>
    %173 = vector.shape_cast %172 : vector<8x1x4xf32> to vector<8x4xf32>
    %174 = arith.mulf %171, %173 : vector<8x4xf32>
    %cst_53 = arith.constant dense<0.000000e+00> : vector<8x128xf32>
    %175 = tpu.matmul %174, %7, %cst_53 {dimension_numbers = #tpu.dot_dimension_numbers<[1], [0], [0], [1], [0, 0, 1, 1], [], []>} : vector<8x4xf32>, vector<4x128xf32>, vector<8x128xf32> -> vector<8x128xf32>
    %cst_54 = arith.constant dense<0.000000e+00> : vector<8x128xf32>
    %176 = tpu.matmul %148, %8, %cst_54 {dimension_numbers = #tpu.dot_dimension_numbers<[1], [0], [0], [1], [0, 0, 1, 1], [], []>} : vector<8x32xf32>, vector<32x128xf32>, vector<8x128xf32> -> vector<8x128xf32>
    %177 = arith.addf %175, %176 : vector<8x128xf32>
    %178 = vector.broadcast %9 : vector<1x128xf32> to vector<8x128xf32>
    %179 = arith.addf %177, %178 : vector<8x128xf32>
    %180 = arith.negf %179 : vector<8x128xf32>
    %181 = math.exp %180 : vector<8x128xf32>
    %cst_55 = arith.constant 1.000000e+00 : f32
    %182 = vector.broadcast %cst_55 : f32 to vector<8x128xf32>
    %183 = arith.addf %182, %181 : vector<8x128xf32>
    %184 = arith.divf %182, %183 : vector<8x128xf32>
    %185 = vector.extract_strided_slice %184 {offsets = [0, 0], sizes = [8, 32], strides = [1, 1]} : vector<8x128xf32> to vector<8x32xf32>
    %186 = vector.extract_strided_slice %184 {offsets = [0, 32], sizes = [8, 32], strides = [1, 1]} : vector<8x128xf32> to vector<8x32xf32>
    %187 = vector.extract_strided_slice %184 {offsets = [0, 96], sizes = [8, 32], strides = [1, 1]} : vector<8x128xf32> to vector<8x32xf32>
    %188 = vector.extract_strided_slice %179 {offsets = [0, 64], sizes = [8, 32], strides = [1, 1]} : vector<8x128xf32> to vector<8x32xf32>
    %189 = math.tanh %188 : vector<8x32xf32>
    %190 = arith.mulf %186, %146 : vector<8x32xf32>
    %191 = arith.mulf %185, %189 : vector<8x32xf32>
    %192 = arith.addf %190, %191 : vector<8x32xf32>
    %193 = math.tanh %192 : vector<8x32xf32>
    %194 = arith.mulf %187, %193 : vector<8x32xf32>
    %c0_56 = arith.constant 0 : index
    %c96 = arith.constant 96 : index
    %195 = vector.load %arg10[%c0_56, %c96] : memref<8x256xf32, #tpu.memory_space<vmem>>, vector<8x32xf32>
    tpu.vector_store %arg10[%c0_56, %c96], %194 {strides = array<i32>} : memref<8x256xf32, #tpu.memory_space<vmem>>, vector<8x32xf32>,
    %cst_57 = arith.constant dense<0.000000e+00> : vector<8x8xf32>
    %196 = tpu.matmul %194, %2, %cst_57 {dimension_numbers = #tpu.dot_dimension_numbers<[1], [0], [0], [1], [0, 0, 1, 1], [], []>} : vector<8x32xf32>, vector<32x8xf32>, vector<8x8xf32> -> vector<8x8xf32>
    %cst_58 = arith.constant dense<0.000000e+00> : vector<8x8xf32>
    %197 = tpu.matmul %192, %3, %cst_58 {dimension_numbers = #tpu.dot_dimension_numbers<[1], [0], [0], [1], [0, 0, 1, 1], [], []>} : vector<8x32xf32>, vector<32x8xf32>, vector<8x8xf32> -> vector<8x8xf32>
    %198 = arith.addf %196, %197 : vector<8x8xf32>
    %199 = vector.broadcast %4 : vector<1x8xf32> to vector<8x8xf32>
    %200 = arith.addf %198, %199 : vector<8x8xf32>
    %201 = vector.shape_cast %200 : vector<8x8xf32> to vector<8x1x8xf32>
    %202 = vector.broadcast %201 : vector<8x1x8xf32> to vector<8x4x8xf32>
    %203 = arith.addf %202, %0 : vector<8x4x8xf32>
    %204 = math.tanh %203 : vector<8x4x8xf32>
    %205 = vector.broadcast %6 : vector<1x1x8xf32> to vector<8x4x8xf32>
    %206 = arith.mulf %204, %205 : vector<8x4x8xf32>
    %cst_59 = arith.constant dense<0.000000e+00> : vector<8x4xf32>
    %207 = vector.multi_reduction <add>, %206, %cst_59 [2] : vector<8x4x8xf32> to vector<8x4xf32>
    %cst_60 = arith.constant dense<0xFF800000> : vector<8xf32>
    %208 = vector.multi_reduction <maximumf>, %207, %cst_60 [1] : vector<8x4xf32> to vector<8xf32>
    %209 = vector.shape_cast %208 : vector<8xf32> to vector<8x1xf32>
    %210 = vector.broadcast %209 : vector<8x1xf32> to vector<8x4xf32>
    %211 = arith.subf %207, %210 : vector<8x4xf32>
    %212 = math.exp %211 : vector<8x4xf32>
    %cst_61 = arith.constant dense<0.000000e+00> : vector<8xf32>
    %213 = vector.multi_reduction <add>, %212, %cst_61 [1] : vector<8x4xf32> to vector<8xf32>
    %214 = vector.shape_cast %213 : vector<8xf32> to vector<8x1xf32>
    %215 = tpu.reciprocal %214 : vector<8x1xf32> -> vector<8x1xf32>
    %216 = vector.broadcast %215 : vector<8x1xf32> to vector<8x4xf32>
    %217 = arith.mulf %212, %216 : vector<8x4xf32>
    %218 = vector.extract_strided_slice %1 {offsets = [0, 4, 0], sizes = [8, 1, 4], strides = [1, 1, 1]} : vector<8x8x4xf32> to vector<8x1x4xf32>
    %219 = vector.shape_cast %218 : vector<8x1x4xf32> to vector<8x4xf32>
    %220 = arith.mulf %217, %219 : vector<8x4xf32>
    %cst_62 = arith.constant dense<0.000000e+00> : vector<8x128xf32>
    %221 = tpu.matmul %220, %7, %cst_62 {dimension_numbers = #tpu.dot_dimension_numbers<[1], [0], [0], [1], [0, 0, 1, 1], [], []>} : vector<8x4xf32>, vector<4x128xf32>, vector<8x128xf32> -> vector<8x128xf32>
    %cst_63 = arith.constant dense<0.000000e+00> : vector<8x128xf32>
    %222 = tpu.matmul %194, %8, %cst_63 {dimension_numbers = #tpu.dot_dimension_numbers<[1], [0], [0], [1], [0, 0, 1, 1], [], []>} : vector<8x32xf32>, vector<32x128xf32>, vector<8x128xf32> -> vector<8x128xf32>
    %223 = arith.addf %221, %222 : vector<8x128xf32>
    %224 = vector.broadcast %9 : vector<1x128xf32> to vector<8x128xf32>
    %225 = arith.addf %223, %224 : vector<8x128xf32>
    %226 = arith.negf %225 : vector<8x128xf32>
    %227 = math.exp %226 : vector<8x128xf32>
    %cst_64 = arith.constant 1.000000e+00 : f32
    %228 = vector.broadcast %cst_64 : f32 to vector<8x128xf32>
    %229 = arith.addf %228, %227 : vector<8x128xf32>
    %230 = arith.divf %228, %229 : vector<8x128xf32>
    %231 = vector.extract_strided_slice %230 {offsets = [0, 0], sizes = [8, 32], strides = [1, 1]} : vector<8x128xf32> to vector<8x32xf32>
    %232 = vector.extract_strided_slice %230 {offsets = [0, 32], sizes = [8, 32], strides = [1, 1]} : vector<8x128xf32> to vector<8x32xf32>
    %233 = vector.extract_strided_slice %230 {offsets = [0, 96], sizes = [8, 32], strides = [1, 1]} : vector<8x128xf32> to vector<8x32xf32>
    %234 = vector.extract_strided_slice %225 {offsets = [0, 64], sizes = [8, 32], strides = [1, 1]} : vector<8x128xf32> to vector<8x32xf32>
    %235 = math.tanh %234 : vector<8x32xf32>
    %236 = arith.mulf %232, %192 : vector<8x32xf32>
    %237 = arith.mulf %231, %235 : vector<8x32xf32>
    %238 = arith.addf %236, %237 : vector<8x32xf32>
    %239 = math.tanh %238 : vector<8x32xf32>
    %240 = arith.mulf %233, %239 : vector<8x32xf32>
    %c0_65 = arith.constant 0 : index
    %c128 = arith.constant 128 : index
    %241 = vector.load %arg10[%c0_65, %c128] : memref<8x256xf32, #tpu.memory_space<vmem>>, vector<8x32xf32>
    tpu.vector_store %arg10[%c0_65, %c128], %240 {strides = array<i32>} : memref<8x256xf32, #tpu.memory_space<vmem>>, vector<8x32xf32>,
    %cst_66 = arith.constant dense<0.000000e+00> : vector<8x8xf32>
    %242 = tpu.matmul %240, %2, %cst_66 {dimension_numbers = #tpu.dot_dimension_numbers<[1], [0], [0], [1], [0, 0, 1, 1], [], []>} : vector<8x32xf32>, vector<32x8xf32>, vector<8x8xf32> -> vector<8x8xf32>
    %cst_67 = arith.constant dense<0.000000e+00> : vector<8x8xf32>
    %243 = tpu.matmul %238, %3, %cst_67 {dimension_numbers = #tpu.dot_dimension_numbers<[1], [0], [0], [1], [0, 0, 1, 1], [], []>} : vector<8x32xf32>, vector<32x8xf32>, vector<8x8xf32> -> vector<8x8xf32>
    %244 = arith.addf %242, %243 : vector<8x8xf32>
    %245 = vector.broadcast %4 : vector<1x8xf32> to vector<8x8xf32>
    %246 = arith.addf %244, %245 : vector<8x8xf32>
    %247 = vector.shape_cast %246 : vector<8x8xf32> to vector<8x1x8xf32>
    %248 = vector.broadcast %247 : vector<8x1x8xf32> to vector<8x4x8xf32>
    %249 = arith.addf %248, %0 : vector<8x4x8xf32>
    %250 = math.tanh %249 : vector<8x4x8xf32>
    %251 = vector.broadcast %6 : vector<1x1x8xf32> to vector<8x4x8xf32>
    %252 = arith.mulf %250, %251 : vector<8x4x8xf32>
    %cst_68 = arith.constant dense<0.000000e+00> : vector<8x4xf32>
    %253 = vector.multi_reduction <add>, %252, %cst_68 [2] : vector<8x4x8xf32> to vector<8x4xf32>
    %cst_69 = arith.constant dense<0xFF800000> : vector<8xf32>
    %254 = vector.multi_reduction <maximumf>, %253, %cst_69 [1] : vector<8x4xf32> to vector<8xf32>
    %255 = vector.shape_cast %254 : vector<8xf32> to vector<8x1xf32>
    %256 = vector.broadcast %255 : vector<8x1xf32> to vector<8x4xf32>
    %257 = arith.subf %253, %256 : vector<8x4xf32>
    %258 = math.exp %257 : vector<8x4xf32>
    %cst_70 = arith.constant dense<0.000000e+00> : vector<8xf32>
    %259 = vector.multi_reduction <add>, %258, %cst_70 [1] : vector<8x4xf32> to vector<8xf32>
    %260 = vector.shape_cast %259 : vector<8xf32> to vector<8x1xf32>
    %261 = tpu.reciprocal %260 : vector<8x1xf32> -> vector<8x1xf32>
    %262 = vector.broadcast %261 : vector<8x1xf32> to vector<8x4xf32>
    %263 = arith.mulf %258, %262 : vector<8x4xf32>
    %264 = vector.extract_strided_slice %1 {offsets = [0, 5, 0], sizes = [8, 1, 4], strides = [1, 1, 1]} : vector<8x8x4xf32> to vector<8x1x4xf32>
    %265 = vector.shape_cast %264 : vector<8x1x4xf32> to vector<8x4xf32>
    %266 = arith.mulf %263, %265 : vector<8x4xf32>
    %cst_71 = arith.constant dense<0.000000e+00> : vector<8x128xf32>
    %267 = tpu.matmul %266, %7, %cst_71 {dimension_numbers = #tpu.dot_dimension_numbers<[1], [0], [0], [1], [0, 0, 1, 1], [], []>} : vector<8x4xf32>, vector<4x128xf32>, vector<8x128xf32> -> vector<8x128xf32>
    %cst_72 = arith.constant dense<0.000000e+00> : vector<8x128xf32>
    %268 = tpu.matmul %240, %8, %cst_72 {dimension_numbers = #tpu.dot_dimension_numbers<[1], [0], [0], [1], [0, 0, 1, 1], [], []>} : vector<8x32xf32>, vector<32x128xf32>, vector<8x128xf32> -> vector<8x128xf32>
    %269 = arith.addf %267, %268 : vector<8x128xf32>
    %270 = vector.broadcast %9 : vector<1x128xf32> to vector<8x128xf32>
    %271 = arith.addf %269, %270 : vector<8x128xf32>
    %272 = arith.negf %271 : vector<8x128xf32>
    %273 = math.exp %272 : vector<8x128xf32>
    %cst_73 = arith.constant 1.000000e+00 : f32
    %274 = vector.broadcast %cst_73 : f32 to vector<8x128xf32>
    %275 = arith.addf %274, %273 : vector<8x128xf32>
    %276 = arith.divf %274, %275 : vector<8x128xf32>
    %277 = vector.extract_strided_slice %276 {offsets = [0, 0], sizes = [8, 32], strides = [1, 1]} : vector<8x128xf32> to vector<8x32xf32>
    %278 = vector.extract_strided_slice %276 {offsets = [0, 32], sizes = [8, 32], strides = [1, 1]} : vector<8x128xf32> to vector<8x32xf32>
    %279 = vector.extract_strided_slice %276 {offsets = [0, 96], sizes = [8, 32], strides = [1, 1]} : vector<8x128xf32> to vector<8x32xf32>
    %280 = vector.extract_strided_slice %271 {offsets = [0, 64], sizes = [8, 32], strides = [1, 1]} : vector<8x128xf32> to vector<8x32xf32>
    %281 = math.tanh %280 : vector<8x32xf32>
    %282 = arith.mulf %278, %238 : vector<8x32xf32>
    %283 = arith.mulf %277, %281 : vector<8x32xf32>
    %284 = arith.addf %282, %283 : vector<8x32xf32>
    %285 = math.tanh %284 : vector<8x32xf32>
    %286 = arith.mulf %279, %285 : vector<8x32xf32>
    %c0_74 = arith.constant 0 : index
    %c160 = arith.constant 160 : index
    %287 = vector.load %arg10[%c0_74, %c160] : memref<8x256xf32, #tpu.memory_space<vmem>>, vector<8x32xf32>
    tpu.vector_store %arg10[%c0_74, %c160], %286 {strides = array<i32>} : memref<8x256xf32, #tpu.memory_space<vmem>>, vector<8x32xf32>,
    %cst_75 = arith.constant dense<0.000000e+00> : vector<8x8xf32>
    %288 = tpu.matmul %286, %2, %cst_75 {dimension_numbers = #tpu.dot_dimension_numbers<[1], [0], [0], [1], [0, 0, 1, 1], [], []>} : vector<8x32xf32>, vector<32x8xf32>, vector<8x8xf32> -> vector<8x8xf32>
    %cst_76 = arith.constant dense<0.000000e+00> : vector<8x8xf32>
    %289 = tpu.matmul %284, %3, %cst_76 {dimension_numbers = #tpu.dot_dimension_numbers<[1], [0], [0], [1], [0, 0, 1, 1], [], []>} : vector<8x32xf32>, vector<32x8xf32>, vector<8x8xf32> -> vector<8x8xf32>
    %290 = arith.addf %288, %289 : vector<8x8xf32>
    %291 = vector.broadcast %4 : vector<1x8xf32> to vector<8x8xf32>
    %292 = arith.addf %290, %291 : vector<8x8xf32>
    %293 = vector.shape_cast %292 : vector<8x8xf32> to vector<8x1x8xf32>
    %294 = vector.broadcast %293 : vector<8x1x8xf32> to vector<8x4x8xf32>
    %295 = arith.addf %294, %0 : vector<8x4x8xf32>
    %296 = math.tanh %295 : vector<8x4x8xf32>
    %297 = vector.broadcast %6 : vector<1x1x8xf32> to vector<8x4x8xf32>
    %298 = arith.mulf %296, %297 : vector<8x4x8xf32>
    %cst_77 = arith.constant dense<0.000000e+00> : vector<8x4xf32>
    %299 = vector.multi_reduction <add>, %298, %cst_77 [2] : vector<8x4x8xf32> to vector<8x4xf32>
    %cst_78 = arith.constant dense<0xFF800000> : vector<8xf32>
    %300 = vector.multi_reduction <maximumf>, %299, %cst_78 [1] : vector<8x4xf32> to vector<8xf32>
    %301 = vector.shape_cast %300 : vector<8xf32> to vector<8x1xf32>
    %302 = vector.broadcast %301 : vector<8x1xf32> to vector<8x4xf32>
    %303 = arith.subf %299, %302 : vector<8x4xf32>
    %304 = math.exp %303 : vector<8x4xf32>
    %cst_79 = arith.constant dense<0.000000e+00> : vector<8xf32>
    %305 = vector.multi_reduction <add>, %304, %cst_79 [1] : vector<8x4xf32> to vector<8xf32>
    %306 = vector.shape_cast %305 : vector<8xf32> to vector<8x1xf32>
    %307 = tpu.reciprocal %306 : vector<8x1xf32> -> vector<8x1xf32>
    %308 = vector.broadcast %307 : vector<8x1xf32> to vector<8x4xf32>
    %309 = arith.mulf %304, %308 : vector<8x4xf32>
    %310 = vector.extract_strided_slice %1 {offsets = [0, 6, 0], sizes = [8, 1, 4], strides = [1, 1, 1]} : vector<8x8x4xf32> to vector<8x1x4xf32>
    %311 = vector.shape_cast %310 : vector<8x1x4xf32> to vector<8x4xf32>
    %312 = arith.mulf %309, %311 : vector<8x4xf32>
    %cst_80 = arith.constant dense<0.000000e+00> : vector<8x128xf32>
    %313 = tpu.matmul %312, %7, %cst_80 {dimension_numbers = #tpu.dot_dimension_numbers<[1], [0], [0], [1], [0, 0, 1, 1], [], []>} : vector<8x4xf32>, vector<4x128xf32>, vector<8x128xf32> -> vector<8x128xf32>
    %cst_81 = arith.constant dense<0.000000e+00> : vector<8x128xf32>
    %314 = tpu.matmul %286, %8, %cst_81 {dimension_numbers = #tpu.dot_dimension_numbers<[1], [0], [0], [1], [0, 0, 1, 1], [], []>} : vector<8x32xf32>, vector<32x128xf32>, vector<8x128xf32> -> vector<8x128xf32>
    %315 = arith.addf %313, %314 : vector<8x128xf32>
    %316 = vector.broadcast %9 : vector<1x128xf32> to vector<8x128xf32>
    %317 = arith.addf %315, %316 : vector<8x128xf32>
    %318 = arith.negf %317 : vector<8x128xf32>
    %319 = math.exp %318 : vector<8x128xf32>
    %cst_82 = arith.constant 1.000000e+00 : f32
    %320 = vector.broadcast %cst_82 : f32 to vector<8x128xf32>
    %321 = arith.addf %320, %319 : vector<8x128xf32>
    %322 = arith.divf %320, %321 : vector<8x128xf32>
    %323 = vector.extract_strided_slice %322 {offsets = [0, 0], sizes = [8, 32], strides = [1, 1]} : vector<8x128xf32> to vector<8x32xf32>
    %324 = vector.extract_strided_slice %322 {offsets = [0, 32], sizes = [8, 32], strides = [1, 1]} : vector<8x128xf32> to vector<8x32xf32>
    %325 = vector.extract_strided_slice %322 {offsets = [0, 96], sizes = [8, 32], strides = [1, 1]} : vector<8x128xf32> to vector<8x32xf32>
    %326 = vector.extract_strided_slice %317 {offsets = [0, 64], sizes = [8, 32], strides = [1, 1]} : vector<8x128xf32> to vector<8x32xf32>
    %327 = math.tanh %326 : vector<8x32xf32>
    %328 = arith.mulf %324, %284 : vector<8x32xf32>
    %329 = arith.mulf %323, %327 : vector<8x32xf32>
    %330 = arith.addf %328, %329 : vector<8x32xf32>
    %331 = math.tanh %330 : vector<8x32xf32>
    %332 = arith.mulf %325, %331 : vector<8x32xf32>
    %c0_83 = arith.constant 0 : index
    %c192 = arith.constant 192 : index
    %333 = vector.load %arg10[%c0_83, %c192] : memref<8x256xf32, #tpu.memory_space<vmem>>, vector<8x32xf32>
    tpu.vector_store %arg10[%c0_83, %c192], %332 {strides = array<i32>} : memref<8x256xf32, #tpu.memory_space<vmem>>, vector<8x32xf32>,
    %cst_84 = arith.constant dense<0.000000e+00> : vector<8x8xf32>
    %334 = tpu.matmul %332, %2, %cst_84 {dimension_numbers = #tpu.dot_dimension_numbers<[1], [0], [0], [1], [0, 0, 1, 1], [], []>} : vector<8x32xf32>, vector<32x8xf32>, vector<8x8xf32> -> vector<8x8xf32>
    %cst_85 = arith.constant dense<0.000000e+00> : vector<8x8xf32>
    %335 = tpu.matmul %330, %3, %cst_85 {dimension_numbers = #tpu.dot_dimension_numbers<[1], [0], [0], [1], [0, 0, 1, 1], [], []>} : vector<8x32xf32>, vector<32x8xf32>, vector<8x8xf32> -> vector<8x8xf32>
    %336 = arith.addf %334, %335 : vector<8x8xf32>
    %337 = vector.broadcast %4 : vector<1x8xf32> to vector<8x8xf32>
    %338 = arith.addf %336, %337 : vector<8x8xf32>
    %339 = vector.shape_cast %338 : vector<8x8xf32> to vector<8x1x8xf32>
    %340 = vector.broadcast %339 : vector<8x1x8xf32> to vector<8x4x8xf32>
    %341 = arith.addf %340, %0 : vector<8x4x8xf32>
    %342 = math.tanh %341 : vector<8x4x8xf32>
    %343 = vector.broadcast %6 : vector<1x1x8xf32> to vector<8x4x8xf32>
    %344 = arith.mulf %342, %343 : vector<8x4x8xf32>
    %cst_86 = arith.constant dense<0.000000e+00> : vector<8x4xf32>
    %345 = vector.multi_reduction <add>, %344, %cst_86 [2] : vector<8x4x8xf32> to vector<8x4xf32>
    %cst_87 = arith.constant dense<0xFF800000> : vector<8xf32>
    %346 = vector.multi_reduction <maximumf>, %345, %cst_87 [1] : vector<8x4xf32> to vector<8xf32>
    %347 = vector.shape_cast %346 : vector<8xf32> to vector<8x1xf32>
    %348 = vector.broadcast %347 : vector<8x1xf32> to vector<8x4xf32>
    %349 = arith.subf %345, %348 : vector<8x4xf32>
    %350 = math.exp %349 : vector<8x4xf32>
    %cst_88 = arith.constant dense<0.000000e+00> : vector<8xf32>
    %351 = vector.multi_reduction <add>, %350, %cst_88 [1] : vector<8x4xf32> to vector<8xf32>
    %352 = vector.shape_cast %351 : vector<8xf32> to vector<8x1xf32>
    %353 = tpu.reciprocal %352 : vector<8x1xf32> -> vector<8x1xf32>
    %354 = vector.broadcast %353 : vector<8x1xf32> to vector<8x4xf32>
    %355 = arith.mulf %350, %354 : vector<8x4xf32>
    %356 = vector.extract_strided_slice %1 {offsets = [0, 7, 0], sizes = [8, 1, 4], strides = [1, 1, 1]} : vector<8x8x4xf32> to vector<8x1x4xf32>
    %357 = vector.shape_cast %356 : vector<8x1x4xf32> to vector<8x4xf32>
    %358 = arith.mulf %355, %357 : vector<8x4xf32>
    %cst_89 = arith.constant dense<0.000000e+00> : vector<8x128xf32>
    %359 = tpu.matmul %358, %7, %cst_89 {dimension_numbers = #tpu.dot_dimension_numbers<[1], [0], [0], [1], [0, 0, 1, 1], [], []>} : vector<8x4xf32>, vector<4x128xf32>, vector<8x128xf32> -> vector<8x128xf32>
    %cst_90 = arith.constant dense<0.000000e+00> : vector<8x128xf32>
    %360 = tpu.matmul %332, %8, %cst_90 {dimension_numbers = #tpu.dot_dimension_numbers<[1], [0], [0], [1], [0, 0, 1, 1], [], []>} : vector<8x32xf32>, vector<32x128xf32>, vector<8x128xf32> -> vector<8x128xf32>
    %361 = arith.addf %359, %360 : vector<8x128xf32>
    %362 = vector.broadcast %9 : vector<1x128xf32> to vector<8x128xf32>
    %363 = arith.addf %361, %362 : vector<8x128xf32>
    %364 = arith.negf %363 : vector<8x128xf32>
    %365 = math.exp %364 : vector<8x128xf32>
    %cst_91 = arith.constant 1.000000e+00 : f32
    %366 = vector.broadcast %cst_91 : f32 to vector<8x128xf32>
    %367 = arith.addf %366, %365 : vector<8x128xf32>
    %368 = arith.divf %366, %367 : vector<8x128xf32>
    %369 = vector.extract_strided_slice %368 {offsets = [0, 0], sizes = [8, 32], strides = [1, 1]} : vector<8x128xf32> to vector<8x32xf32>
    %370 = vector.extract_strided_slice %368 {offsets = [0, 32], sizes = [8, 32], strides = [1, 1]} : vector<8x128xf32> to vector<8x32xf32>
    %371 = vector.extract_strided_slice %368 {offsets = [0, 96], sizes = [8, 32], strides = [1, 1]} : vector<8x128xf32> to vector<8x32xf32>
    %372 = vector.extract_strided_slice %363 {offsets = [0, 64], sizes = [8, 32], strides = [1, 1]} : vector<8x128xf32> to vector<8x32xf32>
    %373 = math.tanh %372 : vector<8x32xf32>
    %374 = arith.mulf %370, %330 : vector<8x32xf32>
    %375 = arith.mulf %369, %373 : vector<8x32xf32>
    %376 = arith.addf %374, %375 : vector<8x32xf32>
    %377 = math.tanh %376 : vector<8x32xf32>
    %378 = arith.mulf %371, %377 : vector<8x32xf32>
    %c0_92 = arith.constant 0 : index
    %c224 = arith.constant 224 : index
    %379 = vector.load %arg10[%c0_92, %c224] : memref<8x256xf32, #tpu.memory_space<vmem>>, vector<8x32xf32>
    tpu.vector_store %arg10[%c0_92, %c224], %378 {strides = array<i32>} : memref<8x256xf32, #tpu.memory_space<vmem>>, vector<8x32xf32>,
    return
  }
  func.func @transform_0(%arg0: i32) -> (i32, i32, i32) {
    %c0_i32 = arith.constant 0 : i32
    %c0_i32_0 = arith.constant 0 : i32
    %c0_i32_1 = arith.constant 0 : i32
    return %arg0, %c0_i32, %c0_i32_0 : i32, i32, i32
  }
  func.func @transform_1(%arg0: i32) -> (i32, i32, i32) {
    %c0_i32 = arith.constant 0 : i32
    %c0_i32_0 = arith.constant 0 : i32
    %c0_i32_1 = arith.constant 0 : i32
    return %arg0, %c0_i32, %c0_i32_0 : i32, i32, i32
  }
  func.func @transform_2(%arg0: i32) -> (i32, i32) {
    %c0_i32 = arith.constant 0 : i32
    %c0_i32_0 = arith.constant 0 : i32
    %c0_i32_1 = arith.constant 0 : i32
    return %c0_i32, %c0_i32_0 : i32, i32
  }
  func.func @transform_3(%arg0: i32) -> (i32, i32) {
    %c0_i32 = arith.constant 0 : i32
    %c0_i32_0 = arith.constant 0 : i32
    %c0_i32_1 = arith.constant 0 : i32
    return %c0_i32, %c0_i32_0 : i32, i32
  }
  func.func @transform_4(%arg0: i32) -> (i32, i32) {
    %c0_i32 = arith.constant 0 : i32
    %c0_i32_0 = arith.constant 0 : i32
    %c0_i32_1 = arith.constant 0 : i32
    return %c0_i32, %c0_i32_0 : i32, i32
  }
  func.func @transform_5(%arg0: i32) -> (i32, i32) {
    %c0_i32 = arith.constant 0 : i32
    %c0_i32_0 = arith.constant 0 : i32
    %c0_i32_1 = arith.constant 0 : i32
    return %c0_i32, %c0_i32_0 : i32, i32
  }
  func.func @transform_6(%arg0: i32) -> (i32, i32) {
    %c0_i32 = arith.constant 0 : i32
    %c0_i32_0 = arith.constant 0 : i32
    %c0_i32_1 = arith.constant 0 : i32
    return %c0_i32, %c0_i32_0 : i32, i32
  }
  func.func @transform_7(%arg0: i32) -> (i32, i32) {
    %c0_i32 = arith.constant 0 : i32
    %c0_i32_0 = arith.constant 0 : i32
    %c0_i32_1 = arith.constant 0 : i32
    return %c0_i32, %c0_i32_0 : i32, i32
  }
  func.func @transform_8(%arg0: i32) -> (i32, i32) {
    %c0_i32 = arith.constant 0 : i32
    %c0_i32_0 = arith.constant 0 : i32
    %c0_i32_1 = arith.constant 0 : i32
    return %c0_i32, %c0_i32_0 : i32, i32
  }
  func.func @transform_9(%arg0: i32) -> (i32, i32) {
    %c0_i32 = arith.constant 0 : i32
    %c0_i32_0 = arith.constant 0 : i32
    return %arg0, %c0_i32 : i32, i32
  }
}

</mosaic_0001>

<bundles_post_ra>
// kernel: tpu_custom_call.1
= control target key start
LH: loop header
LB: loop body
LE: loop exit
PB: predicated region body
PF: predicated region fallthrough
CT: control target
= control target key end

     0   :  { %s6322_s0 = inlined_call_operand.vmem [shape: f32[8,4,8], index: 0, kind: input, shape index: {}]   ;;  %s6323_s1 = inlined_call_operand.vmem [shape: f32[8,8,4], index: 1, kind: input, shape index: {}]   ;;  %s6324_s2 = inlined_call_operand.vmem [shape: f32[32,8], index: 2, kind: input, shape index: {}]   ;;  %s6325_s3 = inlined_call_operand.vmem [shape: f32[32,8], index: 3, kind: input, shape index: {}]   ;;  %s6326_s4 = inlined_call_operand.vmem [shape: f32[1,8], index: 4, kind: input, shape index: {}]   ;;  %s6327_s5 = inlined_call_operand.vmem [shape: f32[1,8], index: 5, kind: input, shape index: {}]   ;;  %s6328_s6 = inlined_call_operand.vmem [shape: f32[4,128], index: 6, kind: input, shape index: {}]   ;;  %s6329_s7 = inlined_call_operand.vmem [shape: f32[32,128], index: 7, kind: input, shape index: {}]   ;;  %s6330_s8 = inlined_call_operand.vmem [shape: f32[1,128], index: 8, kind: input, shape index: {}]   ;;  %s6331_s9 = inlined_call_operand.hbm [shape: f32[8,256], index: 9, kind: output, shape index: {}]  }
   0x1   :  { %v4565_v0 = vld [vmem:[%s6325_s3 + $0x18] sm:$0xff]  ;;  %v4575_v2 = vld [vmem:[%s6325_s3 + $0x10] sm:$0xff]  ;;  %v4587_v4 = vld [vmem:[%s6325_s3 + $0x8] sm:$0xff] }
   0x2   :  { %v4570_v1 = vld [vmem:[%s6324_s2 + $0x18] sm:$0xff]  ;;  %81 = vmatpush.msra.mxu0 %v4565_v0  ;;  %v4582_v3 = vld [vmem:[%s6324_s2 + $0x10] sm:$0xff]  ;;  %v4592_v5 = vld [vmem:[%s6324_s2 + $0x8] sm:$0xff] }
   0x3   :  { %101 = vmatpush.msra.mxu1 %v4570_v1 }
   0x4   :  { %82 = vmatpush.msra.mxu0 %v4575_v2 }
   0x5   :  { %102 = vmatpush.msra.mxu1 %v4582_v3 }
   0x6   :  { %14 = vsyncpa [#allocation3], 0  ;;  %v4599_v6 = vld [vmem:[%s6325_s3] sm:$0xff]  ;;  %83 = vmatpush.msra.mxu0 %v4587_v4  ;;  %v4506_v8 = vmov 0.0   ;;  %v4634_v16 = vld [vmem:[%s6322_s0 + $0x10] sm:$0xf] }
   0x7   :  { %v4604_v7 = vld [vmem:[%s6324_s2] sm:$0xff]  ;;  %103 = vmatpush.msra.mxu1 %v4592_v5  ;;  %v4639_v20 = vld [vmem:[%s6322_s0 + $0x8] sm:$0xf]  ;;  %v4650_v28 = vld [vmem:[%s6322_s0 + $0x14] sm:$0xf]  ;;  %vm164_vm0 = vcmask 60416  }
   0x8   :  { %84 = vmatpush.msra.mxu0 %v4599_v6  ;;  %v4623_v9 = vld [vmem:[%s6326_s4] ss:$0 sm:$0xff]  ;;  %v4644_v21 = vld [vmem:[%s6322_s0 + $0x4] sm:$0xf]  ;;  %v4658_v35 = vld [vmem:[%s6322_s0 + $0xc] sm:$0xf] }
   0x9   :  { %104 = vmatpush.msra.mxu1 %v4604_v7  ;;  %85 = vmatmul.f32.vlgmr.msra.gmra.mxu0 %v4506_v8  ;;  %v4629_v14 = vld [vmem:[%s6322_s0] sm:$0xf]  ;;  %v4670_v41 = vld [vmem:[%s6322_s0 + $0x18] sm:$0xf]  ;;  %v4677_v47 = vld [vmem:[%s6322_s0 + $0x1c] sm:$0xf] }
   0xa   :  { %105 = vmatmul.f32.vlgmr.msra.gmra.mxu1 %v4506_v8  ;;  %615 = vmatpush.msrb.mxu0 %v4570_v1  ;;  %v4664_v37 = vld [vmem:[%s6327_s5] ss:$0 sm:$0xff]  ;;  %vm207_vm1 = vcmask 1041409   ;;  %vm209_vm2 = vcmask 1042434   ;;  %vm211_vm3 = vcmask 1043459   ;;  %vm213_vm4 = vcmask 1044484  }
   0xb   :  { %vm215_vm5 = vcmask 1045509   ;;  %vm217_vm6 = vcmask 1046534   ;;  %vm219_vm7 = vcmask 1047559   ;;  %vm222_vm8 = vcmask 31744   ;;  %s4508_s10 = smov 64   ;;  %s4509_s11 = smov 32  }
   0xc   :  { %616 = vmatpush.msrb.mxu0 %v4582_v3  ;;  %vm506_vm13 = vcmask 1043456   ;;  %s4510_s12 = smov 96  }
   0xe   :  { %617 = vmatpush.msrb.mxu0 %v4592_v5 }
  0x10   :  { %618 = vmatpush.msrb.mxu0 %v4604_v7 }
  0x12   :  { %1100 = vmatpush.msra.mxu0 %v4570_v1 }
  0x14   :  { %1101 = vmatpush.msra.mxu0 %v4582_v3 }
  0x16   :  { %1102 = vmatpush.msra.mxu0 %v4592_v5 }
  0x18   :  { %1103 = vmatpush.msra.mxu0 %v4604_v7 }
  0x86   :  { %v86_v10 = vpop.f32.mrf.mxu0 }
  0x87   :  { %v106_v11 = vpop.f32.mrf.mxu1 }
  0x88   :  { %v107_v12 = vadd.f32 %v106_v11, %v86_v10 }
  0x8a   :  { %v112_v13 = vadd.f32 %v4623_v9, %v107_v12 }
  0x8c   :  { %v121_v15 = vperm.slane %v112_v13, 0  ;;  %v117_v17 = vrot.slane %v112_v13, 4  ;;  %v115_v18 = vrot.slane %v112_v13, 2  ;;  %v114_v19 = vrot.slane %v112_v13, 1 }
  0x8d   :  { %v118_v22 = vrot.slane %v112_v13, 5  ;;  %v116_v23 = vrot.slane %v112_v13, 3  ;;  %v119_v31 = vrot.slane %v112_v13, 6  ;;  %v120_v39 = vrot.slane %v112_v13, 7 }
  0x8e   :  { %v137_v24 = vadd.f32 %v121_v15, %v4629_v14  ;;  %v125_v25 = vperm.slane %v117_v17, 0  ;;  %v123_v26 = vperm.slane %v115_v18, 0  ;;  %v122_v27 = vperm.slane %v114_v19, 0 }
  0x8f   :  { %v126_v29 = vperm.slane %v118_v22, 0  ;;  %v124_v30 = vperm.slane %v116_v23, 0  ;;  %v127_v40 = vperm.slane %v119_v31, 0  ;;  %v128_v44 = vperm.slane %v120_v39, 0 }
  0x90   :  { %4061 = vtanh.f32 %v137_v24  ;;  %v141_v32 = vadd.f32 %v125_v25, %v4634_v16  ;;  %v139_v33 = vadd.f32 %v123_v26, %v4639_v20  ;;  %v138_v34 = vadd.f32 %v122_v27, %v4644_v21 }
  0x91   :  { %v142_v36 = vadd.f32 %v126_v29, %v4650_v28  ;;  %v140_v38 = vadd.f32 %v124_v30, %v4658_v35  ;;  %v143_v46 = vadd.f32 %v127_v40, %v4670_v41  ;;  %v144_v54 = vadd.f32 %v128_v44, %v4677_v47 }
  0x92   :  { %4063 = vtanh.f32 %v141_v32  ;;  %v197_v19 = vlaneseq }
  0x93   :  { %4065 = vtanh.f32 %v139_v33 }
  0x94   :  { %4067 = vtanh.f32 %v138_v34  ;;  %v4696_v24 = vand.u32 127, %v197_v19 }
  0x95   :  { %4069 = vtanh.f32 %v142_v36 }
  0x96   :  { %v4062_v42 = vpop.eup %4061  ;;  %4071 = vtanh.f32 %v140_v38 }
  0x97   :  { %v156_v43 = vmul.f32 %v4062_v42, %v4664_v37  ;;  %4073 = vtanh.f32 %v143_v46 }
  0x98   :  { %v4064_v45 = vpop.eup %4063  ;;  %4075 = vtanh.f32 %v144_v54 }
  0x99   :  { %v4066_v48 = vpop.eup %4065  ;;  %v165_v49 = vsel %vm164_vm0, %v156_v43, 0.0  ;;  %v160_v50 = vmul.f32 %v4064_v45, %v4664_v37 }
  0x9a   :  { %v4068_v51 = vpop.eup %4067  ;;  %166 = vadd.xlane.f32.xlu0 %v165_v49  ;;  %v158_v52 = vmul.f32 %v4066_v48, %v4664_v37 }
  0x9b   :  { %v177_v53 = vsel %vm164_vm0, %v160_v50, 0.0  ;;  %v4070_v55 = vpop.eup %4069  ;;  %v157_v58 = vmul.f32 %v4068_v51, %v4664_v37  ;;  %v4507_v51 = vmov 0  }
  0x9c   :  { %178 = vadd.xlane.f32.xlu2 %v177_v53  ;;  %v171_v56 = vsel %vm164_vm0, %v158_v52, 0.0  ;;  %v4072_v57 = vpop.eup %4071  ;;  %v161_v59 = vmul.f32 %v4070_v55, %v4664_v37  ;;  %4024 = vset.pattern.permute.xlu1 %v4507_v51 }
  0x9d   :  { %172 = vadd.xlane.f32.xlu1 %v171_v56  ;;  %v159_v60 = vmul.f32 %v4072_v57, %v4664_v37  ;;  %v168_v61 = vsel %vm164_vm0, %v157_v58, 0.0  ;;  %v4074_v62 = vpop.eup %4073  ;;  %4025 = vset.pattern.permute.xlu2 %v4507_v51 }
  0x9e   :  { %v180_v63 = vsel %vm164_vm0, %v161_v59, 0.0  ;;  %v4076_v11 = vpop.eup %4075  ;;  %v162_v12 = vmul.f32 %v4074_v62, %v4664_v37  ;;  %4023 = vset.pattern.permute.xlu0 %v4507_v51 }
  0x9f   :  { %v174_v10 = vsel %vm164_vm0, %v159_v60, 0.0  ;;  %v163_v13 = vmul.f32 %v4076_v11, %v4664_v37 }
  0xa0   :  { %v183_v15 = vsel %vm164_vm0, %v162_v12, 0.0 }
  0xa1   :  { %v186_v17 = vsel %vm164_vm0, %v163_v13, 0.0 }
  0xa2   :  { %169 = vadd.xlane.f32.xlu0 %v168_v61 }
  0xa4   :  { %181 = vadd.xlane.f32.xlu2 %v180_v63 }
  0xa5   :  { %175 = vadd.xlane.f32.xlu1 %v174_v10 }
  0xaa   :  { %184 = vadd.xlane.f32.xlu0 %v183_v15 }
  0xad   :  { %187 = vadd.xlane.f32.xlu1 %v186_v17 }
 0x10d   :  { %v167_v18 = vpop.xlane.xlu0 %166 }
 0x10e   :  { %v199_v26 = vperm.slane %v167_v18, %v4696_v24 }
 0x10f   :  { %v179_v22 = vpop.xlane.xlu2 %178 }
 0x110   :  { %v173_v23 = vpop.xlane.xlu1 %172  ;;  %v203_v34 = vperm.slane %v179_v22, %v4696_v24 }
 0x111   :  { %v201_v29 = vperm.slane %v173_v23, %v4696_v24 }
 0x115   :  { %v170_v25 = vpop.xlane.xlu0 %169 }
 0x116   :  { %v200_v27 = vperm.slane %v170_v25, %v4696_v24 }
 0x117   :  { %v182_v36 = vpop.xlane.xlu2 %181 }
 0x118   :  { %v208_v30 = vsel %vm207_vm1, %v200_v27, %v199_v26  ;;  %v176_v31 = vpop.xlane.xlu1 %175  ;;  %v204_v40 = vperm.slane %v182_v36, %v4696_v24 }
 0x119   :  { %v202_v32 = vperm.slane %v176_v31, %v4696_v24  ;;  %v210_v33 = vsel %vm209_vm2, %v201_v29, %v208_v30 }
 0x11b   :  { %v212_v38 = vsel %vm211_vm3, %v202_v32, %v210_v33 }
 0x11c   :  { %v214_v39 = vsel %vm213_vm4, %v203_v34, %v212_v38 }
 0x11d   :  { %v185_v42 = vpop.xlane.xlu0 %184  ;;  %v216_v44 = vsel %vm215_vm5, %v204_v40, %v214_v39  ;;  %v4742_v40 = vshrl.u32 %v197_v19, 7 }
 0x11e   :  { %v205_v43 = vperm.slane %v185_v42, %v4696_v24 }
 0x120   :  { %v188_v45 = vpop.xlane.xlu1 %187  ;;  %v218_v46 = vsel %vm217_vm6, %v205_v43, %v216_v44  ;;  %v4755_v44 = vld [vmem:[%s6323_s1 + $0x10] sm:$0xff] }
 0x121   :  { %v206_v48 = vperm.slane %v188_v45, %v4696_v24  ;;  %v379_v19 = vperm.slane %v4755_v44, 0 }
 0x123   :  { %v220_v49 = vsel %vm219_vm7, %v206_v48, %v218_v46  ;;  %v4767_v48 = vld [vmem:[%s6323_s1 + $0x8] sm:$0xff] }
 0x124   :  { %v223_v50 = vsel %vm222_vm8, %v220_v49, -inf  ;;  %v372_v49 = vperm.slane %v4767_v48, 0 }
 0x125   :  { %224 = vmax.xlane.f32.xlu2 %v223_v50 }
 0x198   :  { %v225_v52 = vpop.xlane.xlu2 %224 }
 0x199   :  { %v229_v53 = vperm.slane %v225_v52, 2  ;;  %v228_v54 = vperm.slane %v225_v52, 1  ;;  %v227_v55 = vperm.slane %v225_v52, 0  ;;  %v230_v59 = vperm.slane %v225_v52, 3 }
 0x19a   :  { %v231_v60 = vperm.slane %v225_v52, 4  ;;  %v234_v61 = vperm.slane %v225_v52, 7  ;;  %v232_v17 = vperm.slane %v225_v52, 5  ;;  %v233_v27 = vperm.slane %v225_v52, 6  ;;  %v4773_v52 = vld [vmem:[%s6323_s1 + $0x28] sm:$0xff] }
 0x19b   :  { %v245_v56 = vsub.f32 %v173_v23, %v229_v53  ;;  %v244_v57 = vsub.f32 %v170_v25, %v228_v54  ;;  %v243_v58 = vsub.f32 %v167_v18, %v227_v55  ;;  %v246_v11 = vsub.f32 %v176_v31, %v230_v59  ;;  %v4778_v53 = vld [vmem:[%s6323_s1 + $0x20] sm:$0xff]  ;;  %v4790_v59 = vld [vmem:[%s6323_s1 + $0x30] sm:$0xff] }
 0x19c   :  { %v247_v12 = vsub.f32 %v179_v22, %v231_v60  ;;  %v250_v13 = vsub.f32 %v188_v45, %v234_v61  ;;  %v248_v30 = vsub.f32 %v182_v36, %v232_v17  ;;  %v249_v22 = vsub.f32 %v185_v42, %v233_v27  ;;  %v4749_v42 = vld [vmem:[%s6323_s1] sm:$0xff]  ;;  %v4761_v45 = vld [vmem:[%s6323_s1 + $0x18] sm:$0xff] }
 0x19d   :  { %v255_v62 = vmul.f32 1.442695, %v245_v56  ;;  %v253_v63 = vmul.f32 1.442695, %v244_v57  ;;  %v251_v10 = vmul.f32 1.442695, %v243_v58 }
 0x19e   :  { %v257_v15 = vmul.f32 1.442695, %v246_v11  ;;  %v259_v26 = vmul.f32 1.442695, %v247_v12  ;;  %v265_v23 = vmul.f32 1.442695, %v250_v13 }
 0x19f   :  { %4077 = vpow2.f32 %v255_v62  ;;  %v261_v31 = vmul.f32 1.442695, %v248_v30  ;;  %v263_v32 = vmul.f32 1.442695, %v249_v22  ;;  %v365_v43 = vperm.slane %v4749_v42, 0  ;;  %v4785_v58 = vld [vmem:[%s6323_s1 + $0x38] sm:$0xff] }
 0x1a0   :  { %4079 = vpow2.f32 %v253_v63  ;;  %v386_v46 = vperm.slane %v4761_v45, 0  ;;  %v400_v54 = vperm.slane %v4773_v52, 0  ;;  %v393_v55 = vperm.slane %v4778_v53, 0 }
 0x1a1   :  { %4081 = vpow2.f32 %v251_v10  ;;  %v414_v63 = vperm.slane %v4785_v58, 0  ;;  %v407_v10 = vperm.slane %v4790_v59, 0 }
 0x1a2   :  { %4083 = vpow2.f32 %v257_v15 }
 0x1a3   :  { %4085 = vpow2.f32 %v259_v26 }
 0x1a4   :  { %4087 = vpow2.f32 %v265_v23 }
 0x1a5   :  { %v4717_v29 = vpop.eup %4077  ;;  %4089 = vpow2.f32 %v261_v31 }
 0x1a6   :  { %v4719_v18 = vpop.eup %4079  ;;  %282 = vperm.xlu2 %4025, %v4717_v29   ;;  %4091 = vpow2.f32 %v263_v32 }
 0x1a7   :  { %v4722_v25 = vpop.eup %4081  ;;  %279 = vperm.xlu1 %4024, %v4719_v18  }
 0x1a8   :  { %276 = vperm.xlu0 %4023, %v4722_v25   ;;  %v4726_v33 = vpop.eup %4083 }
 0x1a9   :  { %v4728_v34 = vpop.eup %4085 }
 0x1aa   :  { %v4731_v38 = vpop.eup %4087 }
 0x1ab   :  { %v4735_v36 = vpop.eup %4089 }
 0x1ac   :  { %v4737_v39 = vpop.eup %4091 }
 0x1ae   :  { %285 = vperm.xlu2 %4025, %v4726_v33  }
 0x1af   :  { %288 = vperm.xlu1 %4024, %v4728_v34  }
 0x1b0   :  { %297 = vperm.xlu0 %4023, %v4731_v38  }
 0x1b6   :  { %291 = vperm.xlu2 %4025, %v4735_v36  }
 0x1b7   :  { %294 = vperm.xlu1 %4024, %v4737_v39  }
 0x1b8   :  { %4027 = vset.pattern.permute.xlu0 %v4742_v40 }
 0x1bf   :  { %4026 = vset.pattern.permute.xlu1 %v4742_v40 }
 0x1c0   :  { %377 = vperm.xlu0 %4027, %v372_v49  }
 0x1c7   :  { %370 = vperm.xlu1 %4026, %v365_v43  }
 0x1c8   :  { %398 = vperm.xlu0 %4027, %v393_v55  }
 0x1cf   :  { %384 = vperm.xlu1 %4026, %v379_v19  }
 0x1d0   :  { %412 = vperm.xlu0 %4027, %v407_v10  }
 0x1d7   :  { %391 = vperm.xlu1 %4026, %v386_v46  }
 0x1d8   :  { %4028 = vset.pattern.permute.xlu0 %v4507_v51 }
 0x1df   :  { %405 = vperm.xlu1 %4026, %v400_v54  }
 0x1e7   :  { %419 = vperm.xlu1 %4026, %v414_v63  }
 0x1ef   :  { %4029 = vset.pattern.permute.xlu1 %v4507_v51 }
 0x200   :  { %v283_v50 = vpop.permute.xlu2 %282 }
 0x201   :  { %v301_v13 = vperm.slane %v283_v50, %v4696_v24 }
 0x208   :  { %v286_v60 = vpop.permute.xlu2 %285 }
 0x209   :  { %v302_v26 = vperm.slane %v286_v60, %v4696_v24 }
 0x210   :  { %v292_v27 = vpop.permute.xlu2 %291 }
 0x211   :  { %v304_v31 = vperm.slane %v292_v27, %v4696_v24 }
 0x219   :  { %v280_v56 = vpop.permute.xlu1 %279 }
 0x21a   :  { %v277_v57 = vpop.permute.xlu0 %276  ;;  %v300_v61 = vperm.slane %v280_v56, %v4696_v24 }
 0x21b   :  { %v299_v62 = vperm.slane %v277_v57, %v4696_v24 }
 0x21d   :  { %v307_v11 = vsel %vm207_vm1, %v300_v61, %v299_v62 }
 0x21e   :  { %v308_v15 = vsel %vm209_vm2, %v301_v13, %v307_v11 }
 0x21f   :  { %v309_v23 = vsel %vm211_vm3, %v302_v26, %v308_v15 }
 0x221   :  { %v289_v12 = vpop.permute.xlu1 %288 }
 0x222   :  { %v303_v17 = vperm.slane %v289_v12, %v4696_v24  ;;  %v298_v22 = vpop.permute.xlu0 %297 }
 0x223   :  { %v306_v19 = vperm.slane %v298_v22, %v4696_v24 }
 0x224   :  { %v310_v30 = vsel %vm213_vm4, %v303_v17, %v309_v23 }
 0x225   :  { %v311_v46 = vsel %vm215_vm5, %v304_v31, %v310_v30 }
 0x229   :  { %v295_v32 = vpop.permute.xlu1 %294 }
 0x22a   :  { %v305_v43 = vperm.slane %v295_v32, %v4696_v24 }
 0x22c   :  { %v312_v49 = vsel %vm217_vm6, %v305_v43, %v311_v46 }
 0x22d   :  { %v313_v50 = vsel %vm219_vm7, %v306_v19, %v312_v49 }
 0x22e   :  { %v315_v54 = vsel %vm222_vm8, %v313_v50, 0.0 }
 0x22f   :  { %316 = vadd.xlane.f32.xlu2 %v315_v54 }
 0x232   :  { %v378_v17 = vpop.permute.xlu0 %377 }
 0x239   :  { %v371_v56 = vpop.permute.xlu1 %370 }
 0x241   :  { %v385_v12 = vpop.permute.xlu1 %384 }
 0x249   :  { %v392_v54 = vpop.permute.xlu1 %391 }
 0x2a2   :  { %v317_v55 = vpop.xlane.xlu2 %316 }
 0x2a3   :  { %4093 = vrcp.f32 %v317_v55  ;;  %v329_v62 = vand.u32 2147483648, %v317_v55  ;;  %v327_v10 = vand.u32 2147483647, %v317_v55  ;;  %vm323_vm10 = vweird.f32 %v317_v55 }
 0x2a5   :  { %v330_v13 = vor.u32 1.1754944e-38, %v329_v62  ;;  %vm328_vm12 = vcmp.eq.f32.partialorder %v327_v10, 8.507059e+37 }
 0x2a9   :  { %v4094_v57 = vpop.eup %4093 }
 0x2aa   :  { %v319_v60 = vmul.f32 %v4094_v57, %v317_v55  ;;  %vm324_vm9 = vweird.f32 %v4094_v57  ;;  %v399_v55 = vpop.permute.xlu0 %398 }
 0x2ab   :  { %vm325_vm11 = vmor %vm323_vm10, %vm324_vm9 }
 0x2ac   :  { %v320_v61 = vsub.f32 1.0, %v319_v60 }
 0x2ae   :  { %v321_v63 = vmul.f32 %v4094_v57, %v320_v61 }
 0x2b0   :  { %v322_v11 = vadd.f32 %v4094_v57, %v321_v63  ;;  %v406_v63 = vpop.permute.xlu1 %405 }
 0x2b2   :  { %v326_v15 = vsel %vm325_vm11, %v4094_v57, %v322_v11  ;;  %v413_v10 = vpop.permute.xlu0 %412  ;;  %vm65_vm11 = vcmask 261120  }
 0x2b3   :  { %v331_v26 = vsel %vm328_vm12, %v330_v13, %v326_v15 }
 0x2b4   :  { %v334_v27 = vperm.slane %v331_v26, 1  ;;  %v335_v23 = vperm.slane %v331_v26, 2  ;;  %v333_v30 = vperm.slane %v331_v26, 0  ;;  %v336_v19 = vperm.slane %v331_v26, 3 }
 0x2b5   :  { %v337_v46 = vperm.slane %v331_v26, 4  ;;  %v338_v61 = vperm.slane %v331_v26, 5 }
 0x2b6   :  { %v350_v22 = vmul.f32 %v4719_v18, %v334_v27  ;;  %v351_v31 = vmul.f32 %v4717_v29, %v335_v23  ;;  %v349_v32 = vmul.f32 %v4722_v25, %v333_v30  ;;  %v352_v57 = vmul.f32 %v4726_v33, %v336_v19 }
 0x2b7   :  { %v353_v60 = vmul.f32 %v4728_v34, %v337_v46  ;;  %v339_v29 = vperm.slane %v331_v26, 6  ;;  %v354_v25 = vmul.f32 %v4735_v36, %v338_v61  ;;  %v4828_v36 = vld [vmem:[%s6329_s7 + $0x10] sm:$0xff] }
 0x2b8   :  { %v430_v43 = vmul.f32 %v378_v17, %v350_v22  ;;  %v431_v49 = vmul.f32 %v385_v12, %v351_v31  ;;  %v429_v50 = vmul.f32 %v371_v56, %v349_v32  ;;  %v432_v18 = vmul.f32 %v392_v54, %v352_v57  ;;  %v420_v34 = vpop.permute.xlu1 %419  ;;  %v4823_v17 = vld [vmem:[%s6329_s7 + $0x18] sm:$0xff] }
 0x2b9   :  { %v433_v62 = vmul.f32 %v399_v55, %v353_v60  ;;  %v355_v56 = vmul.f32 %v4737_v39, %v339_v29  ;;  %v434_v11 = vmul.f32 %v406_v63, %v354_v25  ;;  %v340_v12 = vperm.slane %v331_v26, 7  ;;  %449 = vmatpush.msra.mxu2 %v4823_v17  ;;  %938 = vmatpush.msrb.mxu1 %v4823_v17  ;;  %v4842_v39 = vld [vmem:[%s6329_s7] sm:$0xff] }
 0x2ba   :  { %469 = vperm.xlu1 %4029, %v430_v43   ;;  %472 = vperm.xlu2 %4025, %v431_v49   ;;  %v4847_v26 = vld [vmem:[%s6328_s6] sm:$0xf] }
 0x2bb   :  { %466 = vperm.xlu0 %4028, %v429_v50   ;;  %v435_v13 = vmul.f32 %v413_v10, %v355_v56  ;;  %v356_v33 = vmul.f32 %v4731_v38, %v340_v12  ;;  %450 = vmatpush.msra.mxu2 %v4828_v36  ;;  %v4837_v38 = vld [vmem:[%s6329_s7 + $0x8] sm:$0xff] }
 0x2bc   :  { %939 = vmatpush.msrb.mxu1 %v4828_v36  ;;  %3972 = vmatpush.msk.msra.mxu3 %vm506_vm13, %v4847_v26 }
 0x2bd   :  { %v436_v15 = vmul.f32 %v420_v34, %v356_v33  ;;  %451 = vmatpush.msra.mxu2 %v4837_v38 }
 0x2be   :  { %593 = vmatpush.msrb.mxu3 %v4565_v0  ;;  %940 = vmatpush.msrb.mxu1 %v4837_v38 }
 0x2bf   :  { %452 = vmatpush.msra.mxu2 %v4842_v39 }
 0x2c0   :  { %453 = vmatmul.f32.vlgmr.msra.gmra.mxu2 %v4506_v8  ;;  %594 = vmatpush.msrb.mxu3 %v4575_v2 }
 0x2c1   :  { %941 = vmatpush.msrb.mxu1 %v4842_v39  ;;  %3978 = vmatpush.msk.msrb.mxu2 %vm506_vm13, %v4847_v26 }
 0x2c2   :  { %475 = vperm.xlu1 %4029, %v432_v18   ;;  %595 = vmatpush.msrb.mxu3 %v4587_v4 }
 0x2c3   :  { %478 = vperm.xlu0 %4028, %v433_v62   ;;  %1423 = vmatpush.msra.mxu1 %v4823_v17 }
 0x2c4   :  { %3984 = vmatpush.msk.msra.mxu2 %vm506_vm13, %v4847_v26  ;;  %596 = vmatpush.msrb.mxu3 %v4599_v6 }
 0x2c5   :  { %1424 = vmatpush.msra.mxu1 %v4828_v36 }
 0x2c7   :  { %1425 = vmatpush.msra.mxu1 %v4837_v38 }
 0x2c9   :  { %1426 = vmatpush.msra.mxu1 %v4842_v39 }
 0x2ca   :  { %481 = vperm.xlu1 %4029, %v434_v11   ;;  %v4891_v11 = vld [vmem:[%s6330_s8] ss:$0 sm:$0xff] }
 0x2cb   :  { %484 = vperm.xlu0 %4028, %v435_v13  }
 0x2d2   :  { %487 = vperm.xlu1 %4029, %v436_v15  }
 0x314   :  { %v473_v32 = vpop.permute.xlu2 %472 }
 0x315   :  { %v491_v46 = vperm.slane %v473_v32, %v4696_v24 }
 0x32c   :  { %v470_v27 = vpop.permute.xlu1 %469 }
 0x32d   :  { %v467_v23 = vpop.permute.xlu0 %466  ;;  %v490_v22 = vperm.slane %v470_v27, %v4696_v24 }
 0x32e   :  { %v489_v31 = vperm.slane %v467_v23, %v4696_v24 }
 0x330   :  { %v497_v43 = vsel %vm207_vm1, %v490_v22, %v489_v31 }
 0x331   :  { %v498_v50 = vsel %vm209_vm2, %v491_v46, %v497_v43 }
 0x334   :  { %v476_v8 = vpop.permute.xlu1 %475 }
 0x335   :  { %v479_v30 = vpop.permute.xlu0 %478  ;;  %v492_v19 = vperm.slane %v476_v8, %v4696_v24 }
 0x336   :  { %v493_v54 = vperm.slane %v479_v30, %v4696_v24 }
 0x337   :  { %v499_v55 = vsel %vm211_vm3, %v492_v19, %v498_v50 }
 0x338   :  { %v500_v61 = vsel %vm213_vm4, %v493_v54, %v499_v55 }
 0x33c   :  { %v482_v49 = vpop.permute.xlu1 %481 }
 0x33d   :  { %v494_v57 = vperm.slane %v482_v49, %v4696_v24  ;;  %v485_v60 = vpop.permute.xlu0 %484 }
 0x33e   :  { %v495_v18 = vperm.slane %v485_v60, %v4696_v24 }
 0x33f   :  { %v501_v62 = vsel %vm215_vm5, %v494_v57, %v500_v61 }
 0x340   :  { %v502_v63 = vsel %vm217_vm6, %v495_v18, %v501_v62 }
 0x343   :  { %v454_v10 = vpop.f32.mrf.mxu2 }
 0x344   :  { %v488_v29 = vpop.permute.xlu1 %487 }
 0x345   :  { %v496_v25 = vperm.slane %v488_v29, %v4696_v24 }
 0x347   :  { %v503_v56 = vsel %vm219_vm7, %v496_v25, %v502_v63 }
 0x348   :  { %3973 = vmatmul.msk.f32.vlgmr.msra.gmra.mxu3 %vm222_vm8, %v503_v56 }
 0x349   :  { %1076 = vmatpush.msra.mxu3 %v4565_v0 }
 0x34b   :  { %1077 = vmatpush.msra.mxu3 %v4575_v2 }
 0x34d   :  { %1078 = vmatpush.msra.mxu3 %v4587_v4 }
 0x34f   :  { %1079 = vmatpush.msra.mxu3 %v4599_v6 }
 0x3cb   :  { %v527_v12 = vpop.f32.mrf.mxu3 }
 0x3cc   :  { %v528_v13 = vadd.f32 %v527_v12, %v454_v10 }
 0x3ce   :  { %v533_v33 = vadd.f32 %v4891_v11, %v528_v13 }
 0x3d0   :  { %4095 = vtanh.f32 %v533_v33  ;;  %v3974_v15 = vmul.f32 -1.442695, %v533_v33 }
 0x3d2   :  { %4097 = vpow2.f32 %v3974_v15 }
 0x3d6   :  { %v4096_v34 = vpop.eup %4095 }
 0x3d7   :  { %556 = vrot.lane.b32.xlu2 %v4096_v34, %s4508_s10 }
 0x3d8   :  { %v4098_v27 = vpop.eup %4097 }
 0x3d9   :  { %v537_v23 = vadd.f32 1.0, %v4098_v27 }
 0x3db   :  { %4099 = vrcp.f32 %v537_v23  ;;  %v549_v43 = vand.u32 2147483648, %v537_v23  ;;  %vm543_vm15 = vweird.f32 %v537_v23  ;;  %v547_v19 = vand.u32 2147483647, %v537_v23 }
 0x3dd   :  { %v550_v49 = vor.u32 1.1754944e-38, %v549_v43  ;;  %vm548_vm10 = vcmp.eq.f32.partialorder %v547_v19, 8.507059e+37 }
 0x3e1   :  { %v4100_v8 = vpop.eup %4099 }
 0x3e2   :  { %v539_v30 = vmul.f32 %v4100_v8, %v537_v23  ;;  %vm544_vm14 = vweird.f32 %v4100_v8 }
 0x3e3   :  { %vm545_vm9 = vmor %vm543_vm15, %vm544_vm14 }
 0x3e4   :  { %v540_v22 = vsub.f32 1.0, %v539_v30 }
 0x3e6   :  { %v541_v31 = vmul.f32 %v4100_v8, %v540_v22 }
 0x3e8   :  { %v542_v32 = vadd.f32 %v4100_v8, %v541_v31 }
 0x3ea   :  { %v546_v46 = vsel %vm545_vm9, %v4100_v8, %v542_v32 }
 0x3eb   :  { %v551_v54 = vsel %vm548_vm10, %v550_v49, %v546_v46 }
 0x3ec   :  { %v554_v57 = vmul.f32 0.0, %v551_v54 }
 0x431   :  { %v557_v50 = vpop.permute.xlu2 %556 }
 0x432   :  { %v559_v55 = vmul.f32 %v557_v50, %v551_v54 }
 0x434   :  { %561 = vrot.lane.b32.xlu0 %v559_v55, %s4509_s11 }
 0x4a6   :  { %v562_v60 = vpop.permute.xlu0 %561 }
 0x4a7   :  { %v4896_v61 = vadd.f32 %v562_v60, %v554_v57 }
 0x4a9   :  { %4101 = vtanh.f32 %v4896_v61  ;;  %577 = vrot.lane.b32.xlu2 %v4896_v61, %s4510_s12 }
 0x4af   :  { %v4102_v18 = vpop.eup %4101 }
 0x4b0   :  { %567 = vrot.lane.b32.xlu1 %v4102_v18, %s4508_s10 }
 0x503   :  { %v578_v62 = vpop.permute.xlu2 %577 }
 0x504   :  { %3975 = vmatmul.msk.f32.vlgmr.msrb.gmra.mxu3 %vm65_vm11, %v578_v62 }
 0x505   :  { %1561 = vmatpush.msrb.mxu3 %v4565_v0 }
 0x507   :  { %1562 = vmatpush.msrb.mxu3 %v4575_v2 }
 0x509   :  { %1563 = vmatpush.msrb.mxu3 %v4587_v4 }
 0x50b   :  { %1564 = vmatpush.msrb.mxu3 %v4599_v6 }
 0x522   :  { %v568_v29 = vpop.permute.xlu1 %567 }
 0x523   :  { %v570_v25 = vmul.f32 %v568_v29, %v551_v54 }
 0x525   :  { %572 = vrot.lane.b32.xlu0 %v570_v25, %s4509_s11 }
 0x587   :  { %v598_v0 = vpop.f32.mrf.mxu3 }
 0x597   :  { %v573_v63 = vpop.permute.xlu0 %572 }
 0x598   :  { %575 = vst.msk [vmem:[#allocation2] sm:$0xff] %vm65_vm11, %v573_v63  ;;  %3976 = vmatmul.msk.f32.vlgmr.msrb.gmra.mxu0 %vm65_vm11, %v573_v63  ;;  %3977 = vmatmul.msk.f32.vlgmr.msrb.gmra.mxu1 %vm65_vm11, %v573_v63 }
 0x599   :  { %1585 = vmatpush.msrb.mxu0 %v4570_v1  ;;  %1908 = vmatpush.msrb.mxu1 %v4823_v17 }
 0x59b   :  { %1586 = vmatpush.msrb.mxu0 %v4582_v3  ;;  %1909 = vmatpush.msrb.mxu1 %v4828_v36 }
 0x59d   :  { %1587 = vmatpush.msrb.mxu0 %v4592_v5  ;;  %1910 = vmatpush.msrb.mxu1 %v4837_v38 }
 0x59f   :  { %1588 = vmatpush.msrb.mxu0 %v4604_v7  ;;  %1911 = vmatpush.msrb.mxu1 %v4842_v39 }
 0x615   :  { %v620_v2 = vpop.f32.mrf.mxu0 }
 0x616   :  { %v621_v4 = vadd.f32 %v620_v2, %v598_v0 }
 0x618   :  { %v623_v6 = vadd.f32 %v4623_v9, %v621_v4 }
 0x61a   :  { %v632_v1 = vperm.slane %v623_v6, 0  ;;  %v626_v56 = vrot.slane %v623_v6, 2  ;;  %v625_v10 = vrot.slane %v623_v6, 1  ;;  %v628_v12 = vrot.slane %v623_v6, 4 }
 0x61b   :  { %v629_v3 = vrot.slane %v623_v6, 5  ;;  %v627_v13 = vrot.slane %v623_v6, 3  ;;  %v631_v23 = vrot.slane %v623_v6, 7 }
 0x61c   :  { %v648_v33 = vadd.f32 %v632_v1, %v4629_v14  ;;  %v634_v5 = vperm.slane %v626_v56, 0  ;;  %v633_v34 = vperm.slane %v625_v10, 0  ;;  %v636_v15 = vperm.slane %v628_v12, 0 }
 0x61d   :  { %v637_v27 = vperm.slane %v629_v3, 0  ;;  %v635_v7 = vperm.slane %v627_v13, 0  ;;  %v630_v14 = vrot.slane %v623_v6, 6  ;;  %v639_v32 = vperm.slane %v631_v23, 0 }
 0x61e   :  { %4103 = vtanh.f32 %v648_v33  ;;  %v650_v8 = vadd.f32 %v634_v5, %v4639_v20  ;;  %v649_v30 = vadd.f32 %v633_v34, %v4644_v21  ;;  %v652_v9 = vadd.f32 %v636_v15, %v4634_v16 }
 0x61f   :  { %v653_v22 = vadd.f32 %v637_v27, %v4650_v28  ;;  %v651_v31 = vadd.f32 %v635_v7, %v4658_v35  ;;  %v638_v46 = vperm.slane %v630_v14, 0  ;;  %v655_v21 = vadd.f32 %v639_v32, %v4677_v47 }
 0x620   :  { %4105 = vtanh.f32 %v650_v8 }
 0x621   :  { %4107 = vtanh.f32 %v649_v30  ;;  %v654_v55 = vadd.f32 %v638_v46, %v4670_v41 }
 0x622   :  { %4109 = vtanh.f32 %v652_v9 }
 0x623   :  { %4111 = vtanh.f32 %v653_v22 }
 0x624   :  { %v4104_v43 = vpop.eup %4103  ;;  %4113 = vtanh.f32 %v651_v31 }
 0x625   :  { %v664_v19 = vmul.f32 %v4104_v43, %v4664_v37  ;;  %4115 = vtanh.f32 %v655_v21 }
 0x626   :  { %v4106_v20 = vpop.eup %4105  ;;  %4117 = vtanh.f32 %v654_v55 }
 0x627   :  { %v4108_v49 = vpop.eup %4107  ;;  %v672_v16 = vsel %vm164_vm0, %v664_v19, 0.0  ;;  %v666_v28 = vmul.f32 %v4106_v20, %v4664_v37 }
 0x628   :  { %v4110_v50 = vpop.eup %4109  ;;  %673 = vadd.xlane.f32.xlu1 %v672_v16  ;;  %v665_v35 = vmul.f32 %v4108_v49, %v4664_v37 }
 0x629   :  { %v678_v54 = vsel %vm164_vm0, %v666_v28, 0.0  ;;  %v4112_v57 = vpop.eup %4111  ;;  %v668_v47 = vmul.f32 %v4110_v50, %v4664_v37 }
 0x62a   :  { %679 = vadd.xlane.f32.xlu0 %v678_v54  ;;  %v675_v60 = vsel %vm164_vm0, %v665_v35, 0.0  ;;  %v4114_v18 = vpop.eup %4113  ;;  %v669_v62 = vmul.f32 %v4112_v57, %v4664_v37 }
 0x62b   :  { %676 = vadd.xlane.f32.xlu2 %v675_v60  ;;  %v667_v29 = vmul.f32 %v4114_v18, %v4664_v37  ;;  %v684_v25 = vsel %vm164_vm0, %v668_v47, 0.0  ;;  %v4116_v63 = vpop.eup %4115 }
 0x62c   :  { %v687_v41 = vsel %vm164_vm0, %v669_v62, 0.0  ;;  %v4118_v2 = vpop.eup %4117  ;;  %v671_v4 = vmul.f32 %v4116_v63, %v4664_v37 }
 0x62d   :  { %v681_v0 = vsel %vm164_vm0, %v667_v29, 0.0  ;;  %v670_v6 = vmul.f32 %v4118_v2, %v4664_v37 }
 0x62e   :  { %v693_v1 = vsel %vm164_vm0, %v671_v4, 0.0 }
 0x62f   :  { %v690_v56 = vsel %vm164_vm0, %v670_v6, 0.0 }
 0x630   :  { %685 = vadd.xlane.f32.xlu1 %v684_v25 }
 0x632   :  { %688 = vadd.xlane.f32.xlu0 %v687_v41 }
 0x633   :  { %682 = vadd.xlane.f32.xlu2 %v681_v0 }
 0x638   :  { %694 = vadd.xlane.f32.xlu1 %v693_v1 }
 0x63b   :  { %691 = vadd.xlane.f32.xlu2 %v690_v56 }
 0x69b   :  { %v674_v10 = vpop.xlane.xlu1 %673 }
 0x69c   :  { %v704_v5 = vperm.slane %v674_v10, %v4696_v24 }
 0x69d   :  { %v680_v3 = vpop.xlane.xlu0 %679 }
 0x69e   :  { %v677_v12 = vpop.xlane.xlu2 %676  ;;  %v706_v34 = vperm.slane %v680_v3, %v4696_v24 }
 0x69f   :  { %v705_v13 = vperm.slane %v677_v12, %v4696_v24 }
 0x6a1   :  { %v712_v15 = vsel %vm207_vm1, %v705_v13, %v704_v5 }
 0x6a2   :  { %v713_v7 = vsel %vm209_vm2, %v706_v34, %v712_v15 }
 0x6a3   :  { %v686_v33 = vpop.xlane.xlu1 %685 }
 0x6a4   :  { %v708_v8 = vperm.slane %v686_v33, %v4696_v24 }
 0x6a5   :  { %v689_v30 = vpop.xlane.xlu0 %688 }
 0x6a6   :  { %v683_v27 = vpop.xlane.xlu2 %682  ;;  %v709_v31 = vperm.slane %v689_v30, %v4696_v24 }
 0x6a7   :  { %v707_v37 = vperm.slane %v683_v27, %v4696_v24 }
 0x6a9   :  { %v714_v23 = vsel %vm211_vm3, %v707_v37, %v713_v7 }
 0x6aa   :  { %v715_v22 = vsel %vm213_vm4, %v708_v8, %v714_v23  ;;  %v861_v23 = vperm.slane %v4767_v48, 1  ;;  %v854_v8 = vperm.slane %v4749_v42, 1  ;;  %v882_v42 = vperm.slane %v4778_v53, 1 }
 0x6ab   :  { %v695_v9 = vpop.xlane.xlu1 %694  ;;  %v716_v19 = vsel %vm215_vm5, %v709_v31, %v715_v22  ;;  %v868_v22 = vperm.slane %v4755_v44, 1  ;;  %v896_v53 = vperm.slane %v4790_v59, 1 }
 0x6ac   :  { %v711_v43 = vperm.slane %v695_v9, %v4696_v24 }
 0x6ae   :  { %v692_v14 = vpop.xlane.xlu2 %691 }
 0x6af   :  { %v710_v32 = vperm.slane %v692_v14, %v4696_v24 }
 0x6b1   :  { %v717_v46 = vsel %vm217_vm6, %v710_v32, %v716_v19 }
 0x6b2   :  { %v718_v20 = vsel %vm219_vm7, %v711_v43, %v717_v46 }
 0x6b3   :  { %v720_v21 = vsel %vm222_vm8, %v718_v20, -inf  ;;  %v903_v20 = vperm.slane %v4785_v58, 1 }
 0x6b4   :  { %721 = vmax.xlane.f32.xlu0 %v720_v21 }
 0x727   :  { %v722_v49 = vpop.xlane.xlu0 %721 }
 0x728   :  { %v726_v16 = vperm.slane %v722_v49, 2  ;;  %v725_v28 = vperm.slane %v722_v49, 1  ;;  %v724_v50 = vperm.slane %v722_v49, 0  ;;  %v729_v57 = vperm.slane %v722_v49, 5 }
 0x729   :  { %v728_v60 = vperm.slane %v722_v49, 4  ;;  %v727_v18 = vperm.slane %v722_v49, 3  ;;  %v731_v4 = vperm.slane %v722_v49, 7  ;;  %v730_v56 = vperm.slane %v722_v49, 6 }
 0x72a   :  { %v742_v35 = vsub.f32 %v680_v3, %v726_v16  ;;  %v741_v54 = vsub.f32 %v677_v12, %v725_v28  ;;  %v740_v55 = vsub.f32 %v674_v10, %v724_v50  ;;  %v745_v25 = vsub.f32 %v689_v30, %v729_v57 }
 0x72b   :  { %v744_v63 = vsub.f32 %v686_v33, %v728_v60  ;;  %v743_v41 = vsub.f32 %v683_v27, %v727_v18  ;;  %v747_v3 = vsub.f32 %v695_v9, %v731_v4  ;;  %v746_v13 = vsub.f32 %v692_v14, %v730_v56 }
 0x72c   :  { %v752_v47 = vmul.f32 1.442695, %v742_v35  ;;  %v750_v62 = vmul.f32 1.442695, %v741_v54  ;;  %v748_v29 = vmul.f32 1.442695, %v740_v55 }
 0x72d   :  { %v758_v0 = vmul.f32 1.442695, %v745_v25  ;;  %v756_v2 = vmul.f32 1.442695, %v744_v63  ;;  %v754_v1 = vmul.f32 1.442695, %v743_v41 }
 0x72e   :  { %4119 = vpow2.f32 %v752_v47  ;;  %v762_v33 = vmul.f32 1.442695, %v747_v3  ;;  %v760_v34 = vmul.f32 1.442695, %v746_v13  ;;  %v875_v30 = vperm.slane %v4761_v45, 1 }
 0x72f   :  { %4121 = vpow2.f32 %v750_v62  ;;  %v889_v14 = vperm.slane %v4773_v52, 1 }
 0x730   :  { %4123 = vpow2.f32 %v748_v29 }
 0x731   :  { %4125 = vpow2.f32 %v758_v0 }
 0x732   :  { %4127 = vpow2.f32 %v756_v2 }
 0x733   :  { %4129 = vpow2.f32 %v754_v1 }
 0x734   :  { %v4960_v6 = vpop.eup %4119  ;;  %4131 = vpow2.f32 %v762_v33 }
 0x735   :  { %v4962_v10 = vpop.eup %4121  ;;  %779 = vperm.xlu0 %4028, %v4960_v6   ;;  %4133 = vpow2.f32 %v760_v34 }
 0x736   :  { %v4965_v12 = vpop.eup %4123  ;;  %776 = vperm.xlu1 %4029, %v4962_v10  }
 0x737   :  { %773 = vperm.xlu2 %4025, %v4965_v12   ;;  %v4969_v5 = vpop.eup %4125 }
 0x738   :  { %v4971_v15 = vpop.eup %4127 }
 0x739   :  { %v4974_v27 = vpop.eup %4129 }
 0x73a   :  { %v4978_v37 = vpop.eup %4131 }
 0x73b   :  { %v4980_v7 = vpop.eup %4133 }
 0x73d   :  { %788 = vperm.xlu0 %4028, %v4969_v5  }
 0x73e   :  { %785 = vperm.xlu1 %4029, %v4971_v15  }
 0x73f   :  { %782 = vperm.xlu2 %4025, %v4974_v27  }
 0x746   :  { %794 = vperm.xlu1 %4029, %v4978_v37  }
 0x747   :  { %791 = vperm.xlu2 %4025, %v4980_v7  }
 0x74e   :  { %4031 = vset.pattern.permute.xlu1 %v4742_v40 }
 0x74f   :  { %4030 = vset.pattern.permute.xlu2 %v4742_v40 }
 0x756   :  { %866 = vperm.xlu1 %4031, %v861_v23  }
 0x757   :  { %859 = vperm.xlu2 %4030, %v854_v8  }
 0x75e   :  { %880 = vperm.xlu1 %4031, %v875_v30  }
 0x75f   :  { %873 = vperm.xlu2 %4030, %v868_v22  }
 0x766   :  { %894 = vperm.xlu1 %4031, %v889_v14  }
 0x767   :  { %887 = vperm.xlu2 %4030, %v882_v42  }
 0x76e   :  { %908 = vperm.xlu1 %4031, %v903_v20  }
 0x76f   :  { %901 = vperm.xlu2 %4030, %v896_v53  }
 0x776   :  { %4033 = vset.pattern.permute.xlu1 %v4507_v51 }
 0x777   :  { %4032 = vset.pattern.permute.xlu2 %v4507_v51 }
 0x791   :  { %v774_v9 = vpop.permute.xlu2 %773 }
 0x792   :  { %v796_v19 = vperm.slane %v774_v9, %v4696_v24 }
 0x799   :  { %v783_v48 = vpop.permute.xlu2 %782 }
 0x79a   :  { %v799_v49 = vperm.slane %v783_v48, %v4696_v24 }
 0x7a1   :  { %v792_v54 = vpop.permute.xlu2 %791 }
 0x7a2   :  { %v802_v55 = vperm.slane %v792_v54, %v4696_v24 }
 0x7a7   :  { %v780_v31 = vpop.permute.xlu0 %779 }
 0x7a8   :  { %v777_v32 = vpop.permute.xlu1 %776  ;;  %v798_v45 = vperm.slane %v780_v31, %v4696_v24 }
 0x7a9   :  { %v797_v43 = vperm.slane %v777_v32, %v4696_v24 }
 0x7ab   :  { %v804_v46 = vsel %vm207_vm1, %v797_v43, %v796_v19 }
 0x7ac   :  { %v805_v44 = vsel %vm209_vm2, %v798_v45, %v804_v46 }
 0x7ad   :  { %v806_v50 = vsel %vm211_vm3, %v799_v49, %v805_v44 }
 0x7af   :  { %v789_v52 = vpop.permute.xlu0 %788 }
 0x7b0   :  { %v786_v21 = vpop.permute.xlu1 %785  ;;  %v801_v28 = vperm.slane %v789_v52, %v4696_v24 }
 0x7b1   :  { %v800_v16 = vperm.slane %v786_v21, %v4696_v24  ;;  %v860_v25 = vpop.permute.xlu2 %859 }
 0x7b3   :  { %v807_v35 = vsel %vm213_vm4, %v800_v16, %v806_v50 }
 0x7b4   :  { %v808_v58 = vsel %vm215_vm5, %v801_v28, %v807_v35 }
 0x7b5   :  { %v809_v18 = vsel %vm217_vm6, %v802_v55, %v808_v58 }
 0x7b8   :  { %v795_v57 = vpop.permute.xlu1 %794 }
 0x7b9   :  { %v803_v60 = vperm.slane %v795_v57, %v4696_v24  ;;  %v874_v34 = vpop.permute.xlu2 %873 }
 0x7bb   :  { %v810_v47 = vsel %vm219_vm7, %v803_v60, %v809_v18 }
 0x7bc   :  { %v812_v62 = vsel %vm222_vm8, %v810_v47, 0.0 }
 0x7bd   :  { %813 = vadd.xlane.f32.xlu0 %v812_v62 }
 0x7c1   :  { %v888_v20 = vpop.permute.xlu2 %887 }
 0x7c8   :  { %v867_v1 = vpop.permute.xlu1 %866 }
 0x7c9   :  { %v902_v16 = vpop.permute.xlu2 %901 }
 0x7d0   :  { %v881_v42 = vpop.permute.xlu1 %880 }
 0x830   :  { %v814_v59 = vpop.xlane.xlu0 %813 }
 0x831   :  { %4135 = vrcp.f32 %v814_v59  ;;  %v826_v0 = vand.u32 2147483648, %v814_v59  ;;  %v824_v4 = vand.u32 2147483647, %v814_v59  ;;  %vm820_vm14 = vweird.f32 %v814_v59 }
 0x833   :  { %v827_v3 = vor.u32 1.1754944e-38, %v826_v0  ;;  %vm825_vm9 = vcmp.eq.f32.partialorder %v824_v4, 8.507059e+37 }
 0x837   :  { %v4136_v29 = vpop.eup %4135 }
 0x838   :  { %v816_v63 = vmul.f32 %v4136_v29, %v814_v59  ;;  %vm821_vm12 = vweird.f32 %v4136_v29 }
 0x839   :  { %vm822_vm15 = vmor %vm820_vm14, %vm821_vm12 }
 0x83a   :  { %v817_v41 = vsub.f32 1.0, %v816_v63 }
 0x83c   :  { %v818_v2 = vmul.f32 %v4136_v29, %v817_v41 }
 0x83e   :  { %v819_v56 = vadd.f32 %v4136_v29, %v818_v2 }
 0x840   :  { %v823_v13 = vsel %vm822_vm15, %v4136_v29, %v819_v56 }
 0x841   :  { %v828_v33 = vsel %vm825_vm9, %v827_v3, %v823_v13 }
 0x842   :  { %v831_v23 = vperm.slane %v828_v33, 1  ;;  %v830_v8 = vperm.slane %v828_v33, 0  ;;  %v832_v30 = vperm.slane %v828_v33, 2  ;;  %v833_v14 = vperm.slane %v828_v33, 3 }
 0x843   :  { %v834_v32 = vperm.slane %v828_v33, 4  ;;  %v835_v52 = vperm.slane %v828_v33, 5  ;;  %v837_v53 = vperm.slane %v828_v33, 7 }
 0x844   :  { %v847_v9 = vmul.f32 %v4962_v10, %v831_v23  ;;  %v846_v22 = vmul.f32 %v4965_v12, %v830_v8  ;;  %v848_v31 = vmul.f32 %v4960_v6, %v832_v30  ;;  %v849_v45 = vmul.f32 %v4974_v27, %v833_v14  ;;  %v895_v6 = vpop.permute.xlu1 %894 }
 0x845   :  { %v850_v46 = vmul.f32 %v4971_v15, %v834_v32  ;;  %v836_v12 = vperm.slane %v828_v33, 6  ;;  %v851_v21 = vmul.f32 %v4969_v5, %v835_v52  ;;  %v853_v15 = vmul.f32 %v4978_v37, %v837_v53  ;;  %v943_v33 = vpop.f32.mrf.mxu1  ;;  %v5074_v53 = vld [vmem:[%s6325_s3] sm:$0xff] }
 0x846   :  { %v919_v43 = vmul.f32 %v867_v1, %v847_v9  ;;  %v918_v19 = vmul.f32 %v860_v25, %v846_v22  ;;  %v920_v48 = vmul.f32 %v874_v34, %v848_v31  ;;  %v921_v44 = vmul.f32 %v881_v42, %v849_v45 }
 0x847   :  { %v922_v10 = vmul.f32 %v888_v20, %v850_v46  ;;  %v852_v49 = vmul.f32 %v4980_v7, %v836_v12  ;;  %v923_v28 = vmul.f32 %v895_v6, %v851_v21 }
 0x848   :  { %958 = vperm.xlu1 %4033, %v919_v43   ;;  %955 = vperm.xlu2 %4032, %v918_v19  }
 0x849   :  { %961 = vperm.xlu0 %4028, %v920_v48   ;;  %v924_v50 = vmul.f32 %v902_v16, %v852_v49 }
 0x84c   :  { %v909_v27 = vpop.permute.xlu1 %908 }
 0x84d   :  { %v925_v35 = vmul.f32 %v909_v27, %v853_v15  ;;  %v5082_v27 = vld [vmem:[%s6324_s2 + $0x18] sm:$0xff] }
 0x850   :  { %964 = vperm.xlu2 %4032, %v921_v44   ;;  %967 = vperm.xlu1 %4033, %v922_v10  }
 0x858   :  { %970 = vperm.xlu2 %4032, %v923_v28   ;;  %973 = vperm.xlu1 %4033, %v924_v50   ;;  %v5062_v28 = vld [vmem:[%s6325_s3 + $0x10] sm:$0xff]  ;;  %v5068_v50 = vld [vmem:[%s6325_s3 + $0x8] sm:$0xff] }
 0x860   :  { %976 = vperm.xlu2 %4032, %v925_v35   ;;  %v5089_v35 = vld [vmem:[%s6324_s2 + $0x10] sm:$0xff] }
 0x8a2   :  { %v956_v54 = vpop.permute.xlu2 %955 }
 0x8a3   :  { %v978_v7 = vperm.slane %v956_v54, %v4696_v24  ;;  %v5096_v54 = vld [vmem:[%s6324_s2 + $0x8] sm:$0xff] }
 0x8aa   :  { %v965_v58 = vpop.permute.xlu2 %964 }
 0x8ab   :  { %v981_v29 = vperm.slane %v965_v58, %v4696_v24 }
 0x8b2   :  { %v971_v5 = vpop.permute.xlu2 %970 }
 0x8b3   :  { %v983_v0 = vperm.slane %v971_v5, %v4696_v24 }
 0x8ba   :  { %v959_v55 = vpop.permute.xlu1 %958  ;;  %v977_v63 = vpop.permute.xlu2 %976 }
 0x8bb   :  { %v979_v57 = vperm.slane %v959_v55, %v4696_v24  ;;  %v962_v60 = vpop.permute.xlu0 %961  ;;  %v985_v1 = vperm.slane %v977_v63, %v4696_v24 }
 0x8bc   :  { %v980_v18 = vperm.slane %v962_v60, %v4696_v24 }
 0x8bd   :  { %v986_v47 = vsel %vm207_vm1, %v979_v57, %v978_v7  ;;  %v5110_v57 = vld [vmem:[%s6326_s4] ss:$0 sm:$0xff] }
 0x8be   :  { %v987_v59 = vsel %vm209_vm2, %v980_v18, %v986_v47 }
 0x8bf   :  { %v988_v25 = vsel %vm211_vm3, %v981_v29, %v987_v59 }
 0x8c2   :  { %v968_v62 = vpop.permute.xlu1 %967 }
 0x8c3   :  { %v982_v37 = vperm.slane %v968_v62, %v4696_v24 }
 0x8c5   :  { %v989_v41 = vsel %vm213_vm4, %v982_v37, %v988_v25 }
 0x8c6   :  { %v990_v56 = vsel %vm215_vm5, %v983_v0, %v989_v41 }
 0x8ca   :  { %v974_v2 = vpop.permute.xlu1 %973 }
 0x8cb   :  { %v984_v4 = vperm.slane %v974_v2, %v4696_v24  ;;  %v5122_v2 = vld [vmem:[%s6322_s0 + $0x8] sm:$0xf] }
 0x8cd   :  { %v991_v3 = vsel %vm217_vm6, %v984_v4, %v990_v56 }
 0x8ce   :  { %v992_v13 = vsel %vm219_vm7, %v985_v1, %v991_v3  ;;  %v5128_v1 = vld [vmem:[%s6322_s0 + $0x4] sm:$0xf]  ;;  %v5134_v3 = vld [vmem:[%s6322_s0 + $0xc] sm:$0xf] }
 0x8cf   :  { %3979 = vmatmul.msk.f32.vlgmr.msrb.gmra.mxu2 %vm222_vm8, %v992_v13 }
 0x8d0   :  { %3990 = vmatpush.msk.msrb.mxu2 %vm506_vm13, %v4847_v26 }
 0x952   :  { %v1012_v34 = vpop.f32.mrf.mxu2 }
 0x953   :  { %v1013_v23 = vadd.f32 %v1012_v34, %v943_v33  ;;  %v5140_v33 = vld [vmem:[%s6322_s0 + $0x14] sm:$0xf] }
 0x955   :  { %v1015_v8 = vadd.f32 %v4891_v11, %v1013_v23  ;;  %v5146_v23 = vld [vmem:[%s6322_s0 + $0x10] sm:$0xf] }
 0x957   :  { %4137 = vtanh.f32 %v1015_v8  ;;  %v3980_v9 = vmul.f32 -1.442695, %v1015_v8 }
 0x959   :  { %4139 = vpow2.f32 %v3980_v9 }
 0x95d   :  { %v4138_v30 = vpop.eup %4137 }
 0x95e   :  { %1038 = vrot.lane.b32.xlu0 %v4138_v30, %s4508_s10 }
 0x95f   :  { %v4140_v22 = vpop.eup %4139 }
 0x960   :  { %v1019_v31 = vadd.f32 1.0, %v4140_v22 }
 0x962   :  { %4141 = vrcp.f32 %v1019_v31  ;;  %v1031_v26 = vand.u32 2147483648, %v1019_v31  ;;  %vm1025_vm12 = vweird.f32 %v1019_v31  ;;  %v1029_v42 = vand.u32 2147483647, %v1019_v31 }
 0x964   :  { %v1032_v45 = vor.u32 1.1754944e-38, %v1031_v26  ;;  %vm1030_vm15 = vcmp.eq.f32.partialorder %v1029_v42, 8.507059e+37 }
 0x968   :  { %v4142_v14 = vpop.eup %4141 }
 0x969   :  { %v1021_v32 = vmul.f32 %v4142_v14, %v1019_v31  ;;  %vm1026_vm10 = vweird.f32 %v4142_v14  ;;  %v5152_v31 = vld [vmem:[%s6327_s5] ss:$0 sm:$0xff] }
 0x96a   :  { %vm1027_vm14 = vmor %vm1025_vm12, %vm1026_vm10 }
 0x96b   :  { %v1022_v43 = vsub.f32 1.0, %v1021_v32 }
 0x96d   :  { %v1023_v19 = vmul.f32 %v4142_v14, %v1022_v43 }
 0x96f   :  { %v1024_v48 = vadd.f32 %v4142_v14, %v1023_v19  ;;  %v5158_v19 = vld [vmem:[%s6322_s0 + $0x18] sm:$0xf] }
 0x971   :  { %v1028_v11 = vsel %vm1027_vm14, %v4142_v14, %v1024_v48 }
 0x972   :  { %v1033_v20 = vsel %vm1030_vm15, %v1032_v45, %v1028_v11 }
 0x973   :  { %v1036_v10 = vmul.f32 %v1033_v20, %v4896_v61  ;;  %v5056_v61 = vld [vmem:[%s6325_s3 + $0x18] sm:$0xff] }
 0x9d0   :  { %v1039_v46 = vpop.permute.xlu0 %1038 }
 0x9d1   :  { %v1041_v44 = vmul.f32 %v1039_v46, %v1033_v20 }
 0x9d3   :  { %1043 = vrot.lane.b32.xlu1 %v1041_v44, %s4509_s11  ;;  %v5168_v44 = vld [vmem:[%s6322_s0 + $0x1c] sm:$0xf] }
 0xa45   :  { %v1044_v52 = vpop.permute.xlu1 %1043 }
 0xa46   :  { %v5042_v12 = vadd.f32 %v1044_v52, %v1036_v10 }
 0xa48   :  { %4143 = vtanh.f32 %v5042_v12  ;;  %1060 = vrot.lane.b32.xlu0 %v5042_v12, %s4510_s12 }
 0xa4e   :  { %v4144_v6 = vpop.eup %4143 }
 0xa4f   :  { %1049 = vrot.lane.b32.xlu2 %v4144_v6, %s4508_s10 }
 0xaa9   :  { %v1050_v21 = vpop.permute.xlu2 %1049 }
 0xaaa   :  { %v5048_v49 = vmul.f32 %v1050_v21, %v1033_v20 }
 0xaac   :  { %1084 = vrot.lane.b32.xlu1 %v5048_v49, %s4509_s11 }
 0xaba   :  { %v1061_v16 = vpop.permute.xlu0 %1060 }
 0xabb   :  { %3981 = vmatmul.msk.f32.vlgmr.msra.gmra.mxu3 %vm65_vm11, %v1061_v16 }
 0xabc   :  { %2042 = vmatpush.msra.mxu3 %v5056_v61 }
 0xabe   :  { %2043 = vmatpush.msra.mxu3 %v5062_v28 }
 0xac0   :  { %2044 = vmatpush.msra.mxu3 %v5068_v50 }
 0xac2   :  { %2045 = vmatpush.msra.mxu3 %v5074_v53 }
 0xb1e   :  { %v1085_v15 = vpop.permute.xlu1 %1084 }
 0xb1f   :  { %3982 = vmatmul.msk.f32.vlgmr.msra.gmra.mxu0 %vm65_vm11, %v1085_v15  ;;  %3983 = vmatmul.msk.f32.vlgmr.msra.gmra.mxu1 %vm65_vm11, %v1085_v15 }
 0xb20   :  { %2067 = vmatpush.msra.mxu0 %v5082_v27  ;;  %2390 = vmatpush.msra.mxu1 %v4823_v17  ;;  %v5103_v17 = vld [vmem:[%s6324_s2] sm:$0xff] }
 0xb22   :  { %2068 = vmatpush.msra.mxu0 %v5089_v35  ;;  %2391 = vmatpush.msra.mxu1 %v4828_v36 }
 0xb24   :  { %2069 = vmatpush.msra.mxu0 %v5096_v54  ;;  %2392 = vmatpush.msra.mxu1 %v4837_v38 }
 0xb26   :  { %2070 = vmatpush.msra.mxu0 %v5103_v17  ;;  %2393 = vmatpush.msra.mxu1 %v4842_v39  ;;  %v5116_v39 = vld [vmem:[%s6322_s0] sm:$0xf] }
 0xb3e   :  { %v1081_v58 = vpop.f32.mrf.mxu3 }
 0xb9c   :  { %v1105_v36 = vpop.f32.mrf.mxu0 }
 0xb9d   :  { %v1106_v55 = vadd.f32 %v1105_v36, %v1081_v58 }
 0xb9f   :  { %v1108_v60 = vadd.f32 %v5110_v57, %v1106_v55 }
 0xba1   :  { %v1117_v38 = vperm.slane %v1108_v60, 0  ;;  %v1111_v5 = vrot.slane %v1108_v60, 2  ;;  %v1110_v7 = vrot.slane %v1108_v60, 1  ;;  %v1112_v18 = vrot.slane %v1108_v60, 3 }
 0xba2   :  { %v1114_v47 = vrot.slane %v1108_v60, 5  ;;  %v1113_v62 = vrot.slane %v1108_v60, 4  ;;  %v1115_v0 = vrot.slane %v1108_v60, 6  ;;  %v1116_v30 = vrot.slane %v1108_v60, 7 }
 0xba3   :  { %v1133_v59 = vadd.f32 %v5116_v39, %v1117_v38  ;;  %v1119_v37 = vperm.slane %v1111_v5, 0  ;;  %v1118_v29 = vperm.slane %v1110_v7, 0  ;;  %v1120_v25 = vperm.slane %v1112_v18, 0 }
 0xba4   :  { %v1122_v63 = vperm.slane %v1114_v47, 0  ;;  %v1121_v41 = vperm.slane %v1113_v62, 0  ;;  %v1123_v9 = vperm.slane %v1115_v0, 0  ;;  %v1124_v32 = vperm.slane %v1116_v30, 0 }
 0xba5   :  { %4145 = vtanh.f32 %v1133_v59  ;;  %v1135_v4 = vadd.f32 %v5122_v2, %v1119_v37  ;;  %v1134_v56 = vadd.f32 %v5128_v1, %v1118_v29  ;;  %v1136_v13 = vadd.f32 %v5134_v3, %v1120_v25 }
 0xba6   :  { %v1138_v34 = vadd.f32 %v5140_v33, %v1122_v63  ;;  %v1137_v8 = vadd.f32 %v5146_v23, %v1121_v41  ;;  %v1139_v48 = vadd.f32 %v5158_v19, %v1123_v9  ;;  %v1140_v10 = vadd.f32 %v5168_v44, %v1124_v32 }
 0xba7   :  { %4147 = vtanh.f32 %v1135_v4 }
 0xba8   :  { %4149 = vtanh.f32 %v1134_v56 }
 0xba9   :  { %4151 = vtanh.f32 %v1136_v13 }
 0xbaa   :  { %4153 = vtanh.f32 %v1138_v34 }
 0xbab   :  { %v4146_v22 = vpop.eup %4145  ;;  %4155 = vtanh.f32 %v1137_v8 }
 0xbac   :  { %v1149_v14 = vmul.f32 %v5152_v31, %v4146_v22  ;;  %4157 = vtanh.f32 %v1139_v48 }
 0xbad   :  { %v4148_v43 = vpop.eup %4147  ;;  %4159 = vtanh.f32 %v1140_v10 }
 0xbae   :  { %v4150_v26 = vpop.eup %4149  ;;  %v1157_v42 = vsel %vm164_vm0, %v1149_v14, 0.0  ;;  %v1151_v11 = vmul.f32 %v5152_v31, %v4148_v43 }
 0xbaf   :  { %v4152_v45 = vpop.eup %4151  ;;  %1158 = vadd.xlane.f32.xlu2 %v1157_v42  ;;  %v1150_v46 = vmul.f32 %v5152_v31, %v4150_v26 }
 0xbb0   :  { %v1163_v20 = vsel %vm164_vm0, %v1151_v11, 0.0  ;;  %v4154_v52 = vpop.eup %4153  ;;  %v1152_v16 = vmul.f32 %v5152_v31, %v4152_v45 }
 0xbb1   :  { %1164 = vadd.xlane.f32.xlu1 %v1163_v20  ;;  %v1160_v6 = vsel %vm164_vm0, %v1150_v46, 0.0  ;;  %v4156_v21 = vpop.eup %4155  ;;  %v1154_v15 = vmul.f32 %v5152_v31, %v4154_v52 }
 0xbb2   :  { %1161 = vadd.xlane.f32.xlu0 %v1160_v6  ;;  %v1153_v58 = vmul.f32 %v5152_v31, %v4156_v21  ;;  %v1166_v36 = vsel %vm164_vm0, %v1152_v16, 0.0  ;;  %v4158_v55 = vpop.eup %4157 }
 0xbb3   :  { %v1172_v60 = vsel %vm164_vm0, %v1154_v15, 0.0  ;;  %v4160_v5 = vpop.eup %4159  ;;  %v1155_v7 = vmul.f32 %v5152_v31, %v4158_v55 }
 0xbb4   :  { %v1169_v38 = vsel %vm164_vm0, %v1153_v58, 0.0  ;;  %v1156_v18 = vmul.f32 %v5152_v31, %v4160_v5 }
 0xbb5   :  { %v1175_v47 = vsel %vm164_vm0, %v1155_v7, 0.0 }
 0xbb6   :  { %v1178_v62 = vsel %vm164_vm0, %v1156_v18, 0.0 }
 0xbb7   :  { %1167 = vadd.xlane.f32.xlu2 %v1166_v36 }
 0xbb9   :  { %1173 = vadd.xlane.f32.xlu1 %v1172_v60 }
 0xbba   :  { %1170 = vadd.xlane.f32.xlu0 %v1169_v38 }
 0xbbf   :  { %1176 = vadd.xlane.f32.xlu2 %v1175_v47 }
 0xbc2   :  { %1179 = vadd.xlane.f32.xlu0 %v1178_v62 }
 0xc22   :  { %v1159_v59 = vpop.xlane.xlu2 %1158 }
 0xc23   :  { %v1189_v63 = vperm.slane %v1159_v59, %v4696_v24 }
 0xc24   :  { %v1165_v37 = vpop.xlane.xlu1 %1164 }
 0xc25   :  { %v1162_v29 = vpop.xlane.xlu0 %1161  ;;  %v1191_v41 = vperm.slane %v1165_v37, %v4696_v24 }
 0xc26   :  { %v1190_v25 = vperm.slane %v1162_v29, %v4696_v24 }
 0xc28   :  { %v1197_v0 = vsel %vm207_vm1, %v1190_v25, %v1189_v63 }
 0xc29   :  { %v1198_v13 = vsel %vm209_vm2, %v1191_v41, %v1197_v0 }
 0xc2a   :  { %v1168_v4 = vpop.xlane.xlu2 %1167 }
 0xc2b   :  { %v1192_v56 = vperm.slane %v1168_v4, %v4696_v24 }
 0xc2c   :  { %v1174_v34 = vpop.xlane.xlu1 %1173 }
 0xc2d   :  { %v1171_v8 = vpop.xlane.xlu0 %1170  ;;  %v1199_v30 = vsel %vm211_vm3, %v1192_v56, %v1198_v13  ;;  %v1194_v22 = vperm.slane %v1174_v34, %v4696_v24 }
 0xc2e   :  { %v1193_v9 = vperm.slane %v1171_v8, %v4696_v24 }
 0xc30   :  { %v1200_v14 = vsel %vm213_vm4, %v1193_v9, %v1199_v30 }
 0xc31   :  { %v1201_v48 = vsel %vm215_vm5, %v1194_v22, %v1200_v14 }
 0xc32   :  { %v1177_v32 = vpop.xlane.xlu2 %1176 }
 0xc33   :  { %v1195_v43 = vperm.slane %v1177_v32, %v4696_v24 }
 0xc35   :  { %v1180_v26 = vpop.xlane.xlu0 %1179  ;;  %v1202_v42 = vsel %vm217_vm6, %v1195_v43, %v1201_v48  ;;  %v5233_v48 = vld [vmem:[%s6323_s1 + $0x18] sm:$0xff] }
 0xc36   :  { %v1196_v11 = vperm.slane %v1180_v26, %v4696_v24 }
 0xc38   :  { %v1203_v45 = vsel %vm219_vm7, %v1196_v11, %v1202_v42  ;;  %v5239_v42 = vld [vmem:[%s6323_s1 + $0x8] sm:$0xff] }
 0xc39   :  { %v1205_v46 = vsel %vm222_vm8, %v1203_v45, -inf  ;;  %v1346_v11 = vperm.slane %v5239_v42, 2  ;;  %v5245_v45 = vld [vmem:[%s6323_s1 + $0x28] sm:$0xff] }
 0xc3a   :  { %1206 = vmax.xlane.f32.xlu1 %v1205_v46  ;;  %v1374_v46 = vperm.slane %v5245_v45, 2 }
 0xcad   :  { %v1207_v20 = vpop.xlane.xlu1 %1206 }
 0xcae   :  { %v1211_v10 = vperm.slane %v1207_v20, 2  ;;  %v1210_v52 = vperm.slane %v1207_v20, 1  ;;  %v1209_v6 = vperm.slane %v1207_v20, 0  ;;  %v1214_v58 = vperm.slane %v1207_v20, 5 }
 0xcaf   :  { %v1212_v36 = vperm.slane %v1207_v20, 3  ;;  %v1213_v55 = vperm.slane %v1207_v20, 4  ;;  %v1215_v63 = vperm.slane %v1207_v20, 6 }
 0xcb0   :  { %v1227_v21 = vsub.f32 %v1165_v37, %v1211_v10  ;;  %v1226_v16 = vsub.f32 %v1162_v29, %v1210_v52  ;;  %v1225_v15 = vsub.f32 %v1159_v59, %v1209_v6  ;;  %v1230_v7 = vsub.f32 %v1174_v34, %v1214_v58  ;;  %v5251_v10 = vld [vmem:[%s6323_s1 + $0x10] sm:$0xff] }
 0xcb1   :  { %v1228_v18 = vsub.f32 %v1168_v4, %v1212_v36  ;;  %v1229_v47 = vsub.f32 %v1171_v8, %v1213_v55  ;;  %v1216_v29 = vperm.slane %v1207_v20, 7  ;;  %v1231_v4 = vsub.f32 %v1177_v32, %v1215_v63  ;;  %v5227_v32 = vld [vmem:[%s6323_s1] sm:$0xff]  ;;  %v5276_v63 = vld [vmem:[%s6323_s1 + $0x30] sm:$0xff] }
 0xcb2   :  { %v1237_v60 = vmul.f32 1.442695, %v1227_v21  ;;  %v1235_v38 = vmul.f32 1.442695, %v1226_v16  ;;  %v1233_v5 = vmul.f32 1.442695, %v1225_v15 }
 0xcb3   :  { %v1243_v62 = vmul.f32 1.442695, %v1230_v7  ;;  %v1239_v25 = vmul.f32 1.442695, %v1228_v18  ;;  %v1241_v37 = vmul.f32 1.442695, %v1229_v47  ;;  %v1232_v56 = vsub.f32 %v1180_v26, %v1216_v29 }
 0xcb4   :  { %4161 = vpow2.f32 %v1237_v60  ;;  %v1245_v13 = vmul.f32 1.442695, %v1231_v4  ;;  %v1339_v43 = vperm.slane %v5227_v32, 2  ;;  %v1360_v26 = vperm.slane %v5233_v48, 2  ;;  %v5257_v21 = vld [vmem:[%s6323_s1 + $0x38] sm:$0xff]  ;;  %v5264_v36 = vld [vmem:[%s6323_s1 + $0x20] sm:$0xff] }
 0xcb5   :  { %4163 = vpow2.f32 %v1235_v38  ;;  %v1247_v8 = vmul.f32 1.442695, %v1232_v56  ;;  %v1353_v52 = vperm.slane %v5251_v10, 2  ;;  %v1388_v16 = vperm.slane %v5257_v21, 2 }
 0xcb6   :  { %4165 = vpow2.f32 %v1233_v5  ;;  %v1367_v55 = vperm.slane %v5264_v36, 2 }
 0xcb7   :  { %4167 = vpow2.f32 %v1243_v62 }
 0xcb8   :  { %4169 = vpow2.f32 %v1239_v25 }
 0xcb9   :  { %4171 = vpow2.f32 %v1241_v37  ;;  %v1381_v37 = vperm.slane %v5276_v63, 2 }
 0xcba   :  { %v5198_v41 = vpop.eup %4161  ;;  %4173 = vpow2.f32 %v1245_v13 }
 0xcbb   :  { %v5200_v59 = vpop.eup %4163  ;;  %1264 = vperm.xlu1 %4033, %v5198_v41   ;;  %4175 = vpow2.f32 %v1247_v8 }
 0xcbc   :  { %v5203_v0 = vpop.eup %4165  ;;  %1261 = vperm.xlu0 %4028, %v5200_v59  }
 0xcbd   :  { %1258 = vperm.xlu2 %4032, %v5203_v0   ;;  %v5207_v34 = vpop.eup %4167 }
 0xcbe   :  { %v5209_v30 = vpop.eup %4169 }
 0xcbf   :  { %v5212_v9 = vpop.eup %4171 }
 0xcc0   :  { %v5216_v22 = vpop.eup %4173 }
 0xcc1   :  { %v5218_v14 = vpop.eup %4175 }
 0xcc3   :  { %1273 = vperm.xlu1 %4033, %v5207_v34  }
 0xcc4   :  { %1267 = vperm.xlu0 %4028, %v5209_v30  }
 0xcc5   :  { %1270 = vperm.xlu2 %4032, %v5212_v9  }
 0xccc   :  { %1276 = vperm.xlu0 %4028, %v5216_v22  }
 0xccd   :  { %1279 = vperm.xlu2 %4032, %v5218_v14  }
 0xcd4   :  { %4034 = vset.pattern.permute.xlu0 %v4742_v40 }
 0xcd5   :  { %4035 = vset.pattern.permute.xlu2 %v4742_v40 }
 0xcdc   :  { %1344 = vperm.xlu0 %4034, %v1339_v43  }
 0xcdd   :  { %1351 = vperm.xlu2 %4035, %v1346_v11  }
 0xce4   :  { %1365 = vperm.xlu0 %4034, %v1360_v26  }
 0xce5   :  { %1358 = vperm.xlu2 %4035, %v1353_v52  }
 0xcec   :  { %1379 = vperm.xlu0 %4034, %v1374_v46  }
 0xced   :  { %1372 = vperm.xlu2 %4035, %v1367_v55  }
 0xcf4   :  { %1393 = vperm.xlu0 %4034, %v1388_v16  }
 0xcf5   :  { %1386 = vperm.xlu2 %4035, %v1381_v37  }
 0xcfc   :  { %4037 = vset.pattern.permute.xlu0 %v4507_v51 }
 0xcfd   :  { %4036 = vset.pattern.permute.xlu2 %v4507_v51 }
 0xd17   :  { %v1259_v20 = vpop.permute.xlu2 %1258 }
 0xd18   :  { %v1281_v38 = vperm.slane %v1259_v20, %v4696_v24 }
 0xd1f   :  { %v1271_v60 = vpop.permute.xlu2 %1270 }
 0xd20   :  { %v1285_v29 = vperm.slane %v1271_v60, %v4696_v24 }
 0xd27   :  { %v1280_v56 = vpop.permute.xlu2 %1279 }
 0xd28   :  { %v1288_v11 = vperm.slane %v1280_v56, %v4696_v24 }
 0xd2d   :  { %v1265_v15 = vpop.permute.xlu1 %1264 }
 0xd2e   :  { %v1262_v6 = vpop.permute.xlu0 %1261  ;;  %v1283_v5 = vperm.slane %v1265_v15, %v4696_v24 }
 0xd2f   :  { %v1282_v58 = vperm.slane %v1262_v6, %v4696_v24 }
 0xd31   :  { %v1289_v7 = vsel %vm207_vm1, %v1282_v58, %v1281_v38 }
 0xd32   :  { %v1290_v62 = vsel %vm209_vm2, %v1283_v5, %v1289_v7 }
 0xd35   :  { %v1274_v4 = vpop.permute.xlu1 %1273 }
 0xd36   :  { %v1268_v18 = vpop.permute.xlu0 %1267  ;;  %v1286_v8 = vperm.slane %v1274_v4, %v4696_v24 }
 0xd37   :  { %v1284_v47 = vperm.slane %v1268_v18, %v4696_v24  ;;  %v1352_v5 = vpop.permute.xlu2 %1351 }
 0xd39   :  { %v1291_v25 = vsel %vm211_vm3, %v1284_v47, %v1290_v62 }
 0xd3a   :  { %v1292_v13 = vsel %vm213_vm4, %v1285_v29, %v1291_v25 }
 0xd3b   :  { %v1293_v46 = vsel %vm215_vm5, %v1286_v8, %v1292_v13 }
 0xd3e   :  { %v1277_v43 = vpop.permute.xlu0 %1276 }
 0xd3f   :  { %v1287_v26 = vperm.slane %v1277_v43, %v4696_v24 }
 0xd41   :  { %v1294_v20 = vsel %vm217_vm6, %v1287_v26, %v1293_v46 }
 0xd42   :  { %v1295_v52 = vsel %vm219_vm7, %v1288_v11, %v1294_v20  ;;  %v1359_v11 = vpop.permute.xlu2 %1358 }
 0xd43   :  { %v1297_v6 = vsel %vm222_vm8, %v1295_v52, 0.0 }
 0xd44   :  { %1298 = vadd.xlane.f32.xlu1 %v1297_v6 }
 0xd4e   :  { %v1345_v55 = vpop.permute.xlu0 %1344 }
 0xd56   :  { %v1366_v29 = vpop.permute.xlu0 %1365 }
 0xdb7   :  { %v1299_v16 = vpop.xlane.xlu1 %1298 }
 0xdb8   :  { %4177 = vrcp.f32 %v1299_v16  ;;  %v1311_v38 = vand.u32 2147483648, %v1299_v16  ;;  %v1309_v18 = vand.u32 2147483647, %v1299_v16  ;;  %vm1305_vm10 = vweird.f32 %v1299_v16 }
 0xdba   :  { %v1312_v62 = vor.u32 1.1754944e-38, %v1311_v38  ;;  %vm1310_vm14 = vcmp.eq.f32.partialorder %v1309_v18, 8.507059e+37 }
 0xdbe   :  { %v4178_v15 = vpop.eup %4177 }
 0xdbf   :  { %v1301_v58 = vmul.f32 %v4178_v15, %v1299_v16  ;;  %vm1306_vm9 = vweird.f32 %v4178_v15 }
 0xdc0   :  { %vm1307_vm12 = vmor %vm1305_vm10, %vm1306_vm9 }
 0xdc1   :  { %v1302_v60 = vsub.f32 1.0, %v1301_v58 }
 0xdc3   :  { %v1303_v7 = vmul.f32 %v4178_v15, %v1302_v60  ;;  %v1380_v60 = vpop.permute.xlu0 %1379 }
 0xdc5   :  { %v1304_v47 = vadd.f32 %v4178_v15, %v1303_v7 }
 0xdc7   :  { %v1308_v25 = vsel %vm1307_vm12, %v4178_v15, %v1304_v47 }
 0xdc8   :  { %v1313_v37 = vsel %vm1310_vm14, %v1312_v62, %v1308_v25 }
 0xdc9   :  { %v1315_v4 = vperm.slane %v1313_v37, 0  ;;  %v1316_v56 = vperm.slane %v1313_v37, 1  ;;  %v1317_v13 = vperm.slane %v1313_v37, 2  ;;  %v1318_v6 = vperm.slane %v1313_v37, 3 }
 0xdca   :  { %v1320_v16 = vperm.slane %v1313_v37, 5  ;;  %v1319_v38 = vperm.slane %v1313_v37, 4  ;;  %v1321_v62 = vperm.slane %v1313_v37, 6 }
 0xdcb   :  { %v1331_v8 = vmul.f32 %v5203_v0, %v1315_v4  ;;  %v1332_v43 = vmul.f32 %v5200_v59, %v1316_v56  ;;  %v1333_v26 = vmul.f32 %v5198_v41, %v1317_v13  ;;  %v1334_v15 = vmul.f32 %v5209_v30, %v1318_v6  ;;  %v1394_v47 = vpop.permute.xlu0 %1393 }
 0xdcc   :  { %v1336_v58 = vmul.f32 %v5207_v34, %v1320_v16  ;;  %v1322_v59 = vperm.slane %v1313_v37, 7  ;;  %v1335_v41 = vmul.f32 %v5212_v9, %v1319_v38  ;;  %v1337_v34 = vmul.f32 %v5216_v22, %v1321_v62 }
 0xdcd   :  { %v1403_v46 = vmul.f32 %v1345_v55, %v1331_v8  ;;  %v1404_v20 = vmul.f32 %v1352_v5, %v1332_v43  ;;  %v1405_v52 = vmul.f32 %v1359_v11, %v1333_v26  ;;  %v1406_v0 = vmul.f32 %v1366_v29, %v1334_v15  ;;  %v1373_v55 = vpop.permute.xlu2 %1372 }
 0xdce   :  { %v1408_v7 = vmul.f32 %v1380_v60, %v1336_v58  ;;  %v1338_v5 = vmul.f32 %v5218_v14, %v1322_v59  ;;  %v1407_v18 = vmul.f32 %v1373_v55, %v1335_v41  ;;  %v5317_v41 = vld [vmem:[%s6328_s6] sm:$0xf]  ;;  %v1428_v55 = vpop.f32.mrf.mxu1 }
 0xdcf   :  { %1440 = vperm.xlu2 %4036, %v1403_v46   ;;  %1443 = vperm.xlu1 %4033, %v1404_v20  }
 0xdd0   :  { %1446 = vperm.xlu0 %4037, %v1405_v52   ;;  %v1410_v25 = vmul.f32 %v1394_v47, %v1338_v5  ;;  %v5324_v47 = vld [vmem:[%s6330_s8] ss:$0 sm:$0xff] }
 0xdd5   :  { %v1387_v30 = vpop.permute.xlu2 %1386 }
 0xdd6   :  { %v1409_v4 = vmul.f32 %v1387_v30, %v1337_v34 }
 0xdd7   :  { %1449 = vperm.xlu2 %4036, %v1406_v0  }
 0xdd8   :  { %1455 = vperm.xlu0 %4037, %v1408_v7  }
 0xddf   :  { %1452 = vperm.xlu2 %4036, %v1407_v18  }
 0xde0   :  { %1461 = vperm.xlu0 %4037, %v1410_v25  }
 0xde7   :  { %1458 = vperm.xlu2 %4036, %v1409_v4  }
 0xe29   :  { %v1441_v29 = vpop.permute.xlu2 %1440 }
 0xe2a   :  { %v1463_v43 = vperm.slane %v1441_v29, %v4696_v24 }
 0xe31   :  { %v1450_v56 = vpop.permute.xlu2 %1449 }
 0xe32   :  { %v1466_v22 = vperm.slane %v1450_v56, %v4696_v24 }
 0xe39   :  { %v1453_v14 = vpop.permute.xlu2 %1452 }
 0xe3a   :  { %v1467_v6 = vperm.slane %v1453_v14, %v4696_v24 }
 0xe41   :  { %v1444_v13 = vpop.permute.xlu1 %1443  ;;  %v1459_v16 = vpop.permute.xlu2 %1458 }
 0xe42   :  { %v1447_v8 = vpop.permute.xlu0 %1446  ;;  %v1464_v9 = vperm.slane %v1444_v13, %v4696_v24  ;;  %v1469_v60 = vperm.slane %v1459_v16, %v4696_v24 }
 0xe43   :  { %v1465_v26 = vperm.slane %v1447_v8, %v4696_v24 }
 0xe44   :  { %v1471_v37 = vsel %vm207_vm1, %v1464_v9, %v1463_v43 }
 0xe45   :  { %v1472_v11 = vsel %vm209_vm2, %v1465_v26, %v1471_v37 }
 0xe46   :  { %v1473_v20 = vsel %vm211_vm3, %v1466_v22, %v1472_v11 }
 0xe47   :  { %v1474_v15 = vsel %vm213_vm4, %v1467_v6, %v1473_v20 }
 0xe4a   :  { %v1456_v46 = vpop.permute.xlu0 %1455 }
 0xe4b   :  { %v1468_v52 = vperm.slane %v1456_v46, %v4696_v24 }
 0xe4d   :  { %v1475_v58 = vsel %vm215_vm5, %v1468_v52, %v1474_v15 }
 0xe4e   :  { %v1476_v7 = vsel %vm217_vm6, %v1469_v60, %v1475_v58 }
 0xe52   :  { %v1462_v38 = vpop.permute.xlu0 %1461 }
 0xe53   :  { %v1470_v0 = vperm.slane %v1462_v38, %v4696_v24 }
 0xe55   :  { %v1477_v59 = vsel %vm219_vm7, %v1470_v0, %v1476_v7 }
 0xe56   :  { %3985 = vmatmul.msk.f32.vlgmr.msra.gmra.mxu2 %vm222_vm8, %v1477_v59 }
 0xe57   :  { %3996 = vmatpush.msk.msra.mxu2 %vm506_vm13, %v5317_v41 }
 0xed9   :  { %v1497_v5 = vpop.f32.mrf.mxu2 }
 0xeda   :  { %v1498_v18 = vadd.f32 %v1497_v5, %v1428_v55 }
 0xedc   :  { %v1500_v62 = vadd.f32 %v5324_v47, %v1498_v18 }
 0xede   :  { %4179 = vtanh.f32 %v1500_v62  ;;  %v3986_v34 = vmul.f32 -1.442695, %v1500_v62 }
 0xee0   :  { %4181 = vpow2.f32 %v3986_v34 }
 0xee4   :  { %v4180_v25 = vpop.eup %4179 }
 0xee5   :  { %1523 = vrot.lane.b32.xlu1 %v4180_v25, %s4508_s10 }
 0xee6   :  { %v4182_v30 = vpop.eup %4181 }
 0xee7   :  { %v1504_v4 = vadd.f32 1.0, %v4182_v30 }
 0xee9   :  { %4183 = vrcp.f32 %v1504_v4  ;;  %v1516_v43 = vand.u32 2147483648, %v1504_v4  ;;  %vm1510_vm9 = vweird.f32 %v1504_v4  ;;  %v1514_v14 = vand.u32 2147483647, %v1504_v4 }
 0xeeb   :  { %v1517_v37 = vor.u32 1.1754944e-38, %v1516_v43  ;;  %vm1515_vm12 = vcmp.eq.f32.partialorder %v1514_v14, 8.507059e+37 }
 0xeef   :  { %v4184_v29 = vpop.eup %4183 }
 0xef0   :  { %v1506_v56 = vmul.f32 %v4184_v29, %v1504_v4  ;;  %vm1511_vm15 = vweird.f32 %v4184_v29 }
 0xef1   :  { %vm1512_vm10 = vmor %vm1510_vm9, %vm1511_vm15 }
 0xef2   :  { %v1507_v13 = vsub.f32 1.0, %v1506_v56 }
 0xef4   :  { %v1508_v8 = vmul.f32 %v4184_v29, %v1507_v13 }
 0xef6   :  { %v1509_v9 = vadd.f32 %v4184_v29, %v1508_v8 }
 0xef8   :  { %v1513_v26 = vsel %vm1512_vm10, %v4184_v29, %v1509_v9 }
 0xef9   :  { %v1518_v46 = vsel %vm1515_vm12, %v1517_v37, %v1513_v26 }
 0xefa   :  { %v1521_v20 = vmul.f32 %v1518_v46, %v5042_v12 }
 0xf57   :  { %v1524_v11 = vpop.permute.xlu1 %1523 }
 0xf58   :  { %v1526_v22 = vmul.f32 %v1524_v11, %v1518_v46 }
 0xf5a   :  { %1528 = vrot.lane.b32.xlu2 %v1526_v22, %s4509_s11 }
 0xfb4   :  { %v1529_v52 = vpop.permute.xlu2 %1528 }
 0xfb5   :  { %v5330_v6 = vadd.f32 %v1529_v52, %v1521_v20 }
 0xfb7   :  { %4185 = vtanh.f32 %v5330_v6  ;;  %1545 = vrot.lane.b32.xlu1 %v5330_v6, %s4510_s12 }
 0xfbd   :  { %v4186_v16 = vpop.eup %4185 }
 0xfbe   :  { %1534 = vrot.lane.b32.xlu0 %v4186_v16, %s4508_s10 }
0x1029   :  { %v1546_v15 = vpop.permute.xlu1 %1545 }
0x102a   :  { %3987 = vmatmul.msk.f32.vlgmr.msrb.gmra.mxu3 %vm65_vm11, %v1546_v15 }
0x102b   :  { %2527 = vmatpush.msrb.mxu3 %v5056_v61  ;;  %v5351_v61 = vld [vmem:[%s6329_s7 + $0x18] sm:$0xff] }
0x102d   :  { %2528 = vmatpush.msrb.mxu3 %v5062_v28  ;;  %v5358_v28 = vld [vmem:[%s6329_s7 + $0x10] sm:$0xff] }
0x102f   :  { %2529 = vmatpush.msrb.mxu3 %v5068_v50  ;;  %v5365_v50 = vld [vmem:[%s6329_s7 + $0x8] sm:$0xff] }
0x1030   :  { %v1535_v12 = vpop.permute.xlu0 %1534 }
0x1031   :  { %v5340_v58 = vmul.f32 %v1535_v12, %v1518_v46  ;;  %2530 = vmatpush.msrb.mxu3 %v5074_v53  ;;  %v5372_v53 = vld [vmem:[%s6329_s7] sm:$0xff] }
0x1033   :  { %1569 = vrot.lane.b32.xlu2 %v5340_v58, %s4509_s11 }
0x108d   :  { %v1570_v60 = vpop.permute.xlu2 %1569 }
0x108e   :  { %3988 = vmatmul.msk.f32.vlgmr.msrb.gmra.mxu0 %vm65_vm11, %v1570_v60  ;;  %3989 = vmatmul.msk.f32.vlgmr.msrb.gmra.mxu1 %vm65_vm11, %v1570_v60 }
0x108f   :  { %2549 = vmatpush.msrb.mxu0 %v5082_v27  ;;  %2872 = vmatpush.msrb.mxu1 %v5351_v61 }
0x1091   :  { %2550 = vmatpush.msrb.mxu0 %v5089_v35  ;;  %2873 = vmatpush.msrb.mxu1 %v5358_v28 }
0x1093   :  { %2551 = vmatpush.msrb.mxu0 %v5096_v54  ;;  %2874 = vmatpush.msrb.mxu1 %v5365_v50 }
0x1095   :  { %2552 = vmatpush.msrb.mxu0 %v5103_v17  ;;  %2875 = vmatpush.msrb.mxu1 %v5372_v53 }
0x10ad   :  { %v1566_v27 = vpop.f32.mrf.mxu3 }
0x110b   :  { %v1590_v35 = vpop.f32.mrf.mxu0 }
0x110c   :  { %v1591_v38 = vadd.f32 %v1590_v35, %v1566_v27 }
0x110e   :  { %v1593_v54 = vadd.f32 %v5110_v57, %v1591_v38 }
0x1110   :  { %v1602_v0 = vperm.slane %v1593_v54, 0  ;;  %v1596_v7 = vrot.slane %v1593_v54, 2  ;;  %v1595_v59 = vrot.slane %v1593_v54, 1  ;;  %v1597_v55 = vrot.slane %v1593_v54, 3 }
0x1111   :  { %v1599_v5 = vrot.slane %v1593_v54, 5  ;;  %v1598_v18 = vrot.slane %v1593_v54, 4  ;;  %v1600_v29 = vrot.slane %v1593_v54, 6 }
0x1112   :  { %v1618_v17 = vadd.f32 %v5116_v39, %v1602_v0  ;;  %v1604_v62 = vperm.slane %v1596_v7, 0  ;;  %v1603_v25 = vperm.slane %v1595_v59, 0  ;;  %v1605_v34 = vperm.slane %v1597_v55, 0 }
0x1113   :  { %v1607_v30 = vperm.slane %v1599_v5, 0  ;;  %v1606_v4 = vperm.slane %v1598_v18, 0  ;;  %v1601_v39 = vrot.slane %v1593_v54, 7  ;;  %v1608_v43 = vperm.slane %v1600_v29, 0 }
0x1114   :  { %4187 = vtanh.f32 %v1618_v17  ;;  %v1620_v56 = vadd.f32 %v5122_v2, %v1604_v62  ;;  %v1619_v13 = vadd.f32 %v5128_v1, %v1603_v25  ;;  %v1621_v57 = vadd.f32 %v5134_v3, %v1605_v34 }
0x1115   :  { %v1623_v8 = vadd.f32 %v5140_v33, %v1607_v30  ;;  %v1622_v9 = vadd.f32 %v5146_v23, %v1606_v4  ;;  %v1609_v37 = vperm.slane %v1601_v39, 0  ;;  %v1624_v1 = vadd.f32 %v5158_v19, %v1608_v43 }
0x1116   :  { %4189 = vtanh.f32 %v1620_v56 }
0x1117   :  { %4191 = vtanh.f32 %v1619_v13  ;;  %v1625_v20 = vadd.f32 %v5168_v44, %v1609_v37 }
0x1118   :  { %4193 = vtanh.f32 %v1621_v57 }
0x1119   :  { %4195 = vtanh.f32 %v1623_v8 }
0x111a   :  { %v4188_v14 = vpop.eup %4187  ;;  %4197 = vtanh.f32 %v1622_v9 }
0x111b   :  { %v1634_v26 = vmul.f32 %v5152_v31, %v4188_v14  ;;  %4199 = vtanh.f32 %v1624_v1 }
0x111c   :  { %v4190_v2 = vpop.eup %4189  ;;  %4201 = vtanh.f32 %v1625_v20 }
0x111d   :  { %v4192_v11 = vpop.eup %4191  ;;  %v1642_v3 = vsel %vm164_vm0, %v1634_v26, 0.0  ;;  %v1636_v33 = vmul.f32 %v5152_v31, %v4190_v2 }
0x111e   :  { %v4194_v46 = vpop.eup %4193  ;;  %1643 = vadd.xlane.f32.xlu0 %v1642_v3  ;;  %v1635_v23 = vmul.f32 %v5152_v31, %v4192_v11 }
0x111f   :  { %v1648_v22 = vsel %vm164_vm0, %v1636_v33, 0.0  ;;  %v4196_v52 = vpop.eup %4195  ;;  %v1637_v19 = vmul.f32 %v5152_v31, %v4194_v46 }
0x1120   :  { %1649 = vadd.xlane.f32.xlu2 %v1648_v22  ;;  %v1645_v16 = vsel %vm164_vm0, %v1635_v23, 0.0  ;;  %v4198_v15 = vpop.eup %4197  ;;  %v1639_v12 = vmul.f32 %v5152_v31, %v4196_v52 }
0x1121   :  { %1646 = vadd.xlane.f32.xlu1 %v1645_v16  ;;  %v1638_v60 = vmul.f32 %v5152_v31, %v4198_v15  ;;  %v1651_v27 = vsel %vm164_vm0, %v1637_v19, 0.0  ;;  %v4200_v35 = vpop.eup %4199 }
0x1122   :  { %v1657_v44 = vsel %vm164_vm0, %v1639_v12, 0.0  ;;  %v4202_v54 = vpop.eup %4201  ;;  %v1640_v0 = vmul.f32 %v5152_v31, %v4200_v35 }
0x1123   :  { %v1654_v38 = vsel %vm164_vm0, %v1638_v60, 0.0  ;;  %v1641_v7 = vmul.f32 %v5152_v31, %v4202_v54 }
0x1124   :  { %v1660_v59 = vsel %vm164_vm0, %v1640_v0, 0.0 }
0x1125   :  { %v1663_v55 = vsel %vm164_vm0, %v1641_v7, 0.0 }
0x1126   :  { %1652 = vadd.xlane.f32.xlu0 %v1651_v27 }
0x1128   :  { %1658 = vadd.xlane.f32.xlu2 %v1657_v44 }
0x1129   :  { %1655 = vadd.xlane.f32.xlu1 %v1654_v38 }
0x112e   :  { %1661 = vadd.xlane.f32.xlu0 %v1660_v59 }
0x1131   :  { %1664 = vadd.xlane.f32.xlu1 %v1663_v55 }
0x1191   :  { %v1644_v5 = vpop.xlane.xlu0 %1643 }
0x1192   :  { %v1674_v25 = vperm.slane %v1644_v5, %v4696_v24 }
0x1193   :  { %v1650_v18 = vpop.xlane.xlu2 %1649 }
0x1194   :  { %v1647_v17 = vpop.xlane.xlu1 %1646  ;;  %v1676_v34 = vperm.slane %v1650_v18, %v4696_v24 }
0x1195   :  { %v1675_v62 = vperm.slane %v1647_v17, %v4696_v24 }
0x1197   :  { %v1682_v30 = vsel %vm207_vm1, %v1675_v62, %v1674_v25 }
0x1198   :  { %v1683_v29 = vsel %vm209_vm2, %v1676_v34, %v1682_v30 }
0x1199   :  { %v1653_v4 = vpop.xlane.xlu0 %1652 }
0x119a   :  { %v1677_v31 = vperm.slane %v1653_v4, %v4696_v24 }
0x119b   :  { %v1659_v56 = vpop.xlane.xlu2 %1658 }
0x119c   :  { %v1656_v13 = vpop.xlane.xlu1 %1655  ;;  %v1684_v57 = vsel %vm211_vm3, %v1677_v31, %v1683_v29  ;;  %v1679_v9 = vperm.slane %v1659_v56, %v4696_v24 }
0x119d   :  { %v1678_v8 = vperm.slane %v1656_v13, %v4696_v24 }
0x119f   :  { %v1685_v39 = vsel %vm213_vm4, %v1678_v8, %v1684_v57  ;;  %v1824_v8 = vperm.slane %v5227_v32, 3 }
0x11a0   :  { %v1686_v26 = vsel %vm215_vm5, %v1679_v9, %v1685_v39  ;;  %v1845_v9 = vperm.slane %v5233_v48, 3  ;;  %v1831_v39 = vperm.slane %v5239_v42, 3  ;;  %v1852_v48 = vperm.slane %v5264_v36, 3 }
0x11a1   :  { %v1662_v43 = vpop.xlane.xlu0 %1661 }
0x11a2   :  { %v1680_v14 = vperm.slane %v1662_v43, %v4696_v24 }
0x11a4   :  { %v1665_v37 = vpop.xlane.xlu1 %1664  ;;  %v1687_v2 = vsel %vm217_vm6, %v1680_v14, %v1686_v26  ;;  %v1838_v26 = vperm.slane %v5251_v10, 3 }
0x11a5   :  { %v1681_v1 = vperm.slane %v1665_v37, %v4696_v24 }
0x11a7   :  { %v1688_v11 = vsel %vm219_vm7, %v1681_v1, %v1687_v2  ;;  %v1873_v1 = vperm.slane %v5257_v21, 3 }
0x11a8   :  { %v1690_v3 = vsel %vm222_vm8, %v1688_v11, -inf }
0x11a9   :  { %1691 = vmax.xlane.f32.xlu2 %v1690_v3 }
0x121c   :  { %v1692_v33 = vpop.xlane.xlu2 %1691 }
0x121d   :  { %v1696_v46 = vperm.slane %v1692_v33, 2  ;;  %v1695_v23 = vperm.slane %v1692_v33, 1  ;;  %v1694_v22 = vperm.slane %v1692_v33, 0  ;;  %v1698_v15 = vperm.slane %v1692_v33, 4 }
0x121e   :  { %v1699_v19 = vperm.slane %v1692_v33, 5  ;;  %v1697_v12 = vperm.slane %v1692_v33, 3  ;;  %v1701_v7 = vperm.slane %v1692_v33, 7 }
0x121f   :  { %v1712_v20 = vsub.f32 %v1650_v18, %v1696_v46  ;;  %v1711_v52 = vsub.f32 %v1647_v17, %v1695_v23  ;;  %v1710_v16 = vsub.f32 %v1644_v5, %v1694_v22  ;;  %v1714_v44 = vsub.f32 %v1656_v13, %v1698_v15 }
0x1220   :  { %v1715_v38 = vsub.f32 %v1659_v56, %v1699_v19  ;;  %v1713_v54 = vsub.f32 %v1653_v4, %v1697_v12  ;;  %v1700_v17 = vperm.slane %v1692_v33, 6  ;;  %v1717_v25 = vsub.f32 %v1665_v37, %v1701_v7 }
0x1221   :  { %v1722_v60 = vmul.f32 1.442695, %v1712_v20  ;;  %v1720_v27 = vmul.f32 1.442695, %v1711_v52  ;;  %v1718_v35 = vmul.f32 1.442695, %v1710_v16 }
0x1222   :  { %v1726_v0 = vmul.f32 1.442695, %v1714_v44  ;;  %v1728_v59 = vmul.f32 1.442695, %v1715_v38  ;;  %v1724_v18 = vmul.f32 1.442695, %v1713_v54  ;;  %v1716_v34 = vsub.f32 %v1662_v43, %v1700_v17 }
0x1223   :  { %4203 = vpow2.f32 %v1722_v60  ;;  %v1732_v30 = vmul.f32 1.442695, %v1717_v25  ;;  %v1859_v43 = vperm.slane %v5245_v45, 3  ;;  %v1866_v23 = vperm.slane %v5276_v63, 3 }
0x1224   :  { %4205 = vpow2.f32 %v1720_v27  ;;  %v1730_v31 = vmul.f32 1.442695, %v1716_v34 }
0x1225   :  { %4207 = vpow2.f32 %v1718_v35 }
0x1226   :  { %4209 = vpow2.f32 %v1726_v0 }
0x1227   :  { %4211 = vpow2.f32 %v1728_v59 }
0x1228   :  { %4213 = vpow2.f32 %v1724_v18 }
0x1229   :  { %v5416_v55 = vpop.eup %4203  ;;  %4215 = vpow2.f32 %v1732_v30 }
0x122a   :  { %v5418_v5 = vpop.eup %4205  ;;  %1749 = vperm.xlu2 %4036, %v5416_v55   ;;  %4217 = vpow2.f32 %v1730_v31 }
0x122b   :  { %v5421_v62 = vpop.eup %4207  ;;  %1746 = vperm.xlu1 %4033, %v5418_v5  }
0x122c   :  { %1743 = vperm.xlu0 %4037, %v5421_v62   ;;  %v5425_v4 = vpop.eup %4209 }
0x122d   :  { %v5427_v29 = vpop.eup %4211 }
0x122e   :  { %v5430_v56 = vpop.eup %4213 }
0x122f   :  { %v5434_v13 = vpop.eup %4215 }
0x1230   :  { %v5437_v57 = vpop.eup %4217 }
0x1232   :  { %1755 = vperm.xlu2 %4036, %v5425_v4  }
0x1233   :  { %1758 = vperm.xlu1 %4033, %v5427_v29  }
0x1234   :  { %1752 = vperm.xlu0 %4037, %v5430_v56  }
0x123a   :  { %1764 = vperm.xlu2 %4036, %v5434_v13  }
0x123c   :  { %1761 = vperm.xlu0 %4037, %v5437_v57  }
0x1242   :  { %4039 = vset.pattern.permute.xlu2 %v4742_v40 }
0x1244   :  { %4038 = vset.pattern.permute.xlu0 %v4742_v40 }
0x124a   :  { %1836 = vperm.xlu2 %4039, %v1831_v39  }
0x124c   :  { %1829 = vperm.xlu0 %4038, %v1824_v8  }
0x1252   :  { %1843 = vperm.xlu2 %4039, %v1838_v26  }
0x1254   :  { %1850 = vperm.xlu0 %4038, %v1845_v9  }
0x125a   :  { %1857 = vperm.xlu2 %4039, %v1852_v48  }
0x125c   :  { %1864 = vperm.xlu0 %4038, %v1859_v43  }
0x1262   :  { %1871 = vperm.xlu2 %4039, %v1866_v23  }
0x1264   :  { %1878 = vperm.xlu0 %4038, %v1873_v1  }
0x126a   :  { %4040 = vset.pattern.permute.xlu2 %v4507_v51 }
0x126c   :  { %4041 = vset.pattern.permute.xlu0 %v4507_v51 }
0x1284   :  { %v1750_v14 = vpop.permute.xlu2 %1749 }
0x1285   :  { %v1768_v10 = vperm.slane %v1750_v14, %v4696_v24 }
0x128c   :  { %v1756_v3 = vpop.permute.xlu2 %1755 }
0x128d   :  { %v1770_v22 = vperm.slane %v1756_v3, %v4696_v24 }
0x1294   :  { %v1765_v36 = vpop.permute.xlu2 %1764 }
0x1295   :  { %v1773_v12 = vperm.slane %v1765_v36, %v4696_v24 }
0x129d   :  { %v1747_v2 = vpop.permute.xlu1 %1746 }
0x129e   :  { %v1744_v37 = vpop.permute.xlu0 %1743  ;;  %v1767_v32 = vperm.slane %v1747_v2, %v4696_v24 }
0x129f   :  { %v1766_v11 = vperm.slane %v1744_v37, %v4696_v24 }
0x12a1   :  { %v1774_v42 = vsel %vm207_vm1, %v1767_v32, %v1766_v11 }
0x12a2   :  { %v1775_v46 = vsel %vm209_vm2, %v1768_v10, %v1774_v42 }
0x12a4   :  { %v1837_v18 = vpop.permute.xlu2 %1836 }
0x12a5   :  { %v1759_v20 = vpop.permute.xlu1 %1758 }
0x12a6   :  { %v1753_v45 = vpop.permute.xlu0 %1752  ;;  %v1771_v16 = vperm.slane %v1759_v20, %v4696_v24 }
0x12a7   :  { %v1769_v33 = vperm.slane %v1753_v45, %v4696_v24 }
0x12a9   :  { %v1776_v21 = vsel %vm211_vm3, %v1769_v33, %v1775_v46 }
0x12aa   :  { %v1777_v52 = vsel %vm213_vm4, %v1770_v22, %v1776_v21 }
0x12ab   :  { %v1778_v60 = vsel %vm215_vm5, %v1771_v16, %v1777_v52 }
0x12ac   :  { %v1844_v1 = vpop.permute.xlu2 %1843 }
0x12ae   :  { %v1762_v15 = vpop.permute.xlu0 %1761 }
0x12af   :  { %v1772_v19 = vperm.slane %v1762_v15, %v4696_v24 }
0x12b1   :  { %v1779_v63 = vsel %vm217_vm6, %v1772_v19, %v1778_v60 }
0x12b2   :  { %v1780_v27 = vsel %vm219_vm7, %v1773_v12, %v1779_v63 }
0x12b3   :  { %v1782_v35 = vsel %vm222_vm8, %v1780_v27, 0.0 }
0x12b4   :  { %1783 = vadd.xlane.f32.xlu1 %v1782_v35  ;;  %v1858_v22 = vpop.permute.xlu2 %1857 }
0x12be   :  { %v1830_v54 = vpop.permute.xlu0 %1829 }
0x12c6   :  { %v1851_v9 = vpop.permute.xlu0 %1850 }
0x12ce   :  { %v1865_v10 = vpop.permute.xlu0 %1864 }
0x12d6   :  { %v1879_v20 = vpop.permute.xlu0 %1878 }
0x1327   :  { %v1784_v44 = vpop.xlane.xlu1 %1783 }
0x1328   :  { %4219 = vrcp.f32 %v1784_v44  ;;  %v1796_v59 = vand.u32 2147483648, %v1784_v44  ;;  %v1794_v25 = vand.u32 2147483647, %v1784_v44  ;;  %vm1790_vm15 = vweird.f32 %v1784_v44 }
0x132a   :  { %v1797_v30 = vor.u32 1.1754944e-38, %v1796_v59  ;;  %vm1795_vm10 = vcmp.eq.f32.partialorder %v1794_v25, 8.507059e+37 }
0x132e   :  { %v4220_v38 = vpop.eup %4219 }
0x132f   :  { %v1786_v0 = vmul.f32 %v4220_v38, %v1784_v44  ;;  %vm1791_vm14 = vweird.f32 %v4220_v38 }
0x1330   :  { %vm1792_vm9 = vmor %vm1790_vm15, %vm1791_vm14 }
0x1331   :  { %v1787_v7 = vsub.f32 1.0, %v1786_v0 }
0x1333   :  { %v1788_v17 = vmul.f32 %v4220_v38, %v1787_v7 }
0x1335   :  { %v1789_v34 = vadd.f32 %v4220_v38, %v1788_v17 }
0x1337   :  { %v1793_v31 = vsel %vm1792_vm9, %v4220_v38, %v1789_v34 }
0x1338   :  { %v1798_v8 = vsel %vm1795_vm10, %v1797_v30, %v1793_v31 }
0x1339   :  { %v1802_v39 = vperm.slane %v1798_v8, 2  ;;  %v1801_v43 = vperm.slane %v1798_v8, 1  ;;  %v1800_v14 = vperm.slane %v1798_v8, 0  ;;  %v1805_v32 = vperm.slane %v1798_v8, 5 }
0x133a   :  { %v1803_v42 = vperm.slane %v1798_v8, 3  ;;  %v1804_v21 = vperm.slane %v1798_v8, 4  ;;  %v1806_v16 = vperm.slane %v1798_v8, 6 }
0x133b   :  { %v1818_v26 = vmul.f32 %v5416_v55, %v1802_v39  ;;  %v1817_v37 = vmul.f32 %v5418_v5, %v1801_v43  ;;  %v1816_v2 = vmul.f32 %v5421_v62, %v1800_v14  ;;  %v1821_v45 = vmul.f32 %v5427_v29, %v1805_v32  ;;  %v1913_v39 = vpop.f32.mrf.mxu1 }
0x133c   :  { %v1819_v33 = vmul.f32 %v5430_v56, %v1803_v42  ;;  %v1807_v55 = vperm.slane %v1798_v8, 7  ;;  %v1820_v23 = vmul.f32 %v5425_v4, %v1804_v21  ;;  %v1822_v29 = vmul.f32 %v5437_v57, %v1806_v16  ;;  %v1872_v56 = vpop.permute.xlu2 %1871 }
0x133d   :  { %v1890_v11 = vmul.f32 %v1844_v1, %v1818_v26  ;;  %v1889_v48 = vmul.f32 %v1837_v18, %v1817_v37  ;;  %v1888_v3 = vmul.f32 %v1830_v54, %v1816_v2  ;;  %v1893_v46 = vmul.f32 %v1865_v10, %v1821_v45 }
0x133e   :  { %v1891_v5 = vmul.f32 %v1851_v9, %v1819_v33  ;;  %v1823_v62 = vmul.f32 %v5434_v13, %v1807_v55  ;;  %v1892_v52 = vmul.f32 %v1858_v22, %v1820_v23  ;;  %v1894_v15 = vmul.f32 %v1872_v56, %v1822_v29  ;;  %v5528_v56 = vld [vmem:[%s6325_s3] sm:$0xff] }
0x133f   :  { %1931 = vperm.xlu0 %4041, %v1890_v11   ;;  %1928 = vperm.xlu1 %4033, %v1889_v48  }
0x1340   :  { %1925 = vperm.xlu2 %4040, %v1888_v3   ;;  %v1895_v36 = vmul.f32 %v1879_v20, %v1823_v62 }
0x1347   :  { %1940 = vperm.xlu0 %4041, %v1893_v46  }
0x1348   :  { %1934 = vperm.xlu2 %4040, %v1891_v5  }
0x134f   :  { %1946 = vperm.xlu0 %4041, %v1895_v36   ;;  %v5508_v36 = vld [vmem:[%s6325_s3 + $0x18] sm:$0xff] }
0x1350   :  { %1937 = vperm.xlu2 %4040, %v1892_v52   ;;  %v5520_v52 = vld [vmem:[%s6325_s3 + $0x8] sm:$0xff] }
0x1358   :  { %1943 = vperm.xlu2 %4040, %v1894_v15  }
0x139a   :  { %v1926_v19 = vpop.permute.xlu2 %1925 }
0x139b   :  { %v1948_v4 = vperm.slane %v1926_v19, %v4696_v24  ;;  %v5538_v19 = vld [vmem:[%s6324_s2 + $0x18] sm:$0xff] }
0x13a2   :  { %v1935_v12 = vpop.permute.xlu2 %1934 }
0x13a3   :  { %v1951_v57 = vperm.slane %v1935_v12, %v4696_v24  ;;  %v5545_v12 = vld [vmem:[%s6324_s2 + $0x10] sm:$0xff] }
0x13aa   :  { %v1938_v27 = vpop.permute.xlu2 %1937 }
0x13ab   :  { %v1952_v59 = vperm.slane %v1938_v27, %v4696_v24 }
0x13b1   :  { %v1929_v60 = vpop.permute.xlu1 %1928  ;;  %v1932_v63 = vpop.permute.xlu0 %1931 }
0x13b2   :  { %v1949_v13 = vperm.slane %v1929_v60, %v4696_v24  ;;  %v1950_v35 = vperm.slane %v1932_v63, %v4696_v24  ;;  %v1944_v18 = vpop.permute.xlu2 %1943  ;;  %v5552_v60 = vld [vmem:[%s6324_s2 + $0x8] sm:$0xff] }
0x13b3   :  { %v1954_v34 = vperm.slane %v1944_v18, %v4696_v24 }
0x13b4   :  { %v1956_v44 = vsel %vm207_vm1, %v1949_v13, %v1948_v4  ;;  %v5566_v4 = vld [vmem:[%s6326_s4] ss:$0 sm:$0xff] }
0x13b5   :  { %v1957_v38 = vsel %vm209_vm2, %v1950_v35, %v1956_v44 }
0x13b6   :  { %v1958_v0 = vsel %vm211_vm3, %v1951_v57, %v1957_v38 }
0x13b7   :  { %v1959_v17 = vsel %vm213_vm4, %v1952_v59, %v1958_v0 }
0x13b9   :  { %v1941_v54 = vpop.permute.xlu0 %1940 }
0x13ba   :  { %v1953_v7 = vperm.slane %v1941_v54, %v4696_v24 }
0x13bc   :  { %v1960_v25 = vsel %vm215_vm5, %v1953_v7, %v1959_v17 }
0x13bd   :  { %v1961_v8 = vsel %vm217_vm6, %v1954_v34, %v1960_v25 }
0x13c1   :  { %v1947_v30 = vpop.permute.xlu0 %1946 }
0x13c2   :  { %v1955_v31 = vperm.slane %v1947_v30, %v4696_v24  ;;  %v5578_v30 = vld [vmem:[%s6322_s0 + $0x8] sm:$0xf] }
0x13c4   :  { %v1962_v9 = vsel %vm219_vm7, %v1955_v31, %v1961_v8  ;;  %v5584_v8 = vld [vmem:[%s6322_s0 + $0x4] sm:$0xf] }
0x13c5   :  { %3991 = vmatmul.msk.f32.vlgmr.msrb.gmra.mxu2 %vm222_vm8, %v1962_v9 }
0x13c6   :  { %4002 = vmatpush.msk.msrb.mxu2 %vm506_vm13, %v5317_v41 }
0x1448   :  { %v1982_v43 = vpop.f32.mrf.mxu2 }
0x1449   :  { %v1983_v14 = vadd.f32 %v1982_v43, %v1913_v39  ;;  %v5590_v39 = vld [vmem:[%s6322_s0 + $0xc] sm:$0xf] }
0x144b   :  { %v1985_v26 = vadd.f32 %v5324_v47, %v1983_v14  ;;  %v5596_v14 = vld [vmem:[%s6322_s0 + $0x14] sm:$0xf] }
0x144d   :  { %4221 = vtanh.f32 %v1985_v26  ;;  %v3992_v2 = vmul.f32 -1.442695, %v1985_v26 }
0x144f   :  { %4223 = vpow2.f32 %v3992_v2 }
0x1453   :  { %v4222_v37 = vpop.eup %4221 }
0x1454   :  { %2008 = vrot.lane.b32.xlu1 %v4222_v37, %s4508_s10  ;;  %v5602_v37 = vld [vmem:[%s6322_s0 + $0x10] sm:$0xf] }
0x1455   :  { %v4224_v1 = vpop.eup %4223 }
0x1456   :  { %v1989_v32 = vadd.f32 1.0, %v4224_v1 }
0x1458   :  { %4225 = vrcp.f32 %v1989_v32  ;;  %v2001_v41 = vand.u32 2147483648, %v1989_v32  ;;  %vm1995_vm14 = vweird.f32 %v1989_v32  ;;  %v1999_v10 = vand.u32 2147483647, %v1989_v32 }
0x145a   :  { %v2002_v33 = vor.u32 1.1754944e-38, %v2001_v41  ;;  %vm2000_vm9 = vcmp.eq.f32.partialorder %v1999_v10, 8.507059e+37  ;;  %v5614_v41 = vld [vmem:[%s6322_s0 + $0x18] sm:$0xf] }
0x145e   :  { %v4226_v11 = vpop.eup %4225 }
0x145f   :  { %v1991_v48 = vmul.f32 %v4226_v11, %v1989_v32  ;;  %vm1996_vm12 = vweird.f32 %v4226_v11 }
0x1460   :  { %vm1997_vm15 = vmor %vm1995_vm14, %vm1996_vm12 }
0x1461   :  { %v1992_v3 = vsub.f32 1.0, %v1991_v48  ;;  %v5608_v48 = vld [vmem:[%s6327_s5] ss:$0 sm:$0xff] }
0x1463   :  { %v1993_v42 = vmul.f32 %v4226_v11, %v1992_v3 }
0x1465   :  { %v1994_v45 = vadd.f32 %v4226_v11, %v1993_v42 }
0x1467   :  { %v1998_v47 = vsel %vm1997_vm15, %v4226_v11, %v1994_v45 }
0x1468   :  { %v2003_v55 = vsel %vm2000_vm9, %v2002_v33, %v1998_v47 }
0x1469   :  { %v2006_v5 = vmul.f32 %v2003_v55, %v5330_v6  ;;  %v5514_v6 = vld [vmem:[%s6325_s3 + $0x10] sm:$0xff] }
0x14c6   :  { %v2009_v46 = vpop.permute.xlu1 %2008 }
0x14c7   :  { %v2011_v21 = vmul.f32 %v2009_v46, %v2003_v55 }
0x14c9   :  { %2013 = vrot.lane.b32.xlu2 %v2011_v21, %s4509_s11 }
0x1523   :  { %v2014_v62 = vpop.permute.xlu2 %2013 }
0x1524   :  { %v5498_v23 = vadd.f32 %v2014_v62, %v2006_v5  ;;  %v5624_v62 = vld [vmem:[%s6322_s0 + $0x1c] sm:$0xf] }
0x1526   :  { %4227 = vtanh.f32 %v5498_v23  ;;  %2026 = vrot.lane.b32.xlu1 %v5498_v23, %s4510_s12 }
0x152c   :  { %v4228_v22 = vpop.eup %4227 }
0x152d   :  { %2019 = vrot.lane.b32.xlu0 %v4228_v22, %s4508_s10 }
0x1598   :  { %v2027_v20 = vpop.permute.xlu1 %2026 }
0x1599   :  { %3993 = vmatmul.msk.f32.vlgmr.msra.gmra.mxu3 %vm65_vm11, %v2027_v20 }
0x159a   :  { %3009 = vmatpush.msra.mxu3 %v5508_v36 }
0x159c   :  { %3010 = vmatpush.msra.mxu3 %v5514_v6 }
0x159e   :  { %3011 = vmatpush.msra.mxu3 %v5520_v52 }
0x159f   :  { %v2020_v16 = vpop.permute.xlu0 %2019 }
0x15a0   :  { %v5523_v29 = vmul.f32 %v2020_v16, %v2003_v55  ;;  %3012 = vmatpush.msra.mxu3 %v5528_v56 }
0x15a2   :  { %2051 = vrot.lane.b32.xlu2 %v5523_v29, %s4509_s11 }
0x15fc   :  { %v2052_v15 = vpop.permute.xlu2 %2051 }
0x15fd   :  { %3994 = vmatmul.msk.f32.vlgmr.msra.gmra.mxu0 %vm65_vm11, %v2052_v15  ;;  %3995 = vmatmul.msk.f32.vlgmr.msra.gmra.mxu1 %vm65_vm11, %v2052_v15 }
0x15fe   :  { %3033 = vmatpush.msra.mxu0 %v5538_v19  ;;  %3356 = vmatpush.msra.mxu1 %v5351_v61  ;;  %v5559_v61 = vld [vmem:[%s6324_s2] sm:$0xff] }
0x1600   :  { %3034 = vmatpush.msra.mxu0 %v5545_v12  ;;  %3357 = vmatpush.msra.mxu1 %v5358_v28 }
0x1602   :  { %3035 = vmatpush.msra.mxu0 %v5552_v60  ;;  %3358 = vmatpush.msra.mxu1 %v5365_v50 }
0x1604   :  { %3036 = vmatpush.msra.mxu0 %v5559_v61  ;;  %3359 = vmatpush.msra.mxu1 %v5372_v53  ;;  %v5572_v53 = vld [vmem:[%s6322_s0] sm:$0xf] }
0x161c   :  { %v2047_v63 = vpop.f32.mrf.mxu3 }
0x167a   :  { %v2072_v28 = vpop.f32.mrf.mxu0 }
0x167b   :  { %v2073_v13 = vadd.f32 %v2072_v28, %v2047_v63 }
0x167d   :  { %v2075_v27 = vadd.f32 %v5566_v4, %v2073_v13 }
0x167f   :  { %v2084_v50 = vperm.slane %v2075_v27, 0  ;;  %v2078_v35 = vrot.slane %v2075_v27, 2  ;;  %v2077_v44 = vrot.slane %v2075_v27, 1  ;;  %v2079_v38 = vrot.slane %v2075_v27, 3 }
0x1680   :  { %v2081_v54 = vrot.slane %v2075_v27, 5  ;;  %v2080_v57 = vrot.slane %v2075_v27, 4  ;;  %v2082_v34 = vrot.slane %v2075_v27, 6  ;;  %v2083_v1 = vrot.slane %v2075_v27, 7 }
0x1681   :  { %v2100_v0 = vadd.f32 %v5572_v53, %v2084_v50  ;;  %v2086_v7 = vperm.slane %v2078_v35, 0  ;;  %v2085_v59 = vperm.slane %v2077_v44, 0  ;;  %v2087_v18 = vperm.slane %v2079_v38, 0 }
0x1682   :  { %v2089_v17 = vperm.slane %v2081_v54, 0  ;;  %v2088_v25 = vperm.slane %v2080_v57, 0  ;;  %v2090_v32 = vperm.slane %v2082_v34, 0  ;;  %v2091_v42 = vperm.slane %v2083_v1, 0 }
0x1683   :  { %4229 = vtanh.f32 %v2100_v0  ;;  %v2102_v31 = vadd.f32 %v5578_v30, %v2086_v7  ;;  %v2101_v9 = vadd.f32 %v5584_v8, %v2085_v59  ;;  %v2103_v43 = vadd.f32 %v5590_v39, %v2087_v18 }
0x1684   :  { %v2105_v26 = vadd.f32 %v5596_v14, %v2089_v17  ;;  %v2104_v2 = vadd.f32 %v5602_v37, %v2088_v25  ;;  %v2106_v10 = vadd.f32 %v5614_v41, %v2090_v32  ;;  %v2107_v22 = vadd.f32 %v5624_v62, %v2091_v42 }
0x1685   :  { %4231 = vtanh.f32 %v2102_v31 }
0x1686   :  { %4233 = vtanh.f32 %v2101_v9 }
0x1687   :  { %4235 = vtanh.f32 %v2103_v43 }
0x1688   :  { %4237 = vtanh.f32 %v2105_v26 }
0x1689   :  { %v4230_v11 = vpop.eup %4229  ;;  %4239 = vtanh.f32 %v2104_v2 }
0x168a   :  { %v2116_v3 = vmul.f32 %v5608_v48, %v4230_v11  ;;  %4241 = vtanh.f32 %v2106_v10 }
0x168b   :  { %v4232_v45 = vpop.eup %4231  ;;  %4243 = vtanh.f32 %v2107_v22 }
0x168c   :  { %v4234_v47 = vpop.eup %4233  ;;  %v2124_v33 = vsel %vm164_vm0, %v2116_v3, 0.0  ;;  %v2118_v46 = vmul.f32 %v5608_v48, %v4232_v45 }
0x168d   :  { %v4236_v55 = vpop.eup %4235  ;;  %2125 = vadd.xlane.f32.xlu0 %v2124_v33  ;;  %v2117_v21 = vmul.f32 %v5608_v48, %v4234_v47 }
0x168e   :  { %v2130_v5 = vsel %vm164_vm0, %v2118_v46, 0.0  ;;  %v4238_v20 = vpop.eup %4237  ;;  %v2119_v63 = vmul.f32 %v5608_v48, %v4236_v55 }
0x168f   :  { %2131 = vadd.xlane.f32.xlu2 %v2130_v5  ;;  %v2127_v16 = vsel %vm164_vm0, %v2117_v21, 0.0  ;;  %v4240_v15 = vpop.eup %4239  ;;  %v2121_v28 = vmul.f32 %v5608_v48, %v4238_v20 }
0x1690   :  { %2128 = vadd.xlane.f32.xlu1 %v2127_v16  ;;  %v2120_v13 = vmul.f32 %v5608_v48, %v4240_v15  ;;  %v2133_v27 = vsel %vm164_vm0, %v2119_v63, 0.0  ;;  %v4242_v50 = vpop.eup %4241 }
0x1691   :  { %v2139_v35 = vsel %vm164_vm0, %v2121_v28, 0.0  ;;  %v4244_v38 = vpop.eup %4243  ;;  %v2122_v54 = vmul.f32 %v5608_v48, %v4242_v50 }
0x1692   :  { %v2136_v44 = vsel %vm164_vm0, %v2120_v13, 0.0  ;;  %v2123_v57 = vmul.f32 %v5608_v48, %v4244_v38 }
0x1693   :  { %v2142_v0 = vsel %vm164_vm0, %v2122_v54, 0.0 }
0x1694   :  { %v2145_v7 = vsel %vm164_vm0, %v2123_v57, 0.0 }
0x1695   :  { %2134 = vadd.xlane.f32.xlu0 %v2133_v27 }
0x1697   :  { %2140 = vadd.xlane.f32.xlu2 %v2139_v35 }
0x1698   :  { %2137 = vadd.xlane.f32.xlu1 %v2136_v44 }
0x169d   :  { %2143 = vadd.xlane.f32.xlu0 %v2142_v0 }
0x16a0   :  { %2146 = vadd.xlane.f32.xlu1 %v2145_v7 }
0x1700   :  { %v2126_v59 = vpop.xlane.xlu0 %2125 }
0x1701   :  { %v2156_v34 = vperm.slane %v2126_v59, %v4696_v24 }
0x1702   :  { %v2132_v18 = vpop.xlane.xlu2 %2131 }
0x1703   :  { %v2129_v17 = vpop.xlane.xlu1 %2128  ;;  %v2158_v31 = vperm.slane %v2132_v18, %v4696_v24 }
0x1704   :  { %v2157_v25 = vperm.slane %v2129_v17, %v4696_v24 }
0x1706   :  { %v2164_v9 = vsel %vm207_vm1, %v2157_v25, %v2156_v34 }
0x1707   :  { %v2165_v2 = vsel %vm209_vm2, %v2158_v31, %v2164_v9 }
0x1708   :  { %v2135_v43 = vpop.xlane.xlu0 %2134 }
0x1709   :  { %v2159_v26 = vperm.slane %v2135_v43, %v4696_v24 }
0x170a   :  { %v2141_v1 = vpop.xlane.xlu2 %2140 }
0x170b   :  { %v2138_v32 = vpop.xlane.xlu1 %2137  ;;  %v2166_v11 = vsel %vm211_vm3, %v2159_v26, %v2165_v2  ;;  %v2161_v42 = vperm.slane %v2141_v1, %v4696_v24 }
0x170c   :  { %v2160_v3 = vperm.slane %v2138_v32, %v4696_v24 }
0x170e   :  { %v2167_v45 = vsel %vm213_vm4, %v2160_v3, %v2166_v11 }
0x170f   :  { %v2168_v33 = vsel %vm215_vm5, %v2161_v42, %v2167_v45 }
0x1710   :  { %v2144_v10 = vpop.xlane.xlu0 %2143 }
0x1711   :  { %v2162_v47 = vperm.slane %v2144_v10, %v4696_v24 }
0x1713   :  { %v2147_v46 = vpop.xlane.xlu1 %2146  ;;  %v2169_v55 = vsel %vm217_vm6, %v2162_v47, %v2168_v33  ;;  %v5683_v33 = vld [vmem:[%s6323_s1 + $0x8] sm:$0xff] }
0x1714   :  { %v2163_v21 = vperm.slane %v2147_v46, %v4696_v24 }
0x1716   :  { %v2170_v5 = vsel %vm219_vm7, %v2163_v21, %v2169_v55  ;;  %v5689_v55 = vld [vmem:[%s6323_s1] sm:$0xff] }
0x1717   :  { %v2172_v22 = vsel %vm222_vm8, %v2170_v5, -inf  ;;  %v2306_v21 = vperm.slane %v5689_v55, 4  ;;  %v5695_v5 = vld [vmem:[%s6323_s1 + $0x10] sm:$0xff] }
0x1718   :  { %2173 = vmax.xlane.f32.xlu2 %v2172_v22  ;;  %v2320_v22 = vperm.slane %v5695_v5, 4 }
0x178b   :  { %v2174_v20 = vpop.xlane.xlu2 %2173 }
0x178c   :  { %v2176_v16 = vperm.slane %v2174_v20, 0  ;;  %v2177_v15 = vperm.slane %v2174_v20, 1  ;;  %v2178_v63 = vperm.slane %v2174_v20, 2  ;;  %v2179_v28 = vperm.slane %v2174_v20, 3 }
0x178d   :  { %v2180_v35 = vperm.slane %v2174_v20, 4  ;;  %v2181_v44 = vperm.slane %v2174_v20, 5  ;;  %v2182_v34 = vperm.slane %v2174_v20, 6  ;;  %v2183_v9 = vperm.slane %v2174_v20, 7  ;;  %v5701_v20 = vld [vmem:[%s6323_s1 + $0x18] sm:$0xff] }
0x178e   :  { %v2192_v13 = vsub.f32 %v2126_v59, %v2176_v16  ;;  %v2193_v27 = vsub.f32 %v2129_v17, %v2177_v15  ;;  %v2194_v50 = vsub.f32 %v2132_v18, %v2178_v63  ;;  %v2195_v0 = vsub.f32 %v2135_v43, %v2179_v28  ;;  %v5707_v63 = vld [vmem:[%s6323_s1 + $0x20] sm:$0xff] }
0x178f   :  { %v2196_v7 = vsub.f32 %v2138_v32, %v2180_v35  ;;  %v2197_v25 = vsub.f32 %v2141_v1, %v2181_v44  ;;  %v2198_v11 = vsub.f32 %v2144_v10, %v2182_v34  ;;  %v2199_v43 = vsub.f32 %v2147_v46, %v2183_v9 }
0x1790   :  { %v2200_v38 = vmul.f32 1.442695, %v2192_v13  ;;  %v2202_v54 = vmul.f32 1.442695, %v2193_v27  ;;  %v2204_v57 = vmul.f32 1.442695, %v2194_v50 }
0x1791   :  { %v2206_v31 = vmul.f32 1.442695, %v2195_v0  ;;  %v2208_v26 = vmul.f32 1.442695, %v2196_v7  ;;  %v2210_v59 = vmul.f32 1.442695, %v2197_v25 }
0x1792   :  { %4245 = vpow2.f32 %v2200_v38  ;;  %v2212_v1 = vmul.f32 1.442695, %v2198_v11  ;;  %v2214_v32 = vmul.f32 1.442695, %v2199_v43  ;;  %v2313_v46 = vperm.slane %v5683_v33, 4  ;;  %v5713_v13 = vld [vmem:[%s6323_s1 + $0x28] sm:$0xff] }
0x1793   :  { %4247 = vpow2.f32 %v2202_v54  ;;  %v2327_v16 = vperm.slane %v5701_v20, 4  ;;  %v2334_v28 = vperm.slane %v5707_v63, 4  ;;  %v2341_v27 = vperm.slane %v5713_v13, 4  ;;  %v5722_v0 = vld [vmem:[%s6323_s1 + $0x30] sm:$0xff]  ;;  %v5728_v25 = vld [vmem:[%s6323_s1 + $0x38] sm:$0xff] }
0x1794   :  { %4249 = vpow2.f32 %v2204_v57  ;;  %v2348_v7 = vperm.slane %v5722_v0, 4  ;;  %v2355_v34 = vperm.slane %v5728_v25, 4 }
0x1795   :  { %4251 = vpow2.f32 %v2206_v31 }
0x1796   :  { %4253 = vpow2.f32 %v2208_v26 }
0x1797   :  { %4255 = vpow2.f32 %v2210_v59 }
0x1798   :  { %v5654_v2 = vpop.eup %4245  ;;  %4257 = vpow2.f32 %v2212_v1 }
0x1799   :  { %v5656_v17 = vpop.eup %4247  ;;  %2225 = vperm.xlu0 %4041, %v5654_v2   ;;  %4259 = vpow2.f32 %v2214_v32 }
0x179a   :  { %v5659_v18 = vpop.eup %4249  ;;  %2228 = vperm.xlu1 %4033, %v5656_v17  }
0x179b   :  { %2231 = vperm.xlu2 %4040, %v5659_v18   ;;  %v5663_v3 = vpop.eup %4251 }
0x179c   :  { %v5665_v42 = vpop.eup %4253 }
0x179d   :  { %v5668_v45 = vpop.eup %4255 }
0x179e   :  { %v5672_v10 = vpop.eup %4257 }
0x179f   :  { %v5674_v47 = vpop.eup %4259 }
0x17a1   :  { %2234 = vperm.xlu0 %4041, %v5663_v3  }
0x17a2   :  { %2237 = vperm.xlu1 %4033, %v5665_v42  }
0x17a3   :  { %2240 = vperm.xlu2 %4040, %v5668_v45  }
0x17a9   :  { %2243 = vperm.xlu0 %4041, %v5672_v10  }
0x17aa   :  { %2246 = vperm.xlu1 %4033, %v5674_v47  }
0x17b1   :  { %4042 = vset.pattern.permute.xlu0 %v4742_v40 }
0x17b2   :  { %4043 = vset.pattern.permute.xlu1 %v4742_v40 }
0x17b9   :  { %2311 = vperm.xlu0 %4042, %v2306_v21  }
0x17ba   :  { %2318 = vperm.xlu1 %4043, %v2313_v46  }
0x17c1   :  { %2332 = vperm.xlu0 %4042, %v2327_v16  }
0x17c2   :  { %2325 = vperm.xlu1 %4043, %v2320_v22  }
0x17c9   :  { %2346 = vperm.xlu0 %4042, %v2341_v27  }
0x17ca   :  { %2339 = vperm.xlu1 %4043, %v2334_v28  }
0x17d1   :  { %2360 = vperm.xlu0 %4042, %v2355_v34  }
0x17d2   :  { %2353 = vperm.xlu1 %4043, %v2348_v7  }
0x17d9   :  { %4045 = vset.pattern.permute.xlu0 %v4507_v51 }
0x17da   :  { %4044 = vset.pattern.permute.xlu1 %v4507_v51 }
0x17f5   :  { %v2232_v35 = vpop.permute.xlu2 %2231 }
0x17f6   :  { %v2250_v31 = vperm.slane %v2232_v35, %v4696_v24 }
0x17fd   :  { %v2241_v1 = vpop.permute.xlu2 %2240 }
0x17fe   :  { %v2253_v46 = vperm.slane %v2241_v1, %v4696_v24 }
0x180b   :  { %v2226_v15 = vpop.permute.xlu0 %2225 }
0x180c   :  { %v2229_v50 = vpop.permute.xlu1 %2228  ;;  %v2248_v38 = vperm.slane %v2226_v15, %v4696_v24 }
0x180d   :  { %v2249_v44 = vperm.slane %v2229_v50, %v4696_v24 }
0x180f   :  { %v2256_v54 = vsel %vm207_vm1, %v2249_v44, %v2248_v38 }
0x1810   :  { %v2257_v11 = vsel %vm209_vm2, %v2250_v31, %v2256_v54 }
0x1813   :  { %v2235_v57 = vpop.permute.xlu0 %2234 }
0x1814   :  { %v2238_v9 = vpop.permute.xlu1 %2237  ;;  %v2251_v26 = vperm.slane %v2235_v57, %v4696_v24 }
0x1815   :  { %v2252_v59 = vperm.slane %v2238_v9, %v4696_v24 }
0x1816   :  { %v2258_v43 = vsel %vm211_vm3, %v2251_v26, %v2257_v11 }
0x1817   :  { %v2259_v32 = vsel %vm213_vm4, %v2252_v59, %v2258_v43 }
0x1818   :  { %v2260_v28 = vsel %vm215_vm5, %v2253_v46, %v2259_v32 }
0x181b   :  { %v2244_v21 = vpop.permute.xlu0 %2243 }
0x181c   :  { %v2247_v22 = vpop.permute.xlu1 %2246  ;;  %v2254_v16 = vperm.slane %v2244_v21, %v4696_v24 }
0x181d   :  { %v2255_v15 = vperm.slane %v2247_v22, %v4696_v24 }
0x181e   :  { %v2261_v27 = vsel %vm217_vm6, %v2254_v16, %v2260_v28 }
0x181f   :  { %v2262_v50 = vsel %vm219_vm7, %v2255_v15, %v2261_v27 }
0x1820   :  { %v2264_v35 = vsel %vm222_vm8, %v2262_v50, 0.0 }
0x1821   :  { %2265 = vadd.xlane.f32.xlu2 %v2264_v35 }
0x182b   :  { %v2312_v38 = vpop.permute.xlu0 %2311 }
0x182c   :  { %v2319_v34 = vpop.permute.xlu1 %2318 }
0x1833   :  { %v2333_v1 = vpop.permute.xlu0 %2332 }
0x1834   :  { %v2326_v15 = vpop.permute.xlu1 %2325 }
0x1894   :  { %v2266_v44 = vpop.xlane.xlu2 %2265 }
0x1895   :  { %4261 = vrcp.f32 %v2266_v44  ;;  %v2278_v31 = vand.u32 2147483648, %v2266_v44  ;;  %v2276_v26 = vand.u32 2147483647, %v2266_v44  ;;  %vm2272_vm12 = vweird.f32 %v2266_v44 }
0x1897   :  { %v2279_v11 = vor.u32 1.1754944e-38, %v2278_v31  ;;  %vm2277_vm15 = vcmp.eq.f32.partialorder %v2276_v26, 8.507059e+37 }
0x189b   :  { %v4262_v54 = vpop.eup %4261 }
0x189c   :  { %v2268_v57 = vmul.f32 %v4262_v54, %v2266_v44  ;;  %vm2273_vm10 = vweird.f32 %v4262_v54 }
0x189d   :  { %vm2274_vm14 = vmor %vm2272_vm12, %vm2273_vm10 }
0x189e   :  { %v2269_v7 = vsub.f32 1.0, %v2268_v57 }
0x18a0   :  { %v2270_v9 = vmul.f32 %v4262_v54, %v2269_v7 }
0x18a2   :  { %v2271_v59 = vadd.f32 %v4262_v54, %v2270_v9 }
0x18a4   :  { %v2275_v43 = vsel %vm2274_vm14, %v4262_v54, %v2271_v59  ;;  %v2347_v54 = vpop.permute.xlu0 %2346 }
0x18a5   :  { %v2280_v32 = vsel %vm2277_vm15, %v2279_v11, %v2275_v43 }
0x18a6   :  { %v2284_v46 = vperm.slane %v2280_v32, 2  ;;  %v2283_v21 = vperm.slane %v2280_v32, 1  ;;  %v2282_v22 = vperm.slane %v2280_v32, 0  ;;  %v2285_v35 = vperm.slane %v2280_v32, 3 }
0x18a7   :  { %v2287_v57 = vperm.slane %v2280_v32, 5  ;;  %v2289_v11 = vperm.slane %v2280_v32, 7 }
0x18a8   :  { %v2300_v16 = vmul.f32 %v5659_v18, %v2284_v46  ;;  %v2299_v28 = vmul.f32 %v5656_v17, %v2283_v21  ;;  %v2298_v27 = vmul.f32 %v5654_v2, %v2282_v22  ;;  %v2301_v31 = vmul.f32 %v5663_v3, %v2285_v35  ;;  %v2340_v2 = vpop.permute.xlu1 %2339 }
0x18a9   :  { %v2303_v9 = vmul.f32 %v5668_v45, %v2287_v57  ;;  %v2286_v18 = vperm.slane %v2280_v32, 4  ;;  %v2288_v46 = vperm.slane %v2280_v32, 6 }
0x18aa   :  { %v2372_v50 = vmul.f32 %v2326_v15, %v2300_v16  ;;  %v2371_v44 = vmul.f32 %v2319_v34, %v2299_v28  ;;  %v2370_v7 = vmul.f32 %v2312_v38, %v2298_v27  ;;  %v2373_v26 = vmul.f32 %v2333_v1, %v2301_v31 }
0x18ab   :  { %v2375_v59 = vmul.f32 %v2347_v54, %v2303_v9  ;;  %v2302_v17 = vmul.f32 %v5665_v42, %v2286_v18  ;;  %v2305_v34 = vmul.f32 %v5674_v47, %v2289_v11  ;;  %v2304_v3 = vmul.f32 %v5672_v10, %v2288_v46 }
0x18ac   :  { %2413 = vperm.xlu2 %4040, %v2372_v50   ;;  %2410 = vperm.xlu0 %4045, %v2371_v44   ;;  %v2361_v38 = vpop.permute.xlu0 %2360 }
0x18ad   :  { %2407 = vperm.xlu1 %4044, %v2370_v7   ;;  %v2374_v43 = vmul.f32 %v2340_v2, %v2302_v17  ;;  %v2377_v21 = vmul.f32 %v2361_v38, %v2305_v34  ;;  %v5773_v34 = vld [vmem:[%s6328_s6] sm:$0xf]  ;;  %v2395_v38 = vpop.f32.mrf.mxu1 }
0x18b0   :  { %v2354_v45 = vpop.permute.xlu1 %2353 }
0x18b1   :  { %v2376_v1 = vmul.f32 %v2354_v45, %v2304_v3 }
0x18b4   :  { %2422 = vperm.xlu0 %4045, %v2375_v59  }
0x18b5   :  { %2416 = vperm.xlu1 %4044, %v2373_v26  }
0x18bc   :  { %2428 = vperm.xlu0 %4045, %v2377_v21   ;;  %v5780_v21 = vld [vmem:[%s6330_s8] ss:$0 sm:$0xff] }
0x18bd   :  { %2419 = vperm.xlu1 %4044, %v2374_v43  }
0x18c5   :  { %2425 = vperm.xlu1 %4044, %v2376_v1  }
0x1906   :  { %v2414_v47 = vpop.permute.xlu2 %2413 }
0x1907   :  { %v2432_v57 = vperm.slane %v2414_v47, %v4696_v24 }
0x191e   :  { %v2411_v16 = vpop.permute.xlu0 %2410 }
0x191f   :  { %v2408_v22 = vpop.permute.xlu1 %2407  ;;  %v2431_v42 = vperm.slane %v2411_v16, %v4696_v24 }
0x1920   :  { %v2430_v27 = vperm.slane %v2408_v22, %v4696_v24 }
0x1922   :  { %v2438_v32 = vsel %vm207_vm1, %v2431_v42, %v2430_v27 }
0x1923   :  { %v2439_v44 = vsel %vm209_vm2, %v2432_v57, %v2438_v32 }
0x1926   :  { %v2423_v28 = vpop.permute.xlu0 %2422 }
0x1927   :  { %v2417_v15 = vpop.permute.xlu1 %2416  ;;  %v2435_v9 = vperm.slane %v2423_v28, %v4696_v24 }
0x1928   :  { %v2433_v35 = vperm.slane %v2417_v15, %v4696_v24 }
0x192a   :  { %v2440_v7 = vsel %vm211_vm3, %v2433_v35, %v2439_v44 }
0x192e   :  { %v2429_v31 = vpop.permute.xlu0 %2428 }
0x192f   :  { %v2420_v50 = vpop.permute.xlu1 %2419  ;;  %v2437_v59 = vperm.slane %v2429_v31, %v4696_v24 }
0x1930   :  { %v2434_v10 = vperm.slane %v2420_v50, %v4696_v24 }
0x1932   :  { %v2441_v54 = vsel %vm213_vm4, %v2434_v10, %v2440_v7 }
0x1933   :  { %v2442_v11 = vsel %vm215_vm5, %v2435_v9, %v2441_v54 }
0x1937   :  { %v2426_v26 = vpop.permute.xlu1 %2425 }
0x1938   :  { %v2436_v18 = vperm.slane %v2426_v26, %v4696_v24 }
0x193a   :  { %v2443_v2 = vsel %vm217_vm6, %v2436_v18, %v2442_v11 }
0x193b   :  { %v2444_v17 = vsel %vm219_vm7, %v2437_v59, %v2443_v2 }
0x193c   :  { %3997 = vmatmul.msk.f32.vlgmr.msra.gmra.mxu2 %vm222_vm8, %v2444_v17 }
0x193d   :  { %4008 = vmatpush.msk.msra.mxu2 %vm506_vm13, %v5773_v34 }
0x19bf   :  { %v2464_v43 = vpop.f32.mrf.mxu2 }
0x19c0   :  { %v2465_v46 = vadd.f32 %v2464_v43, %v2395_v38 }
0x19c2   :  { %v2467_v3 = vadd.f32 %v5780_v21, %v2465_v46 }
0x19c4   :  { %4263 = vtanh.f32 %v2467_v3  ;;  %v3998_v1 = vmul.f32 -1.442695, %v2467_v3 }
0x19c6   :  { %4265 = vpow2.f32 %v3998_v1 }
0x19ca   :  { %v4264_v45 = vpop.eup %4263 }
0x19cb   :  { %2490 = vrot.lane.b32.xlu2 %v4264_v45, %s4508_s10 }
0x19cc   :  { %v4266_v22 = vpop.eup %4265 }
0x19cd   :  { %v2471_v16 = vadd.f32 1.0, %v4266_v22 }
0x19cf   :  { %4267 = vrcp.f32 %v2471_v16  ;;  %v2483_v50 = vand.u32 2147483648, %v2471_v16  ;;  %vm2477_vm10 = vweird.f32 %v2471_v16  ;;  %v2481_v32 = vand.u32 2147483647, %v2471_v16 }
0x19d1   :  { %v2484_v57 = vor.u32 1.1754944e-38, %v2483_v50  ;;  %vm2482_vm14 = vcmp.eq.f32.partialorder %v2481_v32, 8.507059e+37 }
0x19d5   :  { %v4268_v15 = vpop.eup %4267 }
0x19d6   :  { %v2473_v28 = vmul.f32 %v4268_v15, %v2471_v16  ;;  %vm2478_vm9 = vweird.f32 %v4268_v15 }
0x19d7   :  { %vm2479_vm12 = vmor %vm2477_vm10, %vm2478_vm9 }
0x19d8   :  { %v2474_v27 = vsub.f32 1.0, %v2473_v28 }
0x19da   :  { %v2475_v42 = vmul.f32 %v4268_v15, %v2474_v27 }
0x19dc   :  { %v2476_v47 = vadd.f32 %v4268_v15, %v2475_v42 }
0x19de   :  { %v2480_v35 = vsel %vm2479_vm12, %v4268_v15, %v2476_v47 }
0x19df   :  { %v2485_v44 = vsel %vm2482_vm14, %v2484_v57, %v2480_v35 }
0x19e0   :  { %v2488_v54 = vmul.f32 %v2485_v44, %v5498_v23 }
0x1a25   :  { %v2491_v10 = vpop.permute.xlu2 %2490 }
0x1a26   :  { %v2493_v7 = vmul.f32 %v2491_v10, %v2485_v44 }
0x1a28   :  { %2495 = vrot.lane.b32.xlu1 %v2493_v7, %s4509_s11 }
0x1a9a   :  { %v2496_v31 = vpop.permute.xlu1 %2495 }
0x1a9b   :  { %v5786_v9 = vadd.f32 %v2496_v31, %v2488_v54 }
0x1a9d   :  { %4269 = vtanh.f32 %v5786_v9  ;;  %2511 = vrot.lane.b32.xlu2 %v5786_v9, %s4510_s12 }
0x1aa3   :  { %v4270_v26 = vpop.eup %4269 }
0x1aa4   :  { %2501 = vrot.lane.b32.xlu0 %v4270_v26, %s4508_s10 }
0x1af7   :  { %v2512_v18 = vpop.permute.xlu2 %2511 }
0x1af8   :  { %3999 = vmatmul.msk.f32.vlgmr.msrb.gmra.mxu3 %vm65_vm11, %v2512_v18 }
0x1af9   :  { %3493 = vmatpush.msrb.mxu3 %v5508_v36  ;;  %v4457_v36 = vld [vmem:[%s6329_s7 + $0x18] sm:$0xff] }
0x1afb   :  { %3494 = vmatpush.msrb.mxu3 %v5514_v6  ;;  %v4458_v6 = vld [vmem:[%s6329_s7 + $0x10] sm:$0xff] }
0x1afd   :  { %3495 = vmatpush.msrb.mxu3 %v5520_v52  ;;  %v4459_v52 = vld [vmem:[%s6329_s7 + $0x8] sm:$0xff] }
0x1aff   :  { %3496 = vmatpush.msrb.mxu3 %v5528_v56  ;;  %v4460_v56 = vld [vmem:[%s6329_s7] sm:$0xff] }
0x1b16   :  { %v2502_v23 = vpop.permute.xlu0 %2501 }
0x1b17   :  { %v2504_v59 = vmul.f32 %v2502_v23, %v2485_v44 }
0x1b19   :  { %2506 = vrot.lane.b32.xlu1 %v2504_v59, %s4509_s11 }
0x1b8b   :  { %v2507_v11 = vpop.permute.xlu1 %2506 }
0x1b8c   :  { %2509 = vst.msk [vmem:[#allocation2 + $0x8] sm:$0xff] %vm65_vm11, %v2507_v11  ;;  %4000 = vmatmul.msk.f32.vlgmr.msrb.gmra.mxu0 %vm65_vm11, %v2507_v11  ;;  %4001 = vmatmul.msk.f32.vlgmr.msrb.gmra.mxu1 %vm65_vm11, %v2507_v11 }
0x1b8d   :  { %3517 = vmatpush.msrb.mxu0 %v5538_v19  ;;  %3840 = vmatpush.msrb.mxu1 %v4457_v36  ;;  %v2532_v19 = vpop.f32.mrf.mxu3 }
0x1b8f   :  { %3518 = vmatpush.msrb.mxu0 %v5545_v12  ;;  %3841 = vmatpush.msrb.mxu1 %v4458_v6 }
0x1b91   :  { %3519 = vmatpush.msrb.mxu0 %v5552_v60  ;;  %3842 = vmatpush.msrb.mxu1 %v4459_v52 }
0x1b93   :  { %3520 = vmatpush.msrb.mxu0 %v5559_v61  ;;  %3843 = vmatpush.msrb.mxu1 %v4460_v56 }
0x1c09   :  { %v2554_v12 = vpop.f32.mrf.mxu0 }
0x1c0a   :  { %v2555_v2 = vadd.f32 %v2554_v12, %v2532_v19 }
0x1c0c   :  { %v2557_v17 = vadd.f32 %v5566_v4, %v2555_v2 }
0x1c0e   :  { %v2566_v38 = vperm.slane %v2557_v17, 0  ;;  %v2560_v43 = vrot.slane %v2557_v17, 2  ;;  %v2559_v60 = vrot.slane %v2557_v17, 1  ;;  %v2562_v46 = vrot.slane %v2557_v17, 4 }
0x1c0f   :  { %v2563_v3 = vrot.slane %v2557_v17, 5  ;;  %v2561_v45 = vrot.slane %v2557_v17, 3  ;;  %v2565_v27 = vrot.slane %v2557_v17, 7 }
0x1c10   :  { %v2582_v1 = vadd.f32 %v5572_v53, %v2566_v38  ;;  %v2568_v22 = vperm.slane %v2560_v43, 0  ;;  %v2567_v61 = vperm.slane %v2559_v60, 0  ;;  %v2570_v16 = vperm.slane %v2562_v46, 0 }
0x1c11   :  { %v2571_v15 = vperm.slane %v2563_v3, 0  ;;  %v2569_v28 = vperm.slane %v2561_v45, 0  ;;  %v2564_v53 = vrot.slane %v2557_v17, 6  ;;  %v2573_v35 = vperm.slane %v2565_v27, 0 }
0x1c12   :  { %4271 = vtanh.f32 %v2582_v1  ;;  %v2584_v42 = vadd.f32 %v5578_v30, %v2568_v22  ;;  %v2583_v47 = vadd.f32 %v5584_v8, %v2567_v61  ;;  %v2586_v4 = vadd.f32 %v5602_v37, %v2570_v16 }
0x1c13   :  { %v2587_v50 = vadd.f32 %v5596_v14, %v2571_v15  ;;  %v2585_v32 = vadd.f32 %v5590_v39, %v2569_v28  ;;  %v2572_v44 = vperm.slane %v2564_v53, 0  ;;  %v2589_v8 = vadd.f32 %v5624_v62, %v2573_v35 }
0x1c14   :  { %4273 = vtanh.f32 %v2584_v42 }
0x1c15   :  { %4275 = vtanh.f32 %v2583_v47  ;;  %v2588_v26 = vadd.f32 %v5614_v41, %v2572_v44 }
0x1c16   :  { %4277 = vtanh.f32 %v2586_v4 }
0x1c17   :  { %4279 = vtanh.f32 %v2587_v50 }
0x1c18   :  { %v4272_v57 = vpop.eup %4271  ;;  %4281 = vtanh.f32 %v2585_v32 }
0x1c19   :  { %v2598_v10 = vmul.f32 %v5608_v48, %v4272_v57  ;;  %4283 = vtanh.f32 %v2589_v8 }
0x1c1a   :  { %v4274_v30 = vpop.eup %4273  ;;  %4285 = vtanh.f32 %v2588_v26 }
0x1c1b   :  { %v4276_v7 = vpop.eup %4275  ;;  %v2606_v37 = vsel %vm164_vm0, %v2598_v10, 0.0  ;;  %v2600_v14 = vmul.f32 %v5608_v48, %v4274_v30 }
0x1c1c   :  { %v4278_v54 = vpop.eup %4277  ;;  %2607 = vadd.xlane.f32.xlu0 %v2606_v37  ;;  %v2599_v39 = vmul.f32 %v5608_v48, %v4276_v7 }
0x1c1d   :  { %v2612_v31 = vsel %vm164_vm0, %v2600_v14, 0.0  ;;  %v4280_v18 = vpop.eup %4279  ;;  %v2602_v62 = vmul.f32 %v5608_v48, %v4278_v54 }
0x1c1e   :  { %2613 = vadd.xlane.f32.xlu1 %v2612_v31  ;;  %v2609_v23 = vsel %vm164_vm0, %v2599_v39, 0.0  ;;  %v4282_v59 = vpop.eup %4281  ;;  %v2603_v11 = vmul.f32 %v5608_v48, %v4280_v18 }
0x1c1f   :  { %2610 = vadd.xlane.f32.xlu2 %v2609_v23  ;;  %v2601_v36 = vmul.f32 %v5608_v48, %v4282_v59  ;;  %v2618_v6 = vsel %vm164_vm0, %v2602_v62, 0.0  ;;  %v4284_v52 = vpop.eup %4283 }
0x1c20   :  { %v2621_v41 = vsel %vm164_vm0, %v2603_v11, 0.0  ;;  %v4286_v19 = vpop.eup %4285  ;;  %v2605_v12 = vmul.f32 %v5608_v48, %v4284_v52 }
0x1c21   :  { %v2615_v56 = vsel %vm164_vm0, %v2601_v36, 0.0  ;;  %v2604_v2 = vmul.f32 %v5608_v48, %v4286_v19 }
0x1c22   :  { %v2627_v17 = vsel %vm164_vm0, %v2605_v12, 0.0 }
0x1c23   :  { %v2624_v38 = vsel %vm164_vm0, %v2604_v2, 0.0 }
0x1c24   :  { %2619 = vadd.xlane.f32.xlu0 %v2618_v6 }
0x1c26   :  { %2622 = vadd.xlane.f32.xlu1 %v2621_v41 }
0x1c27   :  { %2616 = vadd.xlane.f32.xlu2 %v2615_v56 }
0x1c2c   :  { %2628 = vadd.xlane.f32.xlu0 %v2627_v17 }
0x1c2f   :  { %2625 = vadd.xlane.f32.xlu2 %v2624_v38 }
0x1c8f   :  { %v2608_v43 = vpop.xlane.xlu0 %2607 }
0x1c90   :  { %v2638_v1 = vperm.slane %v2608_v43, %v4696_v24 }
0x1c91   :  { %v2614_v46 = vpop.xlane.xlu1 %2613 }
0x1c92   :  { %v2611_v60 = vpop.xlane.xlu2 %2610  ;;  %v2640_v22 = vperm.slane %v2614_v46, %v4696_v24 }
0x1c93   :  { %v2639_v3 = vperm.slane %v2611_v60, %v4696_v24 }
0x1c95   :  { %v2646_v61 = vsel %vm207_vm1, %v2639_v3, %v2638_v1 }
0x1c96   :  { %v2647_v15 = vsel %vm209_vm2, %v2640_v22, %v2646_v61 }
0x1c97   :  { %v2620_v45 = vpop.xlane.xlu0 %2619 }
0x1c98   :  { %v2642_v27 = vperm.slane %v2620_v45, %v4696_v24 }
0x1c99   :  { %v2623_v42 = vpop.xlane.xlu1 %2622 }
0x1c9a   :  { %v2617_v16 = vpop.xlane.xlu2 %2616  ;;  %v2643_v50 = vperm.slane %v2623_v42, %v4696_v24 }
0x1c9b   :  { %v2641_v48 = vperm.slane %v2617_v16, %v4696_v24 }
0x1c9d   :  { %v2648_v28 = vsel %vm211_vm3, %v2641_v48, %v2647_v15  ;;  %v2788_v15 = vperm.slane %v5689_v55, 5 }
0x1c9e   :  { %v2649_v47 = vsel %vm213_vm4, %v2642_v27, %v2648_v28  ;;  %v2795_v28 = vperm.slane %v5683_v33, 5  ;;  %v2802_v27 = vperm.slane %v5695_v5, 5  ;;  %v2830_v5 = vperm.slane %v5722_v0, 5 }
0x1c9f   :  { %v2629_v4 = vpop.xlane.xlu0 %2628  ;;  %v2650_v57 = vsel %vm215_vm5, %v2643_v50, %v2649_v47  ;;  %v2809_v47 = vperm.slane %v5701_v20, 5  ;;  %v2816_v50 = vperm.slane %v5707_v63, 5 }
0x1ca0   :  { %v2645_v35 = vperm.slane %v2629_v4, %v4696_v24 }
0x1ca2   :  { %v2626_v32 = vpop.xlane.xlu2 %2625 }
0x1ca3   :  { %v2644_v53 = vperm.slane %v2626_v32, %v4696_v24 }
0x1ca5   :  { %v2651_v10 = vsel %vm217_vm6, %v2644_v53, %v2650_v57  ;;  %v2823_v53 = vperm.slane %v5713_v13, 5 }
0x1ca6   :  { %v2652_v44 = vsel %vm219_vm7, %v2645_v35, %v2651_v10 }
0x1ca7   :  { %v2654_v30 = vsel %vm222_vm8, %v2652_v44, -inf  ;;  %v2837_v44 = vperm.slane %v5728_v25, 5 }
0x1ca8   :  { %2655 = vmax.xlane.f32.xlu1 %v2654_v30 }
0x1d1b   :  { %v2656_v8 = vpop.xlane.xlu1 %2655 }
0x1d1c   :  { %v2658_v7 = vperm.slane %v2656_v8, 0  ;;  %v2659_v37 = vperm.slane %v2656_v8, 1  ;;  %v2660_v14 = vperm.slane %v2656_v8, 2  ;;  %v2662_v54 = vperm.slane %v2656_v8, 4 }
0x1d1d   :  { %v2661_v18 = vperm.slane %v2656_v8, 3  ;;  %v2664_v23 = vperm.slane %v2656_v8, 6  ;;  %v2665_v41 = vperm.slane %v2656_v8, 7  ;;  %v2663_v19 = vperm.slane %v2656_v8, 5 }
0x1d1e   :  { %v2674_v39 = vsub.f32 %v2608_v43, %v2658_v7  ;;  %v2675_v31 = vsub.f32 %v2611_v60, %v2659_v37  ;;  %v2676_v26 = vsub.f32 %v2614_v46, %v2660_v14  ;;  %v2678_v36 = vsub.f32 %v2620_v45, %v2662_v54 }
0x1d1f   :  { %v2677_v6 = vsub.f32 %v2617_v16, %v2661_v18  ;;  %v2680_v52 = vsub.f32 %v2626_v32, %v2664_v23  ;;  %v2681_v60 = vsub.f32 %v2629_v4, %v2665_v41  ;;  %v2679_v46 = vsub.f32 %v2623_v42, %v2663_v19 }
0x1d20   :  { %v2682_v59 = vmul.f32 1.442695, %v2674_v39  ;;  %v2684_v62 = vmul.f32 1.442695, %v2675_v31  ;;  %v2686_v11 = vmul.f32 1.442695, %v2676_v26 }
0x1d21   :  { %v2690_v56 = vmul.f32 1.442695, %v2678_v36  ;;  %v2688_v12 = vmul.f32 1.442695, %v2677_v6  ;;  %v2694_v17 = vmul.f32 1.442695, %v2680_v52 }
0x1d22   :  { %4287 = vpow2.f32 %v2682_v59  ;;  %v2696_v3 = vmul.f32 1.442695, %v2681_v60  ;;  %v2692_v45 = vmul.f32 1.442695, %v2679_v46 }
0x1d23   :  { %4289 = vpow2.f32 %v2684_v62 }
0x1d24   :  { %4291 = vpow2.f32 %v2686_v11 }
0x1d25   :  { %4293 = vpow2.f32 %v2690_v56 }
0x1d26   :  { %4295 = vpow2.f32 %v2688_v12 }
0x1d27   :  { %4297 = vpow2.f32 %v2694_v17 }
0x1d28   :  { %v5858_v2 = vpop.eup %4287  ;;  %4299 = vpow2.f32 %v2696_v3 }
0x1d29   :  { %v5860_v38 = vpop.eup %4289  ;;  %2707 = vperm.xlu2 %4040, %v5858_v2   ;;  %4301 = vpow2.f32 %v2692_v45 }
0x1d2a   :  { %v5863_v43 = vpop.eup %4291  ;;  %2710 = vperm.xlu0 %4045, %v5860_v38  }
0x1d2b   :  { %2713 = vperm.xlu1 %4044, %v5863_v43   ;;  %v5867_v1 = vpop.eup %4293 }
0x1d2c   :  { %v5869_v22 = vpop.eup %4295 }
0x1d2d   :  { %v5872_v61 = vpop.eup %4297 }
0x1d2e   :  { %v5876_v16 = vpop.eup %4299 }
0x1d2f   :  { %v5878_v48 = vpop.eup %4301 }
0x1d31   :  { %2719 = vperm.xlu2 %4040, %v5867_v1  }
0x1d32   :  { %2716 = vperm.xlu0 %4045, %v5869_v22  }
0x1d33   :  { %2725 = vperm.xlu1 %4044, %v5872_v61  }
0x1d39   :  { %2728 = vperm.xlu2 %4040, %v5876_v16  }
0x1d3a   :  { %2722 = vperm.xlu0 %4045, %v5878_v48  }
0x1d3b   :  { %4046 = vset.pattern.permute.xlu1 %v4742_v40 }
0x1d41   :  { %4047 = vset.pattern.permute.xlu2 %v4742_v40 }
0x1d43   :  { %2793 = vperm.xlu1 %4046, %v2788_v15  }
0x1d49   :  { %2800 = vperm.xlu2 %4047, %v2795_v28  }
0x1d4b   :  { %2807 = vperm.xlu1 %4046, %v2802_v27  }
0x1d51   :  { %2814 = vperm.xlu2 %4047, %v2809_v47  }
0x1d53   :  { %2821 = vperm.xlu1 %4046, %v2816_v50  }
0x1d59   :  { %2828 = vperm.xlu2 %4047, %v2823_v53  }
0x1d5b   :  { %2835 = vperm.xlu1 %4046, %v2830_v5  }
0x1d61   :  { %2842 = vperm.xlu2 %4047, %v2837_v44  }
0x1d63   :  { %4048 = vset.pattern.permute.xlu1 %v4507_v51 }
0x1d69   :  { %4049 = vset.pattern.permute.xlu2 %v4507_v51 }
0x1d83   :  { %v2708_v42 = vpop.permute.xlu2 %2707 }
0x1d84   :  { %v2730_v33 = vperm.slane %v2708_v42, %v4696_v24 }
0x1d8b   :  { %v2720_v35 = vpop.permute.xlu2 %2719 }
0x1d8c   :  { %v2734_v7 = vperm.slane %v2720_v35, %v4696_v24 }
0x1d93   :  { %v2729_v37 = vpop.permute.xlu2 %2728 }
0x1d94   :  { %v2737_v31 = vperm.slane %v2729_v37, %v4696_v24 }
0x1d9c   :  { %v2711_v4 = vpop.permute.xlu0 %2710 }
0x1d9d   :  { %v2714_v32 = vpop.permute.xlu1 %2713  ;;  %v2731_v55 = vperm.slane %v2711_v4, %v4696_v24 }
0x1d9e   :  { %v2732_v10 = vperm.slane %v2714_v32, %v4696_v24 }
0x1d9f   :  { %v2738_v20 = vsel %vm207_vm1, %v2731_v55, %v2730_v33 }
0x1da0   :  { %v2739_v13 = vsel %vm209_vm2, %v2732_v10, %v2738_v20 }
0x1da3   :  { %v2801_v19 = vpop.permute.xlu2 %2800 }
0x1da4   :  { %v2717_v57 = vpop.permute.xlu0 %2716 }
0x1da5   :  { %v2733_v63 = vperm.slane %v2717_v57, %v4696_v24  ;;  %v2726_v30 = vpop.permute.xlu1 %2725 }
0x1da6   :  { %v2736_v54 = vperm.slane %v2726_v30, %v4696_v24 }
0x1da7   :  { %v2740_v8 = vsel %vm211_vm3, %v2733_v63, %v2739_v13 }
0x1da8   :  { %v2741_v39 = vsel %vm213_vm4, %v2734_v7, %v2740_v8 }
0x1dab   :  { %v2815_v55 = vpop.permute.xlu2 %2814 }
0x1dac   :  { %v2723_v14 = vpop.permute.xlu0 %2722 }
0x1dad   :  { %v2735_v0 = vperm.slane %v2723_v14, %v4696_v24 }
0x1daf   :  { %v2742_v25 = vsel %vm215_vm5, %v2735_v0, %v2741_v39 }
0x1db0   :  { %v2743_v26 = vsel %vm217_vm6, %v2736_v54, %v2742_v25 }
0x1db1   :  { %v2744_v18 = vsel %vm219_vm7, %v2737_v31, %v2743_v26 }
0x1db2   :  { %v2746_v23 = vsel %vm222_vm8, %v2744_v18, 0.0 }
0x1db3   :  { %2747 = vadd.xlane.f32.xlu0 %v2746_v23 }
0x1db5   :  { %v2794_v62 = vpop.permute.xlu1 %2793 }
0x1dbd   :  { %v2808_v46 = vpop.permute.xlu1 %2807 }
0x1dc5   :  { %v2822_v57 = vpop.permute.xlu1 %2821 }
0x1dcd   :  { %v2836_v13 = vpop.permute.xlu1 %2835 }
0x1e26   :  { %v2748_v59 = vpop.xlane.xlu0 %2747 }
0x1e27   :  { %4303 = vrcp.f32 %v2748_v59  ;;  %v2760_v52 = vand.u32 2147483648, %v2748_v59  ;;  %v2758_v56 = vand.u32 2147483647, %v2748_v59  ;;  %vm2754_vm9 = vweird.f32 %v2748_v59 }
0x1e29   :  { %v2761_v17 = vor.u32 1.1754944e-38, %v2760_v52  ;;  %vm2759_vm12 = vcmp.eq.f32.partialorder %v2758_v56, 8.507059e+37 }
0x1e2d   :  { %v4304_v11 = vpop.eup %4303 }
0x1e2e   :  { %v2750_v36 = vmul.f32 %v4304_v11, %v2748_v59  ;;  %vm2755_vm15 = vweird.f32 %v4304_v11 }
0x1e2f   :  { %vm2756_vm10 = vmor %vm2754_vm9, %vm2755_vm15 }
0x1e30   :  { %v2751_v6 = vsub.f32 1.0, %v2750_v36 }
0x1e32   :  { %v2752_v41 = vmul.f32 %v4304_v11, %v2751_v6 }
0x1e34   :  { %v2753_v12 = vadd.f32 %v4304_v11, %v2752_v41 }
0x1e36   :  { %v2757_v60 = vsel %vm2756_vm10, %v4304_v11, %v2753_v12 }
0x1e37   :  { %v2762_v3 = vsel %vm2759_vm12, %v2761_v17, %v2757_v60  ;;  %v2877_v60 = vpop.f32.mrf.mxu1 }
0x1e38   :  { %v2766_v45 = vperm.slane %v2762_v3, 2  ;;  %v2764_v15 = vperm.slane %v2762_v3, 0  ;;  %v2765_v28 = vperm.slane %v2762_v3, 1  ;;  %v2767_v50 = vperm.slane %v2762_v3, 3 }
0x1e39   :  { %v2768_v32 = vperm.slane %v2762_v3, 4  ;;  %v2769_v20 = vperm.slane %v2762_v3, 5  ;;  %v2771_v7 = vperm.slane %v2762_v3, 7 }
0x1e3a   :  { %v2782_v27 = vmul.f32 %v5863_v43, %v2766_v45  ;;  %v2780_v42 = vmul.f32 %v5858_v2, %v2764_v15  ;;  %v2781_v47 = vmul.f32 %v5860_v38, %v2765_v28  ;;  %v2783_v33 = vmul.f32 %v5869_v22, %v2767_v50  ;;  %v2829_v38 = vpop.permute.xlu2 %2828 }
0x1e3b   :  { %v2784_v5 = vmul.f32 %v5867_v1, %v2768_v32  ;;  %v2770_v2 = vperm.slane %v2762_v3, 6  ;;  %v2785_v63 = vmul.f32 %v5878_v48, %v2769_v20  ;;  %v2787_v22 = vmul.f32 %v5876_v16, %v2771_v7  ;;  %v5956_v7 = vld [vmem:[%s6326_s4] ss:$0 sm:$0xff] }
0x1e3c   :  { %v2854_v4 = vmul.f32 %v2808_v46, %v2782_v27  ;;  %v2852_v53 = vmul.f32 %v2794_v62, %v2780_v42  ;;  %v2853_v35 = vmul.f32 %v2801_v19, %v2781_v47  ;;  %v2855_v10 = vmul.f32 %v2815_v55, %v2783_v33 }
0x1e3d   :  { %v2856_v43 = vmul.f32 %v2822_v57, %v2784_v5  ;;  %v2786_v44 = vmul.f32 %v5872_v61, %v2770_v2  ;;  %v2857_v30 = vmul.f32 %v2829_v38, %v2785_v63 }
0x1e3e   :  { %2895 = vperm.xlu0 %4045, %v2854_v4   ;;  %2889 = vperm.xlu1 %4048, %v2852_v53  }
0x1e3f   :  { %2892 = vperm.xlu2 %4049, %v2853_v35   ;;  %v2858_v8 = vmul.f32 %v2836_v13, %v2786_v44 }
0x1e42   :  { %v2843_v1 = vpop.permute.xlu2 %2842 }
0x1e43   :  { %v2859_v37 = vmul.f32 %v2843_v1, %v2787_v22 }
0x1e46   :  { %2898 = vperm.xlu1 %4048, %v2855_v10  }
0x1e47   :  { %2901 = vperm.xlu2 %4049, %v2856_v43  }
0x1e4e   :  { %2904 = vperm.xlu1 %4048, %v2857_v30  }
0x1e4f   :  { %2907 = vperm.xlu2 %4049, %v2858_v8  }
0x1e56   :  { %2910 = vperm.xlu1 %4048, %v2859_v37  }
0x1e99   :  { %v2893_v0 = vpop.permute.xlu2 %2892 }
0x1e9a   :  { %v2913_v61 = vperm.slane %v2893_v0, %v4696_v24 }
0x1ea1   :  { %v2902_v39 = vpop.permute.xlu2 %2901 }
0x1ea2   :  { %v2916_v11 = vperm.slane %v2902_v39, %v4696_v24 }
0x1ea9   :  { %v2908_v36 = vpop.permute.xlu2 %2907 }
0x1eaa   :  { %v2918_v41 = vperm.slane %v2908_v36, %v4696_v24 }
0x1eb0   :  { %v2890_v14 = vpop.permute.xlu1 %2889  ;;  %v2896_v31 = vpop.permute.xlu0 %2895 }
0x1eb1   :  { %v2912_v48 = vperm.slane %v2890_v14, %v4696_v24  ;;  %v2914_v25 = vperm.slane %v2896_v31, %v4696_v24  ;;  %v5962_v31 = vld [vmem:[%s6322_s0] sm:$0xf] }
0x1eb3   :  { %v2920_v26 = vsel %vm207_vm1, %v2913_v61, %v2912_v48 }
0x1eb4   :  { %v2921_v16 = vsel %vm209_vm2, %v2914_v25, %v2920_v26 }
0x1eb8   :  { %v2899_v54 = vpop.permute.xlu1 %2898 }
0x1eb9   :  { %v2915_v18 = vperm.slane %v2899_v54, %v4696_v24 }
0x1ebb   :  { %v2922_v59 = vsel %vm211_vm3, %v2915_v18, %v2921_v16 }
0x1ebc   :  { %v2923_v6 = vsel %vm213_vm4, %v2916_v11, %v2922_v59  ;;  %v5968_v59 = vld [vmem:[%s6322_s0 + $0x8] sm:$0xf]  ;;  %v5974_v11 = vld [vmem:[%s6322_s0 + $0x4] sm:$0xf] }
0x1ec0   :  { %v2905_v23 = vpop.permute.xlu1 %2904 }
0x1ec1   :  { %v2917_v62 = vperm.slane %v2905_v23, %v4696_v24 }
0x1ec3   :  { %v2924_v52 = vsel %vm215_vm5, %v2917_v62, %v2923_v6  ;;  %v5980_v6 = vld [vmem:[%s6322_s0 + $0xc] sm:$0xf] }
0x1ec4   :  { %v2925_v12 = vsel %vm217_vm6, %v2918_v41, %v2924_v52  ;;  %v5986_v41 = vld [vmem:[%s6322_s0 + $0x14] sm:$0xf] }
0x1ec8   :  { %v2911_v56 = vpop.permute.xlu1 %2910 }
0x1ec9   :  { %v2919_v19 = vperm.slane %v2911_v56, %v4696_v24 }
0x1ecb   :  { %v2926_v17 = vsel %vm219_vm7, %v2919_v19, %v2925_v12  ;;  %v5992_v19 = vld [vmem:[%s6322_s0 + $0x10] sm:$0xf] }
0x1ecc   :  { %4003 = vmatmul.msk.f32.vlgmr.msrb.gmra.mxu2 %vm222_vm8, %v2926_v17 }
0x1ecd   :  { %4014 = vmatpush.msk.msrb.mxu2 %vm506_vm13, %v5773_v34 }
0x1f4f   :  { %v2946_v46 = vpop.f32.mrf.mxu2 }
0x1f50   :  { %v2947_v3 = vadd.f32 %v2946_v46, %v2877_v60 }
0x1f52   :  { %v2949_v45 = vadd.f32 %v5780_v21, %v2947_v3  ;;  %v5998_v3 = vld [vmem:[%s6327_s5] ss:$0 sm:$0xff] }
0x1f54   :  { %4305 = vtanh.f32 %v2949_v45  ;;  %v4004_v28 = vmul.f32 -1.442695, %v2949_v45 }
0x1f56   :  { %4307 = vpow2.f32 %v4004_v28 }
0x1f5a   :  { %v4306_v15 = vpop.eup %4305 }
0x1f5b   :  { %2972 = vrot.lane.b32.xlu2 %v4306_v15, %s4508_s10 }
0x1f5c   :  { %v4308_v27 = vpop.eup %4307 }
0x1f5d   :  { %v2953_v42 = vadd.f32 1.0, %v4308_v27  ;;  %v6004_v27 = vld [vmem:[%s6322_s0 + $0x18] sm:$0xf] }
0x1f5f   :  { %4309 = vrcp.f32 %v2953_v42  ;;  %v2965_v34 = vand.u32 2147483648, %v2953_v42  ;;  %vm2959_vm14 = vweird.f32 %v2953_v42  ;;  %v2963_v35 = vand.u32 2147483647, %v2953_v42 }
0x1f61   :  { %v2966_v55 = vor.u32 1.1754944e-38, %v2965_v34  ;;  %vm2964_vm9 = vcmp.eq.f32.partialorder %v2963_v35, 8.507059e+37  ;;  %v6014_v35 = vld [vmem:[%s6322_s0 + $0x1c] sm:$0xf] }
0x1f65   :  { %v4310_v47 = vpop.eup %4309 }
0x1f66   :  { %v2955_v4 = vmul.f32 %v4310_v47, %v2953_v42  ;;  %vm2960_vm13 = vweird.f32 %v4310_v47 }
0x1f67   :  { %vm2961_vm15 = vmor %vm2959_vm14, %vm2960_vm13 }
0x1f68   :  { %v2956_v50 = vsub.f32 1.0, %v2955_v4 }
0x1f6a   :  { %v2957_v32 = vmul.f32 %v4310_v47, %v2956_v50 }
0x1f6c   :  { %v2958_v53 = vadd.f32 %v4310_v47, %v2957_v32 }
0x1f6e   :  { %v2962_v21 = vsel %vm2961_vm15, %v4310_v47, %v2958_v53 }
0x1f6f   :  { %v2967_v33 = vsel %vm2964_vm9, %v2966_v55, %v2962_v21 }
0x1f70   :  { %v2970_v10 = vmul.f32 %v2967_v33, %v5786_v9 }
0x1fb5   :  { %v2973_v57 = vpop.permute.xlu2 %2972 }
0x1fb6   :  { %v2975_v5 = vmul.f32 %v2973_v57, %v2967_v33 }
0x1fb8   :  { %2977 = vrot.lane.b32.xlu0 %v2975_v5, %s4509_s11 }
0x202a   :  { %v2978_v43 = vpop.permute.xlu0 %2977 }
0x202b   :  { %v5940_v20 = vadd.f32 %v2978_v43, %v2970_v10 }
0x202d   :  { %4311 = vtanh.f32 %v5940_v20  ;;  %2993 = vrot.lane.b32.xlu2 %v5940_v20, %s4510_s12 }
0x2033   :  { %v4312_v2 = vpop.eup %4311 }
0x2034   :  { %2983 = vrot.lane.b32.xlu1 %v4312_v2, %s4508_s10 }
0x2087   :  { %v2994_v38 = vpop.permute.xlu2 %2993 }
0x2088   :  { %4005 = vmatmul.msk.f32.vlgmr.msra.gmra.mxu3 %vm65_vm11, %v2994_v38 }
0x20a6   :  { %v2984_v63 = vpop.permute.xlu1 %2983 }
0x20a7   :  { %v5947_v44 = vmul.f32 %v2984_v63, %v2967_v33 }
0x20a9   :  { %3017 = vrot.lane.b32.xlu0 %v5947_v44, %s4509_s11 }
0x210b   :  { %v3014_v13 = vpop.f32.mrf.mxu3 }
0x211b   :  { %v3018_v9 = vpop.permute.xlu0 %3017 }
0x211c   :  { %4006 = vmatmul.msk.f32.vlgmr.msra.gmra.mxu0 %vm65_vm11, %v3018_v9  ;;  %4007 = vmatmul.msk.f32.vlgmr.msra.gmra.mxu1 %vm65_vm11, %v3018_v9 }
0x2199   :  { %v3038_v30 = vpop.f32.mrf.mxu0 }
0x219a   :  { %v3039_v8 = vadd.f32 %v3038_v30, %v3014_v13 }
0x219c   :  { %v3041_v22 = vadd.f32 %v5956_v7, %v3039_v8 }
0x219e   :  { %v3050_v1 = vperm.slane %v3041_v22, 0  ;;  %v3044_v37 = vrot.slane %v3041_v22, 2  ;;  %v3043_v14 = vrot.slane %v3041_v22, 1  ;;  %v3045_v0 = vrot.slane %v3041_v22, 3 }
0x219f   :  { %v3047_v54 = vrot.slane %v3041_v22, 5  ;;  %v3046_v39 = vrot.slane %v3041_v22, 4  ;;  %v3048_v16 = vrot.slane %v3041_v22, 6  ;;  %v3049_v17 = vrot.slane %v3041_v22, 7 }
0x21a0   :  { %v3066_v48 = vadd.f32 %v5962_v31, %v3050_v1  ;;  %v3052_v61 = vperm.slane %v3044_v37, 0  ;;  %v3051_v25 = vperm.slane %v3043_v14, 0  ;;  %v3053_v26 = vperm.slane %v3045_v0, 0 }
0x21a1   :  { %v3055_v18 = vperm.slane %v3047_v54, 0  ;;  %v3054_v23 = vperm.slane %v3046_v39, 0  ;;  %v3056_v60 = vperm.slane %v3048_v16, 0  ;;  %v3057_v15 = vperm.slane %v3049_v17, 0 }
0x21a2   :  { %4313 = vtanh.f32 %v3066_v48  ;;  %v3068_v62 = vadd.f32 %v5968_v59, %v3052_v61  ;;  %v3067_v36 = vadd.f32 %v5974_v11, %v3051_v25  ;;  %v3069_v52 = vadd.f32 %v5980_v6, %v3053_v26 }
0x21a3   :  { %v3071_v56 = vadd.f32 %v5986_v41, %v3055_v18  ;;  %v3070_v12 = vadd.f32 %v5992_v19, %v3054_v23  ;;  %v3072_v42 = vadd.f32 %v6004_v27, %v3056_v60  ;;  %v3073_v21 = vadd.f32 %v6014_v35, %v3057_v15 }
0x21a4   :  { %4315 = vtanh.f32 %v3068_v62 }
0x21a5   :  { %4317 = vtanh.f32 %v3067_v36 }
0x21a6   :  { %4319 = vtanh.f32 %v3069_v52 }
0x21a7   :  { %4321 = vtanh.f32 %v3071_v56 }
0x21a8   :  { %v4314_v46 = vpop.eup %4313  ;;  %4323 = vtanh.f32 %v3070_v12 }
0x21a9   :  { %v3082_v45 = vmul.f32 %v5998_v3, %v4314_v46  ;;  %4325 = vtanh.f32 %v3072_v42 }
0x21aa   :  { %v4316_v28 = vpop.eup %4315  ;;  %4327 = vtanh.f32 %v3073_v21 }
0x21ab   :  { %v4318_v47 = vpop.eup %4317  ;;  %v3090_v4 = vsel %vm164_vm0, %v3082_v45, 0.0  ;;  %v3084_v50 = vmul.f32 %v5998_v3, %v4316_v28 }
0x21ac   :  { %v4320_v32 = vpop.eup %4319  ;;  %3091 = vadd.xlane.f32.xlu1 %v3090_v4  ;;  %v3083_v53 = vmul.f32 %v5998_v3, %v4318_v47 }
0x21ad   :  { %v3096_v34 = vsel %vm164_vm0, %v3084_v50, 0.0  ;;  %v4322_v55 = vpop.eup %4321  ;;  %v3085_v5 = vmul.f32 %v5998_v3, %v4320_v32 }
0x21ae   :  { %3097 = vadd.xlane.f32.xlu0 %v3096_v34  ;;  %v3093_v57 = vsel %vm164_vm0, %v3083_v53, 0.0  ;;  %v4324_v33 = vpop.eup %4323  ;;  %v3087_v10 = vmul.f32 %v5998_v3, %v4322_v55 }
0x21af   :  { %3094 = vadd.xlane.f32.xlu2 %v3093_v57  ;;  %v3086_v43 = vmul.f32 %v5998_v3, %v4324_v33  ;;  %v3099_v2 = vsel %vm164_vm0, %v3085_v5, 0.0  ;;  %v4326_v38 = vpop.eup %4325 }
0x21b0   :  { %v3105_v63 = vsel %vm164_vm0, %v3087_v10, 0.0  ;;  %v4328_v13 = vpop.eup %4327  ;;  %v3088_v30 = vmul.f32 %v5998_v3, %v4326_v38 }
0x21b1   :  { %v3102_v9 = vsel %vm164_vm0, %v3086_v43, 0.0  ;;  %v3089_v8 = vmul.f32 %v5998_v3, %v4328_v13 }
0x21b2   :  { %v3108_v22 = vsel %vm164_vm0, %v3088_v30, 0.0 }
0x21b3   :  { %v3111_v1 = vsel %vm164_vm0, %v3089_v8, 0.0 }
0x21b4   :  { %3100 = vadd.xlane.f32.xlu1 %v3099_v2 }
0x21b6   :  { %3106 = vadd.xlane.f32.xlu0 %v3105_v63 }
0x21b7   :  { %3103 = vadd.xlane.f32.xlu2 %v3102_v9 }
0x21bc   :  { %3109 = vadd.xlane.f32.xlu1 %v3108_v22 }
0x21bf   :  { %3112 = vadd.xlane.f32.xlu2 %v3111_v1 }
0x221f   :  { %v3092_v37 = vpop.xlane.xlu1 %3091 }
0x2220   :  { %v3122_v39 = vperm.slane %v3092_v37, %v4696_v24 }
0x2221   :  { %v3098_v14 = vpop.xlane.xlu0 %3097 }
0x2222   :  { %v3095_v0 = vpop.xlane.xlu2 %3094  ;;  %v3124_v48 = vperm.slane %v3098_v14, %v4696_v24 }
0x2223   :  { %v3123_v54 = vperm.slane %v3095_v0, %v4696_v24 }
0x2225   :  { %v3130_v61 = vsel %vm207_vm1, %v3123_v54, %v3122_v39 }
0x2226   :  { %v3131_v18 = vsel %vm209_vm2, %v3124_v48, %v3130_v61 }
0x2227   :  { %v3101_v25 = vpop.xlane.xlu1 %3100 }
0x2228   :  { %v3125_v26 = vperm.slane %v3101_v25, %v4696_v24 }
0x2229   :  { %v3107_v23 = vpop.xlane.xlu0 %3106 }
0x222a   :  { %v3104_v16 = vpop.xlane.xlu2 %3103  ;;  %v3132_v62 = vsel %vm211_vm3, %v3125_v26, %v3131_v18  ;;  %v3127_v52 = vperm.slane %v3107_v23, %v4696_v24 }
0x222b   :  { %v3126_v36 = vperm.slane %v3104_v16, %v4696_v24 }
0x222d   :  { %v3133_v56 = vsel %vm213_vm4, %v3126_v36, %v3132_v62  ;;  %v6079_v36 = vld [vmem:[%s6323_s1 + $0x18] sm:$0xff] }
0x222e   :  { %v3134_v60 = vsel %vm215_vm5, %v3127_v52, %v3133_v56  ;;  %v3293_v52 = vperm.slane %v6079_v36, 6  ;;  %v6085_v56 = vld [vmem:[%s6323_s1 + $0x28] sm:$0xff] }
0x222f   :  { %v3110_v12 = vpop.xlane.xlu1 %3109 }
0x2230   :  { %v3128_v17 = vperm.slane %v3110_v12, %v4696_v24 }
0x2232   :  { %v3113_v46 = vpop.xlane.xlu2 %3112  ;;  %v3135_v45 = vsel %vm217_vm6, %v3128_v17, %v3134_v60  ;;  %v6091_v17 = vld [vmem:[%s6323_s1 + $0x8] sm:$0xff] }
0x2233   :  { %v3129_v15 = vperm.slane %v3113_v46, %v4696_v24  ;;  %v3279_v60 = vperm.slane %v6091_v17, 6 }
0x2235   :  { %v3136_v28 = vsel %vm219_vm7, %v3129_v15, %v3135_v45  ;;  %v6097_v45 = vld [vmem:[%s6323_s1 + $0x38] sm:$0xff] }
0x2236   :  { %v3138_v42 = vsel %vm222_vm8, %v3136_v28, -inf  ;;  %v3321_v15 = vperm.slane %v6097_v45, 6  ;;  %v6103_v28 = vld [vmem:[%s6323_s1 + $0x10] sm:$0xff] }
0x2237   :  { %3139 = vmax.xlane.f32.xlu0 %v3138_v42  ;;  %v3286_v42 = vperm.slane %v6103_v28, 6 }
0x22aa   :  { %v3140_v47 = vpop.xlane.xlu0 %3139 }
0x22ab   :  { %v3142_v4 = vperm.slane %v3140_v47, 0  ;;  %v3143_v50 = vperm.slane %v3140_v47, 1  ;;  %v3144_v32 = vperm.slane %v3140_v47, 2  ;;  %v3147_v53 = vperm.slane %v3140_v47, 5 }
0x22ac   :  { %v3145_v57 = vperm.slane %v3140_v47, 3  ;;  %v3146_v33 = vperm.slane %v3140_v47, 4  ;;  %v3149_v13 = vperm.slane %v3140_v47, 7  ;;  %v3148_v22 = vperm.slane %v3140_v47, 6 }
0x22ad   :  { %v3158_v34 = vsub.f32 %v3092_v37, %v3142_v4  ;;  %v3159_v21 = vsub.f32 %v3095_v0, %v3143_v50  ;;  %v3160_v55 = vsub.f32 %v3098_v14, %v3144_v32  ;;  %v3163_v2 = vsub.f32 %v3107_v23, %v3147_v53  ;;  %v6110_v32 = vld [vmem:[%s6323_s1 + $0x20] sm:$0xff] }
0x22ae   :  { %v3162_v38 = vsub.f32 %v3104_v16, %v3146_v33  ;;  %v3161_v63 = vsub.f32 %v3101_v25, %v3145_v57  ;;  %v3165_v0 = vsub.f32 %v3113_v46, %v3149_v13  ;;  %v3164_v54 = vsub.f32 %v3110_v12, %v3148_v22  ;;  %v6073_v16 = vld [vmem:[%s6323_s1] sm:$0xff] }
0x22af   :  { %v3166_v5 = vmul.f32 1.442695, %v3158_v34  ;;  %v3168_v10 = vmul.f32 1.442695, %v3159_v21  ;;  %v3170_v43 = vmul.f32 1.442695, %v3160_v55 }
0x22b0   :  { %v3176_v9 = vmul.f32 1.442695, %v3163_v2  ;;  %v3174_v30 = vmul.f32 1.442695, %v3162_v38  ;;  %v3172_v1 = vmul.f32 1.442695, %v3161_v63 }
0x22b1   :  { %4329 = vpow2.f32 %v3166_v5  ;;  %v3180_v39 = vmul.f32 1.442695, %v3165_v0  ;;  %v3178_v61 = vmul.f32 1.442695, %v3164_v54  ;;  %v3272_v62 = vperm.slane %v6073_v16, 6  ;;  %v6123_v2 = vld [vmem:[%s6323_s1 + $0x30] sm:$0xff] }
0x22b2   :  { %4331 = vpow2.f32 %v3168_v10  ;;  %v3307_v12 = vperm.slane %v6085_v56, 6  ;;  %v3300_v53 = vperm.slane %v6110_v32, 6  ;;  %v3314_v38 = vperm.slane %v6123_v2, 6 }
0x22b3   :  { %4333 = vpow2.f32 %v3170_v43 }
0x22b4   :  { %4335 = vpow2.f32 %v3176_v9 }
0x22b5   :  { %4337 = vpow2.f32 %v3174_v30 }
0x22b6   :  { %4339 = vpow2.f32 %v3172_v1 }
0x22b7   :  { %v6044_v8 = vpop.eup %4329  ;;  %4341 = vpow2.f32 %v3180_v39 }
0x22b8   :  { %v6046_v37 = vpop.eup %4331  ;;  %3191 = vperm.xlu1 %4048, %v6044_v8   ;;  %4343 = vpow2.f32 %v3178_v61 }
0x22b9   :  { %v6049_v14 = vpop.eup %4333  ;;  %3194 = vperm.xlu2 %4049, %v6046_v37  }
0x22ba   :  { %3197 = vperm.xlu0 %4045, %v6049_v14   ;;  %v6053_v48 = vpop.eup %4335 }
0x22bb   :  { %v6055_v25 = vpop.eup %4337 }
0x22bc   :  { %v6058_v26 = vpop.eup %4339 }
0x22bd   :  { %v6062_v18 = vpop.eup %4341 }
0x22be   :  { %v6064_v23 = vpop.eup %4343 }
0x22c0   :  { %3206 = vperm.xlu1 %4048, %v6053_v48  }
0x22c1   :  { %3203 = vperm.xlu2 %4049, %v6055_v25  }
0x22c2   :  { %3200 = vperm.xlu0 %4045, %v6058_v26  }
0x22c9   :  { %3212 = vperm.xlu2 %4049, %v6062_v18  }
0x22ca   :  { %3209 = vperm.xlu0 %4045, %v6064_v23  }
0x22d1   :  { %4051 = vset.pattern.permute.xlu2 %v4742_v40 }
0x22d2   :  { %4050 = vset.pattern.permute.xlu0 %v4742_v40 }
0x22d9   :  { %3284 = vperm.xlu2 %4051, %v3279_v60  }
0x22da   :  { %3277 = vperm.xlu0 %4050, %v3272_v62  }
0x22e1   :  { %3291 = vperm.xlu2 %4051, %v3286_v42  }
0x22e2   :  { %3298 = vperm.xlu0 %4050, %v3293_v52  }
0x22e9   :  { %3305 = vperm.xlu2 %4051, %v3300_v53  }
0x22ea   :  { %3312 = vperm.xlu0 %4050, %v3307_v12  }
0x22f1   :  { %3319 = vperm.xlu2 %4051, %v3314_v38  }
0x22f2   :  { %3326 = vperm.xlu0 %4050, %v3321_v15  }
0x22f9   :  { %4052 = vset.pattern.permute.xlu2 %v4507_v51 }
0x22fa   :  { %4053 = vset.pattern.permute.xlu0 %v4507_v51 }
0x2313   :  { %v3195_v46 = vpop.permute.xlu2 %3194 }
0x2314   :  { %v3215_v21 = vperm.slane %v3195_v46, %v4696_v24 }
0x231b   :  { %v3204_v34 = vpop.permute.xlu2 %3203 }
0x231c   :  { %v3218_v63 = vperm.slane %v3204_v34, %v4696_v24 }
0x2323   :  { %v3213_v13 = vpop.permute.xlu2 %3212 }
0x2324   :  { %v3221_v54 = vperm.slane %v3213_v13, %v4696_v24 }
0x232a   :  { %v3192_v4 = vpop.permute.xlu1 %3191 }
0x232b   :  { %v3214_v50 = vperm.slane %v3192_v4, %v4696_v24 }
0x232c   :  { %v3198_v47 = vpop.permute.xlu0 %3197 }
0x232d   :  { %v3216_v55 = vperm.slane %v3198_v47, %v4696_v24  ;;  %v3222_v57 = vsel %vm207_vm1, %v3215_v21, %v3214_v50 }
0x232f   :  { %v3223_v10 = vsel %vm209_vm2, %v3216_v55, %v3222_v57 }
0x2332   :  { %v3207_v9 = vpop.permute.xlu1 %3206 }
0x2333   :  { %v3219_v22 = vperm.slane %v3207_v9, %v4696_v24  ;;  %v3285_v4 = vpop.permute.xlu2 %3284 }
0x2334   :  { %v3201_v33 = vpop.permute.xlu0 %3200 }
0x2335   :  { %v3217_v5 = vperm.slane %v3201_v33, %v4696_v24 }
0x2337   :  { %v3224_v43 = vsel %vm211_vm3, %v3217_v5, %v3223_v10 }
0x2338   :  { %v3225_v30 = vsel %vm213_vm4, %v3218_v63, %v3224_v43 }
0x2339   :  { %v3226_v39 = vsel %vm215_vm5, %v3219_v22, %v3225_v30 }
0x233b   :  { %v3292_v9 = vpop.permute.xlu2 %3291 }
0x233c   :  { %v3210_v1 = vpop.permute.xlu0 %3209 }
0x233d   :  { %v3220_v0 = vperm.slane %v3210_v1, %v4696_v24 }
0x233f   :  { %v3227_v61 = vsel %vm217_vm6, %v3220_v0, %v3226_v39 }
0x2340   :  { %v3228_v62 = vsel %vm219_vm7, %v3221_v54, %v3227_v61 }
0x2341   :  { %v3230_v52 = vsel %vm222_vm8, %v3228_v62, 0.0 }
0x2342   :  { %3231 = vadd.xlane.f32.xlu1 %v3230_v52 }
0x234c   :  { %v3278_v12 = vpop.permute.xlu0 %3277 }
0x2354   :  { %v3299_v42 = vpop.permute.xlu0 %3298 }
0x235c   :  { %v3313_v38 = vpop.permute.xlu0 %3312 }
0x23b5   :  { %v3232_v60 = vpop.xlane.xlu1 %3231 }
0x23b6   :  { %4345 = vrcp.f32 %v3232_v60  ;;  %v3244_v50 = vand.u32 2147483648, %v3232_v60  ;;  %v3242_v34 = vand.u32 2147483647, %v3232_v60  ;;  %vm3238_vm12 = vweird.f32 %v3232_v60 }
0x23b8   :  { %v3245_v55 = vor.u32 1.1754944e-38, %v3244_v50  ;;  %vm3243_vm14 = vcmp.eq.f32.partialorder %v3242_v34, 8.507059e+37 }
0x23bc   :  { %v4346_v46 = vpop.eup %4345 }
0x23bd   :  { %v3234_v15 = vmul.f32 %v4346_v46, %v3232_v60  ;;  %vm3239_vm10 = vweird.f32 %v4346_v46  ;;  %v3327_v60 = vpop.permute.xlu0 %3326 }
0x23be   :  { %vm3240_vm13 = vmor %vm3238_vm12, %vm3239_vm10 }
0x23bf   :  { %v3235_v47 = vsub.f32 1.0, %v3234_v15 }
0x23c1   :  { %v3236_v53 = vmul.f32 %v4346_v46, %v3235_v47  ;;  %v3306_v47 = vpop.permute.xlu2 %3305 }
0x23c3   :  { %v3237_v21 = vadd.f32 %v4346_v46, %v3236_v53 }
0x23c5   :  { %v3241_v57 = vsel %vm3240_vm13, %v4346_v46, %v3237_v21 }
0x23c6   :  { %v3246_v33 = vsel %vm3243_vm14, %v3245_v55, %v3241_v57 }
0x23c7   :  { %v3250_v5 = vperm.slane %v3246_v33, 2  ;;  %v3249_v10 = vperm.slane %v3246_v33, 1  ;;  %v3248_v43 = vperm.slane %v3246_v33, 0  ;;  %v3253_v1 = vperm.slane %v3246_v33, 5 }
0x23c8   :  { %v3255_v0 = vperm.slane %v3246_v33, 7  ;;  %v3251_v61 = vperm.slane %v3246_v33, 3  ;;  %v3254_v50 = vperm.slane %v3246_v33, 6 }
0x23c9   :  { %v3266_v63 = vmul.f32 %v6049_v14, %v3250_v5  ;;  %v3265_v13 = vmul.f32 %v6046_v37, %v3249_v10  ;;  %v3264_v30 = vmul.f32 %v6044_v8, %v3248_v43  ;;  %v3269_v62 = vmul.f32 %v6053_v48, %v3253_v1  ;;  %v3320_v53 = vpop.permute.xlu2 %3319 }
0x23ca   :  { %v3271_v52 = vmul.f32 %v6062_v18, %v3255_v0  ;;  %v3267_v14 = vmul.f32 %v6058_v26, %v3251_v61  ;;  %v3252_v37 = vperm.slane %v3246_v33, 4  ;;  %v3270_v48 = vmul.f32 %v6064_v23, %v3254_v50 }
0x23cb   :  { %v3338_v22 = vmul.f32 %v3292_v9, %v3266_v63  ;;  %v3337_v54 = vmul.f32 %v3285_v4, %v3265_v13  ;;  %v3336_v39 = vmul.f32 %v3278_v12, %v3264_v30  ;;  %v3341_v46 = vmul.f32 %v3313_v38, %v3269_v62  ;;  %v3361_v62 = vpop.f32.mrf.mxu1 }
0x23cc   :  { %v3343_v15 = vmul.f32 %v3327_v60, %v3271_v52  ;;  %v3339_v8 = vmul.f32 %v3299_v42, %v3267_v14  ;;  %v3268_v12 = vmul.f32 %v6055_v25, %v3252_v37  ;;  %v3342_v18 = vmul.f32 %v3320_v53, %v3270_v48  ;;  %v6163_v60 = vld [vmem:[%s6330_s8] ss:$0 sm:$0xff]  ;;  %s4511_s8 = smov [#allocation2]  }
0x23cd   :  { %3379 = vperm.xlu0 %4053, %v3338_v22   ;;  %3376 = vperm.xlu1 %4048, %v3337_v54  }
0x23ce   :  { %3373 = vperm.xlu2 %4052, %v3336_v39   ;;  %v3340_v4 = vmul.f32 %v3306_v47, %v3268_v12 }
0x23d5   :  { %3388 = vperm.xlu0 %4053, %v3341_v46   ;;  %3394 = vperm.xlu1 %4048, %v3343_v15  }
0x23d6   :  { %3382 = vperm.xlu2 %4052, %v3339_v8  }
0x23de   :  { %3385 = vperm.xlu2 %4052, %v3340_v4  }
0x23e6   :  { %3391 = vperm.xlu2 %4052, %v3342_v18  }
0x2428   :  { %v3374_v26 = vpop.permute.xlu2 %3373 }
0x2429   :  { %v3396_v5 = vperm.slane %v3374_v26, %v4696_v24 }
0x2430   :  { %v3383_v34 = vpop.permute.xlu2 %3382 }
0x2431   :  { %v3399_v33 = vperm.slane %v3383_v34, %v4696_v24 }
0x2438   :  { %v3386_v21 = vpop.permute.xlu2 %3385 }
0x2439   :  { %v3400_v63 = vperm.slane %v3386_v21, %v4696_v24 }
0x243f   :  { %v3380_v55 = vpop.permute.xlu0 %3379  ;;  %v3377_v57 = vpop.permute.xlu1 %3376 }
0x2440   :  { %v3398_v42 = vperm.slane %v3380_v55, %v4696_v24  ;;  %v3397_v25 = vperm.slane %v3377_v57, %v4696_v24  ;;  %v3392_v43 = vpop.permute.xlu2 %3391 }
0x2441   :  { %v3402_v22 = vperm.slane %v3392_v43, %v4696_v24 }
0x2442   :  { %v3404_v10 = vsel %vm207_vm1, %v3397_v25, %v3396_v5 }
0x2443   :  { %v3405_v23 = vsel %vm209_vm2, %v3398_v42, %v3404_v10 }
0x2444   :  { %v3406_v38 = vsel %vm211_vm3, %v3399_v33, %v3405_v23 }
0x2445   :  { %v3407_v1 = vsel %vm213_vm4, %v3400_v63, %v3406_v38 }
0x2447   :  { %v3389_v9 = vpop.permute.xlu0 %3388  ;;  %v3395_v30 = vpop.permute.xlu1 %3394 }
0x2448   :  { %v3401_v13 = vperm.slane %v3389_v9, %v4696_v24  ;;  %v3403_v54 = vperm.slane %v3395_v30, %v4696_v24 }
0x244a   :  { %v3408_v0 = vsel %vm215_vm5, %v3401_v13, %v3407_v1 }
0x244b   :  { %v3409_v39 = vsel %vm217_vm6, %v3402_v22, %v3408_v0 }
0x244c   :  { %v3410_v61 = vsel %vm219_vm7, %v3403_v54, %v3409_v39 }
0x244d   :  { %4009 = vmatmul.msk.f32.vlgmr.msra.gmra.mxu2 %vm222_vm8, %v3410_v61 }
0x24d0   :  { %v3430_v52 = vpop.f32.mrf.mxu2 }
0x24d1   :  { %v3431_v14 = vadd.f32 %v3430_v52, %v3361_v62 }
0x24d3   :  { %v3433_v46 = vadd.f32 %v6163_v60, %v3431_v14 }
0x24d5   :  { %4347 = vtanh.f32 %v3433_v46  ;;  %v4010_v15 = vmul.f32 -1.442695, %v3433_v46 }
0x24d7   :  { %4349 = vpow2.f32 %v4010_v15 }
0x24db   :  { %v4348_v37 = vpop.eup %4347 }
0x24dc   :  { %3456 = vrot.lane.b32.xlu0 %v4348_v37, %s4508_s10 }
0x24dd   :  { %v4350_v8 = vpop.eup %4349 }
0x24de   :  { %v3437_v12 = vadd.f32 1.0, %v4350_v8 }
0x24e0   :  { %4351 = vrcp.f32 %v3437_v12  ;;  %v3449_v18 = vand.u32 2147483648, %v3437_v12  ;;  %vm3443_vm9 = vweird.f32 %v3437_v12  ;;  %v3447_v26 = vand.u32 2147483647, %v3437_v12 }
0x24e2   :  { %v3450_v21 = vor.u32 1.1754944e-38, %v3449_v18  ;;  %vm3448_vm12 = vcmp.eq.f32.partialorder %v3447_v26, 8.507059e+37 }
0x24e6   :  { %v4352_v47 = vpop.eup %4351 }
0x24e7   :  { %v3439_v4 = vmul.f32 %v4352_v47, %v3437_v12  ;;  %vm3444_vm15 = vweird.f32 %v4352_v47 }
0x24e8   :  { %vm3445_vm10 = vmor %vm3443_vm9, %vm3444_vm15  ;;  %vm1057_vm15 = vcmask 523520   ;;  %vm1542_vm9 = vcmask 785920  }
0x24e9   :  { %v3440_v50 = vsub.f32 1.0, %v3439_v4 }
0x24eb   :  { %v3441_v48 = vmul.f32 %v4352_v47, %v3440_v50 }
0x24ed   :  { %v3442_v53 = vadd.f32 %v4352_v47, %v3441_v48 }
0x24ef   :  { %v3446_v34 = vsel %vm3445_vm10, %v4352_v47, %v3442_v53  ;;  %vm2023_vm10 = vcmask 1048320  }
0x24f0   :  { %v3451_v42 = vsel %vm3448_vm12, %v3450_v21, %v3446_v34 }
0x24f1   :  { %v3454_v5 = vmul.f32 %v3451_v42, %v5940_v20 }
0x254e   :  { %v3457_v55 = vpop.permute.xlu0 %3456 }
0x254f   :  { %v3459_v57 = vmul.f32 %v3457_v55, %v3451_v42 }
0x2551   :  { %3461 = vrot.lane.b32.xlu2 %v3459_v57, %s4509_s11 }
0x25ab   :  { %v3462_v25 = vpop.permute.xlu2 %3461 }
0x25ac   :  { %v6169_v10 = vadd.f32 %v3462_v25, %v3454_v5 }
0x25ae   :  { %4353 = vtanh.f32 %v6169_v10  ;;  %3477 = vrot.lane.b32.xlu0 %v6169_v10, %s4510_s12 }
0x25b4   :  { %v4354_v33 = vpop.eup %4353 }
0x25b5   :  { %3467 = vrot.lane.b32.xlu1 %v4354_v33, %s4508_s10 }
0x2620   :  { %v3478_v23 = vpop.permute.xlu0 %3477 }
0x2621   :  { %4011 = vmatmul.msk.f32.vlgmr.msrb.gmra.mxu3 %vm65_vm11, %v3478_v23 }
0x2627   :  { %v3468_v43 = vpop.permute.xlu1 %3467 }
0x2628   :  { %v6176_v38 = vmul.f32 %v3468_v43, %v3451_v42 }
0x262a   :  { %3501 = vrot.lane.b32.xlu2 %v6176_v38, %s4509_s11 }
0x2684   :  { %v3502_v20 = vpop.permute.xlu2 %3501 }
0x2685   :  { %4012 = vmatmul.msk.f32.vlgmr.msrb.gmra.mxu0 %vm65_vm11, %v3502_v20  ;;  %4013 = vmatmul.msk.f32.vlgmr.msrb.gmra.mxu1 %vm65_vm11, %v3502_v20 }
0x26a4   :  { %v3498_v63 = vpop.f32.mrf.mxu3 }
0x2702   :  { %v3522_v9 = vpop.f32.mrf.mxu0 }
0x2703   :  { %v3523_v13 = vadd.f32 %v3522_v9, %v3498_v63 }
0x2705   :  { %v3525_v30 = vadd.f32 %v5956_v7, %v3523_v13 }
0x2707   :  { %v3534_v22 = vperm.slane %v3525_v30, 0  ;;  %v3528_v1 = vrot.slane %v3525_v30, 2  ;;  %v3527_v0 = vrot.slane %v3525_v30, 1  ;;  %v3529_v54 = vrot.slane %v3525_v30, 3 }
0x2708   :  { %v3530_v39 = vrot.slane %v3525_v30, 4  ;;  %v3531_v61 = vrot.slane %v3525_v30, 5  ;;  %v3532_v8 = vrot.slane %v3525_v30, 6  ;;  %v3533_v50 = vrot.slane %v3525_v30, 7 }
0x2709   :  { %v3550_v62 = vadd.f32 %v5962_v31, %v3534_v22  ;;  %v3536_v52 = vperm.slane %v3528_v1, 0  ;;  %v3535_v14 = vperm.slane %v3527_v0, 0  ;;  %v3537_v46 = vperm.slane %v3529_v54, 0 }
0x270a   :  { %v3538_v37 = vperm.slane %v3530_v39, 0  ;;  %v3539_v15 = vperm.slane %v3531_v61, 0  ;;  %v3540_v48 = vperm.slane %v3532_v8, 0  ;;  %v3541_v18 = vperm.slane %v3533_v50, 0 }
0x270b   :  { %4355 = vtanh.f32 %v3550_v62  ;;  %v3552_v12 = vadd.f32 %v5968_v59, %v3536_v52  ;;  %v3551_v47 = vadd.f32 %v5974_v11, %v3535_v14  ;;  %v3553_v7 = vadd.f32 %v5980_v6, %v3537_v46 }
0x270c   :  { %v3554_v4 = vadd.f32 %v5992_v19, %v3538_v37  ;;  %v3555_v31 = vadd.f32 %v5986_v41, %v3539_v15  ;;  %v3556_v11 = vadd.f32 %v6004_v27, %v3540_v48  ;;  %v3557_v55 = vadd.f32 %v6014_v35, %v3541_v18 }
0x270d   :  { %4357 = vtanh.f32 %v3552_v12 }
0x270e   :  { %4359 = vtanh.f32 %v3551_v47 }
0x270f   :  { %4361 = vtanh.f32 %v3553_v7 }
0x2710   :  { %4363 = vtanh.f32 %v3554_v4 }
0x2711   :  { %v4356_v53 = vpop.eup %4355  ;;  %4365 = vtanh.f32 %v3555_v31 }
0x2712   :  { %v3566_v26 = vmul.f32 %v5998_v3, %v4356_v53  ;;  %4367 = vtanh.f32 %v3556_v11 }
0x2713   :  { %v4358_v59 = vpop.eup %4357  ;;  %4369 = vtanh.f32 %v3557_v55 }
0x2714   :  { %v4360_v34 = vpop.eup %4359  ;;  %v3574_v6 = vsel %vm164_vm0, %v3566_v26, 0.0  ;;  %v3568_v19 = vmul.f32 %v5998_v3, %v4358_v59 }
0x2715   :  { %v4362_v21 = vpop.eup %4361  ;;  %3575 = vadd.xlane.f32.xlu1 %v3574_v6  ;;  %v3567_v41 = vmul.f32 %v5998_v3, %v4360_v34 }
0x2716   :  { %v3580_v42 = vsel %vm164_vm0, %v3568_v19, 0.0  ;;  %v4364_v57 = vpop.eup %4363  ;;  %v3569_v27 = vmul.f32 %v5998_v3, %v4362_v21 }
0x2717   :  { %3581 = vadd.xlane.f32.xlu2 %v3580_v42  ;;  %v3577_v5 = vsel %vm164_vm0, %v3567_v41, 0.0  ;;  %v4366_v25 = vpop.eup %4365  ;;  %v3570_v33 = vmul.f32 %v5998_v3, %v4364_v57 }
0x2718   :  { %3578 = vadd.xlane.f32.xlu0 %v3577_v5  ;;  %v3571_v23 = vmul.f32 %v5998_v3, %v4366_v25  ;;  %v3583_v43 = vsel %vm164_vm0, %v3569_v27, 0.0  ;;  %v4368_v20 = vpop.eup %4367 }
0x2719   :  { %v3586_v35 = vsel %vm164_vm0, %v3570_v33, 0.0  ;;  %v4370_v63 = vpop.eup %4369  ;;  %v3572_v13 = vmul.f32 %v5998_v3, %v4368_v20 }
0x271a   :  { %v3589_v9 = vsel %vm164_vm0, %v3571_v23, 0.0  ;;  %v3573_v30 = vmul.f32 %v5998_v3, %v4370_v63 }
0x271b   :  { %v3592_v22 = vsel %vm164_vm0, %v3572_v13, 0.0 }
0x271c   :  { %v3595_v1 = vsel %vm164_vm0, %v3573_v30, 0.0 }
0x271d   :  { %3584 = vadd.xlane.f32.xlu1 %v3583_v43 }
0x271f   :  { %3587 = vadd.xlane.f32.xlu2 %v3586_v35 }
0x2720   :  { %3590 = vadd.xlane.f32.xlu0 %v3589_v9 }
0x2725   :  { %3593 = vadd.xlane.f32.xlu1 %v3592_v22 }
0x2727   :  { %3596 = vadd.xlane.f32.xlu2 %v3595_v1 }
0x2788   :  { %v3576_v0 = vpop.xlane.xlu1 %3575 }
0x2789   :  { %v3606_v62 = vperm.slane %v3576_v0, %v4696_v24 }
0x278a   :  { %v3582_v54 = vpop.xlane.xlu2 %3581 }
0x278b   :  { %v3579_v39 = vpop.xlane.xlu0 %3578  ;;  %v3608_v52 = vperm.slane %v3582_v54, %v4696_v24 }
0x278c   :  { %v3607_v61 = vperm.slane %v3579_v39, %v4696_v24 }
0x278e   :  { %v3614_v14 = vsel %vm207_vm1, %v3607_v61, %v3606_v62 }
0x278f   :  { %v3615_v15 = vsel %vm209_vm2, %v3608_v52, %v3614_v14 }
0x2790   :  { %v3585_v46 = vpop.xlane.xlu1 %3584 }
0x2791   :  { %v3609_v3 = vperm.slane %v3585_v46, %v4696_v24 }
0x2792   :  { %v3588_v37 = vpop.xlane.xlu2 %3587 }
0x2793   :  { %v3610_v8 = vperm.slane %v3588_v37, %v4696_v24  ;;  %v3591_v12 = vpop.xlane.xlu0 %3590  ;;  %v3616_v47 = vsel %vm211_vm3, %v3609_v3, %v3615_v15 }
0x2794   :  { %v3611_v7 = vperm.slane %v3591_v12, %v4696_v24 }
0x2795   :  { %v3617_v4 = vsel %vm213_vm4, %v3610_v8, %v3616_v47  ;;  %v3756_v8 = vperm.slane %v6073_v16, 7  ;;  %v3777_v47 = vperm.slane %v6079_v36, 7 }
0x2796   :  { %v3618_v48 = vsel %vm215_vm5, %v3611_v7, %v3617_v4  ;;  %v3770_v7 = vperm.slane %v6103_v28, 7  ;;  %v3805_v28 = vperm.slane %v6097_v45, 7 }
0x2798   :  { %v3594_v50 = vpop.xlane.xlu1 %3593 }
0x2799   :  { %v3612_v31 = vperm.slane %v3594_v50, %v4696_v24 }
0x279a   :  { %v3597_v53 = vpop.xlane.xlu2 %3596 }
0x279b   :  { %v3613_v18 = vperm.slane %v3597_v53, %v4696_v24  ;;  %v3619_v26 = vsel %vm217_vm6, %v3612_v31, %v3618_v48  ;;  %v3784_v31 = vperm.slane %v6110_v32, 7 }
0x279d   :  { %v3620_v59 = vsel %vm219_vm7, %v3613_v18, %v3619_v26  ;;  %v3798_v18 = vperm.slane %v6123_v2, 7 }
0x279e   :  { %v3622_v11 = vsel %vm222_vm8, %v3620_v59, -inf }
0x279f   :  { %3623 = vmax.xlane.f32.xlu0 %v3622_v11 }
0x2812   :  { %v3624_v34 = vpop.xlane.xlu0 %3623 }
0x2813   :  { %v3626_v6 = vperm.slane %v3624_v34, 0  ;;  %v3627_v19 = vperm.slane %v3624_v34, 1  ;;  %v3628_v21 = vperm.slane %v3624_v34, 2  ;;  %v3630_v41 = vperm.slane %v3624_v34, 4 }
0x2814   :  { %v3629_v5 = vperm.slane %v3624_v34, 3  ;;  %v3631_v25 = vperm.slane %v3624_v34, 5  ;;  %v3633_v63 = vperm.slane %v3624_v34, 7  ;;  %v3632_v22 = vperm.slane %v3624_v34, 6 }
0x2815   :  { %v3642_v55 = vsub.f32 %v3576_v0, %v3626_v6  ;;  %v3643_v42 = vsub.f32 %v3579_v39, %v3627_v19  ;;  %v3644_v57 = vsub.f32 %v3582_v54, %v3628_v21  ;;  %v3646_v43 = vsub.f32 %v3588_v37, %v3630_v41 }
0x2816   :  { %v3647_v20 = vsub.f32 %v3591_v12, %v3631_v25  ;;  %v3645_v35 = vsub.f32 %v3585_v46, %v3629_v5  ;;  %v3649_v39 = vsub.f32 %v3597_v53, %v3633_v63  ;;  %v3648_v61 = vsub.f32 %v3594_v50, %v3632_v22 }
0x2817   :  { %v3650_v27 = vmul.f32 1.442695, %v3642_v55  ;;  %v3652_v33 = vmul.f32 1.442695, %v3643_v42  ;;  %v3654_v23 = vmul.f32 1.442695, %v3644_v57 }
0x2818   :  { %v3658_v9 = vmul.f32 1.442695, %v3646_v43  ;;  %v3660_v13 = vmul.f32 1.442695, %v3647_v20  ;;  %v3656_v1 = vmul.f32 1.442695, %v3645_v35 }
0x2819   :  { %4371 = vpow2.f32 %v3650_v27  ;;  %v3664_v62 = vmul.f32 1.442695, %v3649_v39  ;;  %v3662_v14 = vmul.f32 1.442695, %v3648_v61  ;;  %v3763_v12 = vperm.slane %v6091_v17, 7 }
0x281a   :  { %4373 = vpow2.f32 %v3652_v33  ;;  %v3791_v50 = vperm.slane %v6085_v56, 7 }
0x281b   :  { %4375 = vpow2.f32 %v3654_v23 }
0x281c   :  { %4377 = vpow2.f32 %v3658_v9 }
0x281d   :  { %4379 = vpow2.f32 %v3660_v13 }
0x281e   :  { %4381 = vpow2.f32 %v3656_v1 }
0x281f   :  { %v6223_v30 = vpop.eup %4371  ;;  %4383 = vpow2.f32 %v3664_v62 }
0x2820   :  { %v6225_v0 = vpop.eup %4373  ;;  %3675 = vperm.xlu1 %4048, %v6223_v30   ;;  %4385 = vpow2.f32 %v3662_v14 }
0x2821   :  { %v6228_v54 = vpop.eup %4375  ;;  %3678 = vperm.xlu2 %4052, %v6225_v0  }
0x2822   :  { %3681 = vperm.xlu0 %4053, %v6228_v54   ;;  %v6232_v52 = vpop.eup %4377 }
0x2823   :  { %v6234_v46 = vpop.eup %4379 }
0x2824   :  { %v6237_v3 = vpop.eup %4381 }
0x2825   :  { %v6241_v37 = vpop.eup %4383 }
0x2826   :  { %v6244_v15 = vpop.eup %4385 }
0x2828   :  { %3687 = vperm.xlu1 %4048, %v6232_v52  }
0x2829   :  { %3690 = vperm.xlu2 %4052, %v6234_v46  }
0x282a   :  { %3684 = vperm.xlu0 %4053, %v6237_v3  }
0x2830   :  { %3696 = vperm.xlu1 %4048, %v6241_v37  }
0x2832   :  { %3693 = vperm.xlu0 %4053, %v6244_v15  }
0x2838   :  { %4055 = vset.pattern.permute.xlu1 %v4742_v40 }
0x283a   :  { %4054 = vset.pattern.permute.xlu0 %v4742_v40 }
0x2840   :  { %3768 = vperm.xlu1 %4055, %v3763_v12  }
0x2842   :  { %3761 = vperm.xlu0 %4054, %v3756_v8  }
0x2848   :  { %3775 = vperm.xlu1 %4055, %v3770_v7  }
0x284a   :  { %3782 = vperm.xlu0 %4054, %v3777_v47  }
0x2850   :  { %3789 = vperm.xlu1 %4055, %v3784_v31  }
0x2852   :  { %3796 = vperm.xlu0 %4054, %v3791_v50  }
0x2858   :  { %3803 = vperm.xlu1 %4055, %v3798_v18  }
0x285a   :  { %3810 = vperm.xlu0 %4054, %v3805_v28  }
0x2860   :  { %4056 = vset.pattern.permute.xlu1 %v4507_v51 }
0x2862   :  { %4057 = vset.pattern.permute.xlu0 %v4507_v51 }
0x287b   :  { %v3679_v53 = vpop.permute.xlu2 %3678 }
0x287c   :  { %v3699_v16 = vperm.slane %v3679_v53, %v4696_v24 }
0x2883   :  { %v3691_v6 = vpop.permute.xlu2 %3690 }
0x2884   :  { %v3703_v45 = vperm.slane %v3691_v6, %v4696_v24 }
0x2892   :  { %v3676_v4 = vpop.permute.xlu1 %3675 }
0x2893   :  { %v3698_v40 = vperm.slane %v3676_v4, %v4696_v24 }
0x2894   :  { %v3682_v48 = vpop.permute.xlu0 %3681 }
0x2895   :  { %v3700_v36 = vperm.slane %v3682_v48, %v4696_v24  ;;  %v3706_v26 = vsel %vm207_vm1, %v3699_v16, %v3698_v40 }
0x2897   :  { %v3707_v59 = vsel %vm209_vm2, %v3700_v36, %v3706_v26 }
0x289a   :  { %v3688_v17 = vpop.permute.xlu1 %3687 }
0x289b   :  { %v3702_v11 = vperm.slane %v3688_v17, %v4696_v24 }
0x289c   :  { %v3685_v56 = vpop.permute.xlu0 %3684 }
0x289d   :  { %v3701_v32 = vperm.slane %v3685_v56, %v4696_v24 }
0x289f   :  { %v3708_v34 = vsel %vm211_vm3, %v3701_v32, %v3707_v59 }
0x28a0   :  { %v3709_v21 = vsel %vm213_vm4, %v3702_v11, %v3708_v34 }
0x28a1   :  { %v3710_v42 = vsel %vm215_vm5, %v3703_v45, %v3709_v21 }
0x28a2   :  { %v3697_v19 = vpop.permute.xlu1 %3696 }
0x28a3   :  { %v3705_v41 = vperm.slane %v3697_v19, %v4696_v24 }
0x28a4   :  { %v3694_v2 = vpop.permute.xlu0 %3693 }
0x28a5   :  { %v3704_v55 = vperm.slane %v3694_v2, %v4696_v24 }
0x28a7   :  { %v3711_v57 = vsel %vm217_vm6, %v3704_v55, %v3710_v42 }
0x28a8   :  { %v3712_v5 = vsel %vm219_vm7, %v3705_v41, %v3711_v57 }
0x28a9   :  { %v3714_v25 = vsel %vm222_vm8, %v3712_v5, 0.0 }
0x28aa   :  { %3715 = vadd.xlane.f32.xlu2 %v3714_v25 }
0x28b2   :  { %v3769_v63 = vpop.permute.xlu1 %3768 }
0x28b4   :  { %v3762_v27 = vpop.permute.xlu0 %3761 }
0x28ba   :  { %v3776_v7 = vpop.permute.xlu1 %3775 }
0x28bc   :  { %v3783_v20 = vpop.permute.xlu0 %3782 }
0x28c2   :  { %v3790_v32 = vpop.permute.xlu1 %3789 }
0x28c4   :  { %v3797_v14 = vpop.permute.xlu0 %3796 }
0x28cc   :  { %v3811_v18 = vpop.permute.xlu0 %3810 }
0x291d   :  { %v3716_v33 = vpop.xlane.xlu2 %3715 }
0x291e   :  { %4387 = vrcp.f32 %v3716_v33  ;;  %v3728_v9 = vand.u32 2147483648, %v3716_v33  ;;  %v3726_v22 = vand.u32 2147483647, %v3716_v33  ;;  %vm3722_vm11 = vweird.f32 %v3716_v33 }
0x2920   :  { %v3729_v51 = vor.u32 1.1754944e-38, %v3728_v9  ;;  %vm3727_vm14 = vcmp.eq.f32.partialorder %v3726_v22, 8.507059e+37  ;;  %v3845_v22 = vpop.f32.mrf.mxu1 }
0x2924   :  { %v4388_v23 = vpop.eup %4387 }
0x2925   :  { %v3718_v43 = vmul.f32 %v4388_v23, %v3716_v33  ;;  %vm3723_vm0 = vweird.f32 %v4388_v23 }
0x2926   :  { %vm3724_vm13 = vmor %vm3722_vm11, %vm3723_vm0 }
0x2927   :  { %v3719_v35 = vsub.f32 1.0, %v3718_v43 }
0x2929   :  { %v3720_v13 = vmul.f32 %v4388_v23, %v3719_v35 }
0x292b   :  { %v3721_v1 = vadd.f32 %v4388_v23, %v3720_v13 }
0x292d   :  { %v3725_v39 = vsel %vm3724_vm13, %v4388_v23, %v3721_v1 }
0x292e   :  { %v3730_v61 = vsel %vm3727_vm14, %v3729_v51, %v3725_v39 }
0x292f   :  { %v3734_v62 = vperm.slane %v3730_v61, 2  ;;  %v3732_v8 = vperm.slane %v3730_v61, 0  ;;  %v3733_v12 = vperm.slane %v3730_v61, 1  ;;  %v3737_v48 = vperm.slane %v3730_v61, 5 }
0x2930   :  { %v3735_v53 = vperm.slane %v3730_v61, 3  ;;  %v3739_v40 = vperm.slane %v3730_v61, 7  ;;  %v3736_v56 = vperm.slane %v3730_v61, 4  ;;  %v3738_v34 = vperm.slane %v3730_v61, 6 }
0x2931   :  { %v3750_v47 = vmul.f32 %v6228_v54, %v3734_v62  ;;  %v3748_v4 = vmul.f32 %v6223_v30, %v3732_v8  ;;  %v3749_v50 = vmul.f32 %v6225_v0, %v3733_v12  ;;  %v3753_v36 = vmul.f32 %v6234_v46, %v3737_v48 }
0x2932   :  { %v3751_v28 = vmul.f32 %v6237_v3, %v3735_v53  ;;  %v3755_v54 = vmul.f32 %v6241_v37, %v3739_v40  ;;  %v3752_v59 = vmul.f32 %v6232_v52, %v3736_v56  ;;  %v3754_v46 = vmul.f32 %v6244_v15, %v3738_v34  ;;  %v3804_v3 = vpop.permute.xlu1 %3803 }
0x2933   :  { %v3822_v31 = vmul.f32 %v3776_v7, %v3750_v47  ;;  %v3820_v16 = vmul.f32 %v3762_v27, %v3748_v4  ;;  %v3821_v17 = vmul.f32 %v3769_v63, %v3749_v50  ;;  %v3825_v26 = vmul.f32 %v3797_v14, %v3753_v36 }
0x2934   :  { %v3823_v30 = vmul.f32 %v3783_v20, %v3751_v28  ;;  %v3827_v0 = vmul.f32 %v3811_v18, %v3755_v54  ;;  %v3824_v11 = vmul.f32 %v3790_v32, %v3752_v59  ;;  %v3826_v37 = vmul.f32 %v3804_v3, %v3754_v46 }
0x2935   :  { %3863 = vperm.xlu0 %4057, %v3822_v31   ;;  %3857 = vperm.xlu1 %4056, %v3820_v16  }
0x2936   :  { %3860 = vperm.xlu2 %4052, %v3821_v17  }
0x293d   :  { %3872 = vperm.xlu0 %4057, %v3825_v26   ;;  %3866 = vperm.xlu1 %4056, %v3823_v30  }
0x293e   :  { %3878 = vperm.xlu2 %4052, %v3827_v0  }
0x2945   :  { %3869 = vperm.xlu1 %4056, %v3824_v11  }
0x2946   :  { %1054 = vrot.lane.b32.xlu2 %v5048_v49, %s4508_s10 }
0x294d   :  { %3875 = vperm.xlu1 %4056, %v3826_v37  }
0x294e   :  { %1539 = vrot.lane.b32.xlu2 %v5340_v58, %s4510_s12 }
0x2990   :  { %v3861_v6 = vpop.permute.xlu2 %3860 }
0x2991   :  { %v3881_v2 = vperm.slane %v3861_v6, %v4696_v24 }
0x2998   :  { %v3879_v19 = vpop.permute.xlu2 %3878 }
0x2999   :  { %v3887_v35 = vperm.slane %v3879_v19, %v4696_v24 }
0x29a0   :  { %v1055_v21 = vpop.permute.xlu2 %1054 }
0x29a1   :  { %1058 = vst.msk [vmem:[#allocation2] sm:$0xff] %vm1057_vm15, %v1055_v21 }
0x29a7   :  { %v3858_v45 = vpop.permute.xlu1 %3857  ;;  %v3864_v15 = vpop.permute.xlu0 %3863 }
0x29a8   :  { %v1540_v52 = vpop.permute.xlu2 %1539  ;;  %v3880_v58 = vperm.slane %v3858_v45, %v4696_v24  ;;  %v3882_v55 = vperm.slane %v3864_v15, %v4696_v24 }
0x29a9   :  { %1543 = vst.msk [vmem:[#allocation2] sm:$0xff] %vm1542_vm9, %v1540_v52 }
0x29aa   :  { %2024 = vst.msk [vmem:[#allocation2] sm:$0xff] %vm2023_vm10, %v5523_v29  ;;  %v3888_v42 = vsel %vm207_vm1, %v3881_v2, %v3880_v58 }
0x29ab   :  { %v3889_v27 = vsel %vm209_vm2, %v3882_v55, %v3888_v42 }
0x29af   :  { %v3867_v49 = vpop.permute.xlu1 %3866  ;;  %v3873_v25 = vpop.permute.xlu0 %3872 }
0x29b0   :  { %v3883_v57 = vperm.slane %v3867_v49, %v4696_v24  ;;  %v3885_v23 = vperm.slane %v3873_v25, %v4696_v24 }
0x29b2   :  { %v3890_v29 = vsel %vm211_vm3, %v3883_v57, %v3889_v27 }
0x29b7   :  { %v3870_v41 = vpop.permute.xlu1 %3869 }
0x29b8   :  { %v3884_v5 = vperm.slane %v3870_v41, %v4696_v24 }
0x29ba   :  { %v3891_v33 = vsel %vm213_vm4, %v3884_v5, %v3890_v29 }
0x29bb   :  { %v3892_v63 = vsel %vm215_vm5, %v3885_v23, %v3891_v33 }
0x29bf   :  { %v3876_v43 = vpop.permute.xlu1 %3875 }
0x29c0   :  { %v3886_v20 = vperm.slane %v3876_v43, %v4696_v24 }
0x29c2   :  { %v3893_v9 = vsel %vm217_vm6, %v3886_v20, %v3892_v63 }
0x29c3   :  { %v3894_v13 = vsel %vm219_vm7, %v3887_v35, %v3893_v9 }
0x29c4   :  { %4015 = vmatmul.msk.f32.vlgmr.msrb.gmra.mxu2 %vm222_vm8, %v3894_v13 }
0x2a47   :  { %v3914_v1 = vpop.f32.mrf.mxu2 }
0x2a48   :  { %v3915_v51 = vadd.f32 %v3914_v1, %v3845_v22 }
0x2a4a   :  { %v3917_v39 = vadd.f32 %v6163_v60, %v3915_v51 }
0x2a4c   :  { %4389 = vtanh.f32 %v3917_v39  ;;  %v4016_v24 = vmul.f32 -1.442695, %v3917_v39 }
0x2a4e   :  { %4391 = vpow2.f32 %v4016_v24 }
0x2a52   :  { %v4390_v61 = vpop.eup %4389 }
0x2a53   :  { %3940 = vrot.lane.b32.xlu0 %v4390_v61, %s4508_s10 }
0x2a54   :  { %v4392_v62 = vpop.eup %4391 }
0x2a55   :  { %v3921_v14 = vadd.f32 1.0, %v4392_v62 }
0x2a57   :  { %4393 = vrcp.f32 %v3921_v14  ;;  %v3933_v4 = vand.u32 2147483648, %v3921_v14  ;;  %vm3927_vm2 = vweird.f32 %v3921_v14  ;;  %v3931_v50 = vand.u32 2147483647, %v3921_v14 }
0x2a59   :  { %vm3932_vm4 = vcmp.eq.f32.partialorder %v3931_v50, 8.507059e+37 }
0x2a5b   :  { %2988 = vrot.lane.b32.xlu0 %v5947_v44, %s4508_s10  ;;  %v3934_v44 = vor.u32 1.1754944e-38, %v3933_v4 }
0x2a5d   :  { %v4394_v8 = vpop.eup %4393 }
0x2a5e   :  { %v3923_v12 = vmul.f32 %v4394_v8, %v3921_v14  ;;  %vm3928_vm1 = vweird.f32 %v4394_v8 }
0x2a5f   :  { %vm3929_vm3 = vmor %vm3927_vm2, %vm3928_vm1 }
0x2a60   :  { %v3924_v47 = vsub.f32 1.0, %v3923_v12 }
0x2a62   :  { %v3925_v7 = vmul.f32 %v4394_v8, %v3924_v47 }
0x2a63   :  { %3472 = vrot.lane.b32.xlu0 %v6176_v38, %s4510_s12  ;;  %s3961_s12 = sshll.u32 %s4511_s8, 4  ;;  %s3962_s12 = int_to_ptr.vmem [resolvable:$true] %s3961_s12 }
0x2a64   :  { %v3926_v60 = vadd.f32 %v4394_v8, %v3925_v7 }
0x2a66   :  { %v3930_v31 = vsel %vm3929_vm3, %v4394_v8, %v3926_v60 }
0x2a67   :  { %v3935_v38 = vsel %vm3932_vm4, %v3934_v44, %v3930_v31 }
0x2a68   :  { %v3938_v17 = vmul.f32 %v3935_v38, %v6169_v10 }
0x2ac5   :  { %v3941_v48 = vpop.permute.xlu0 %3940 }
0x2ac6   :  { %v3943_v53 = vmul.f32 %v3941_v48, %v3935_v38 }
0x2ac8   :  { %3945 = vrot.lane.b32.xlu1 %v3943_v53, %s4509_s11  ;;  %s3963_s11 = sshll.u32 %s6331_s9, 4  ;;  %s3964_s11 = int_to_ptr.hbm [resolvable:$true] %s3963_s11 }
0x2acd   :  { %v2989_v40 = vpop.permute.xlu0 %2988 }
0x2ace   :  { %2991 = vst.msk [vmem:[#allocation2 + $0x8] sm:$0xff] %vm1057_vm15, %v2989_v40 }
0x2ad5   :  { %v3473_v16 = vpop.permute.xlu0 %3472 }
0x2ad6   :  { %3475 = vst.msk [vmem:[#allocation2 + $0x8] sm:$0xff] %vm1542_vm9, %v3473_v16 }
0x2b3a   :  { %v3946_v36 = vpop.permute.xlu1 %3945 }
0x2b3b   :  { %v3948_v28 = vadd.f32 %v3946_v36, %v3938_v17 }
0x2b3d   :  { %4395 = vtanh.f32 %v3948_v28 }
0x2b43   :  { %v4396_v54 = vpop.eup %4395 }
0x2b44   :  { %3951 = vrot.lane.b32.xlu1 %v4396_v54, %s4508_s10 }
0x2bb6   :  { %v3952_v18 = vpop.permute.xlu1 %3951 }
0x2bb7   :  { %v3954_v26 = vmul.f32 %v3952_v18, %v3935_v38 }
0x2bb9   :  { %3955 = vst.msk [vmem:[#allocation2 + $0x8] sm:$0xff] %vm2023_vm10, %v3954_v26 }
0x2bba   :  { %3966 = dma.vmem_to_hbm [thread:$0]  %s3962_s12, 256, %s3964_s11, [#allocation3]  }
0x2bbb   :  { %4504 = dma.done.wait [#allocation3], 256  }
0x2bbc   :  { %4505 = vsyncadd [#allocation3], 4294967040 }
0x2bbd   :  { %3971 = vsyncpa [#allocation3], 1 }

</bundles_post_ra>
